<compile_context>
chip_gen: v7x
topology: tpu7x:2x2x1
jax: 0.10.0
libtpu: 0.0.40
codegen_flags: <defaults>
</compile_context>

<pallas_src>
import numpy as np
import jax
import jax.numpy as jnp
from jax import lax
from jax.experimental import pallas as pl
from jax.experimental.pallas import tpu as pltpu

# ---------------- configuration ----------------
INPLANES = 64
PLANES = 16
BASEWIDTH = 26
SCALE = 4
EXPANSION = 4
WIDTH = int(np.floor(PLANES * (BASEWIDTH / 64.0)))   # 6
NUMS = SCALE - 1                                      # 3
OUTC = PLANES * EXPANSION                             # 64
N, H, W = 2, 16, 16
NHW = N * H * W                                       # 512
EPS = 1e-5

# tap order == ky*3 + kx, matching the weight packing below
TAPS = tuple((dy, dx) for dy in (-1, 0, 1) for dx in (-1, 0, 1))


# ---------------- Pallas kernel ----------------
def _bn_train(x, gamma, beta):
    # training-mode BatchNorm2d on a (C, NHW) tile: per-channel stats over the
    # lane (row) axis, biased variance, single pass (var = E[x^2] - mean^2).
    mean = jnp.mean(x, axis=1, keepdims=True)
    meansq = jnp.mean(x * x, axis=1, keepdims=True)
    var = jnp.maximum(meansq - mean * mean, 0.0)
    return (x - mean) * (gamma * lax.rsqrt(var + EPS)) + beta


def bottle2neck_kernel(x_ref, mask_ref, w1_ref, g1_ref, b1_ref, wk_ref, gk_ref,
                       bk_ref, w3_ref, g3_ref, b3_ref, out_ref):
    x = x_ref[...]                                    # (INPLANES, NHW) f32

    # conv1 (1x1) fused over all `scale` chunks + bn1 + relu.
    y1 = jnp.dot(w1_ref[...], x.astype(jnp.bfloat16),
                 preferred_element_type=jnp.float32)  # (WIDTH*SCALE, NHW) f32
    y1 = jnp.maximum(_bn_train(y1, g1_ref[...], b1_ref[...]), 0.0)

    mask = mask_ref[...]                              # (9*WIDTH, NHW) f32, precomputed

    def conv3x3(sp, branch):
        # im2col via XLU lane rolls (source column = p + dy*W + dx), one f32
        # boundary-mask multiply on the whole (9*WIDTH, NHW) col, then a single
        # (WIDTH, 9*WIDTH) @ (9*WIDTH, NHW) MXU matmul.
        cols = []
        for dy, dx in TAPS:
            shift = (-(dy * W + dx)) % NHW
            cols.append(sp if shift == 0 else pltpu.roll(sp, shift, 1))
        col = jnp.concatenate(cols, axis=0) * mask    # (9*WIDTH, NHW)
        return jnp.dot(wk_ref[branch], col.astype(jnp.bfloat16),
                       preferred_element_type=jnp.float32)

    # Res2Net branch convs (sequential data dependency) + bn_i + relu.
    pieces = []
    sp = None
    for i in range(NUMS):
        chunk = y1[i * WIDTH:(i + 1) * WIDTH, :]      # torch.split: sublane slice
        sp = chunk if i == 0 else sp + chunk
        sp = jnp.maximum(_bn_train(conv3x3(sp, i), gk_ref[i], bk_ref[i]), 0.0)
        pieces.append(sp)
    pieces.append(y1[NUMS * WIDTH:, :])               # scale != 1, stype == 'normal'

    # conv3 (1x1) on the channel concatenation (cheap sublane stack) + bn3 +
    # residual + relu.
    cat = jnp.concatenate(pieces, axis=0)             # (WIDTH*SCALE, NHW)
    y3 = jnp.dot(w3_ref[...], cat.astype(jnp.bfloat16),
                 preferred_element_type=jnp.float32)  # (OUTC, NHW)
    out = _bn_train(y3, g3_ref[...], b3_ref[...]) + x   # residual (downsample None)
    out_ref[...] = jnp.maximum(out, 0.0)              # lane-dense (64, 512) store


def bottle2neck_pallas(x_cols, tap_mask, kparams):
    args = (x_cols, tap_mask) + tuple(kparams)
    in_specs = [pl.BlockSpec(memory_space=pltpu.MemorySpace.VMEM) for _ in args]
    return pl.pallas_call(
        bottle2neck_kernel,
        out_shape=jax.ShapeDtypeStruct((OUTC, NHW), jnp.float32),
        in_specs=in_specs,
        out_specs=pl.BlockSpec(memory_space=pltpu.MemorySpace.VMEM),
        compiler_params=pltpu.CompilerParams(vmem_limit_bytes=16 * 1024 * 1024),
    )(*args)


# ---------------- parameter / mask setup (glue, plain JAX / numpy) ----------
def init_params(key):
    ks = jax.random.split(key, 9)
    p = {
        "W1": jax.random.normal(ks[0], (WIDTH * SCALE, INPLANES), jnp.float32)
              / np.sqrt(INPLANES),
        "Wk": jax.random.normal(ks[1], (NUMS, WIDTH, WIDTH, 3, 3), jnp.float32)
              / np.sqrt(9 * WIDTH),
        "W3": jax.random.normal(ks[2], (OUTC, WIDTH * SCALE), jnp.float32)
              / np.sqrt(WIDTH * SCALE),
        "g1": 1.0 + 0.1 * jax.random.normal(ks[3], (WIDTH * SCALE,), jnp.float32),
        "b1": 0.1 * jax.random.normal(ks[4], (WIDTH * SCALE,), jnp.float32),
        "gk": 1.0 + 0.1 * jax.random.normal(ks[5], (NUMS, WIDTH), jnp.float32),
        "bk": 0.1 * jax.random.normal(ks[6], (NUMS, WIDTH), jnp.float32),
        "g3": 1.0 + 0.1 * jax.random.normal(ks[7], (OUTC,), jnp.float32),
        "b3": 0.1 * jax.random.normal(ks[8], (OUTC,), jnp.float32),
    }
    return p


def pack_kernel_params(p):
    # (C, NHW) layout: conv weights keep their PyTorch (out, in) orientation
    # and are stored in bf16 (matmul LHS); BN params stay f32 as (C, 1) columns.
    w1 = jnp.asarray(p["W1"], jnp.bfloat16)                         # (24, 64)
    g1 = p["g1"].reshape(WIDTH * SCALE, 1)
    b1 = p["b1"].reshape(WIDTH * SCALE, 1)
    # Wk: (nums, O, I, ky, kx) -> (nums, O, ky, kx, I) -> (nums, O, 9*I), so
    # column index = (ky*3 + kx)*WIDTH + i matches the kernel's im2col row order.
    wk = jnp.asarray(
        jnp.transpose(p["Wk"], (0, 1, 3, 4, 2)).reshape(NUMS, WIDTH, 9 * WIDTH),
        jnp.bfloat16)
    gk = p["gk"].reshape(NUMS, WIDTH, 1)
    bk = p["bk"].reshape(NUMS, WIDTH, 1)
    w3 = jnp.asarray(p["W3"], jnp.bfloat16)                         # (64, 24)
    g3 = p["g3"].reshape(OUTC, 1)
    b3 = p["b3"].reshape(OUTC, 1)
    return (w1, g1, b1, wk, gk, bk, w3, g3, b3)


def build_tap_mask():
    # Validity of the 9 taps of a zero-padded 3x3 conv per flattened column
    # (row id = n*H*W + h*W + w), repeated WIDTH times per tap -> (9*WIDTH, NHW).
    rows = np.arange(NHW)
    h_id = (rows // W) % H
    w_id = rows % W
    blocks = []
    for dy, dx in TAPS:
        valid = ((h_id + dy >= 0) & (h_id + dy < H) &
                 (w_id + dx >= 0) & (w_id + dx < W)).astype(np.float32)
        blocks.append(np.repeat(valid[None, :], WIDTH, axis=0))
    return jnp.asarray(np.concatenate(blocks, axis=0))              # (54, 512)


# ---------------- pure-JAX reference (NCHW, mirrors the PyTorch module) -------
def ref_forward(x, p):
    def conv(v, w, pad):
        return lax.conv_general_dilated(v, w, (1, 1), pad,
                                        dimension_numbers=("NCHW", "OIHW", "NCHW"),
                                        precision=lax.Precision.HIGHEST)

    def bn(v, g, b):
        mean = jnp.mean(v, axis=(0, 2, 3), keepdims=True)
        var = jnp.mean((v - mean) ** 2, axis=(0, 2, 3), keepdims=True)
        return ((v - mean) * (g[None, :, None, None] * lax.rsqrt(var + EPS))
                + b[None, :, None, None])

    relu = lambda v: jnp.maximum(v, 0.0)
    out = relu(bn(conv(x, p["W1"][:, :, None, None], "VALID"), p["g1"], p["b1"]))
    spx = [out[:, i * WIDTH:(i + 1) * WIDTH] for i in range(SCALE)]
    pieces = []
    sp = None
    for i in range(NUMS):
        sp = spx[i] if i == 0 else sp + spx[i]
        sp = conv(sp, p["Wk"][i], ((1, 1), (1, 1)))
        sp = relu(bn(sp, p["gk"][i], p["bk"][i]))
        pieces.append(sp)
    pieces.append(spx[NUMS])                     # scale != 1, stype == 'normal'
    cat = jnp.concatenate(pieces, axis=1)
    out = bn(conv(cat, p["W3"][:, :, None, None], "VALID"), p["g3"], p["b3"])
    out = out + x                                # residual (downsample is None)
    return relu(out)


# ---------------- main ----------------
if __name__ == "__main__":
    key = jax.random.PRNGKey(0)
    kx, kp = jax.random.split(key)
    x = jax.random.normal(kx, (N, INPLANES, H, W), jnp.float32)   # NCHW like PyTorch
    params = init_params(kp)
    kparams = pack_kernel_params(params)
    tap_mask = build_tap_mask()

    # NCHW -> (C, N*H*W) channels-on-sublanes / rows-on-lanes layout.
    x_cols = jnp.transpose(x, (1, 0, 2, 3)).reshape(INPLANES, NHW)
    out_cols = bottle2neck_pallas(x_cols, tap_mask, kparams)
    out = jnp.transpose(out_cols.reshape(OUTC, N, H, W), (1, 0, 2, 3))
    jax.block_until_ready(out)

    ref = ref_forward(x, params)
    # Kernel uses bf16 matmul inputs with f32 accumulation; the reference is f32
    # HIGHEST precision, so the tolerance is sized for bf16 rounding (~1e-2 rel).
    err = float(jnp.max(jnp.abs(out - ref)))
    assert err < 1e-1, f"max abs error {err}"
    print("KERNEL_OK")
</pallas_src>

<mosaic_0001>
module attributes {stable_mosaic.version = 11 : i64} {
  func.func @bottle2neck_kernel(%arg0: memref<64x512xf32, #tpu.memory_space<vmem>>, %arg1: memref<54x512xf32, #tpu.memory_space<vmem>>, %arg2: memref<24x64xbf16, #tpu.memory_space<vmem>>, %arg3: memref<24x1xf32, #tpu.memory_space<vmem>>, %arg4: memref<24x1xf32, #tpu.memory_space<vmem>>, %arg5: memref<3x6x54xbf16, #tpu.memory_space<vmem>>, %arg6: memref<3x6x1xf32, #tpu.memory_space<vmem>>, %arg7: memref<3x6x1xf32, #tpu.memory_space<vmem>>, %arg8: memref<64x24xbf16, #tpu.memory_space<vmem>>, %arg9: memref<64x1xf32, #tpu.memory_space<vmem>>, %arg10: memref<64x1xf32, #tpu.memory_space<vmem>>, %arg11: memref<64x512xf32, #tpu.memory_space<vmem>>) attributes {dimension_semantics = [], scalar_prefetch = 0 : i64, scratch_operands = 0 : i64, tpu.core_type = #tpu.core_type<tc>} {
    %c0 = arith.constant 0 : index
    %c0_0 = arith.constant 0 : index
    %0 = vector.load %arg0[%c0, %c0_0] : memref<64x512xf32, #tpu.memory_space<vmem>>, vector<64x512xf32>
    %c0_1 = arith.constant 0 : index
    %c0_2 = arith.constant 0 : index
    %1 = vector.load %arg2[%c0_1, %c0_2] : memref<24x64xbf16, #tpu.memory_space<vmem>>, vector<24x64xbf16>
    %2 = arith.truncf %0 : vector<64x512xf32> to vector<64x512xbf16>
    %cst = arith.constant dense<0.000000e+00> : vector<24x512xf32>
    %3 = tpu.matmul %1, %2, %cst {dimension_numbers = #tpu.dot_dimension_numbers<[1], [0], [0], [1], [0, 0, 1, 1], [], []>} : vector<24x64xbf16>, vector<64x512xbf16>, vector<24x512xf32> -> vector<24x512xf32>
    %c0_3 = arith.constant 0 : index
    %c0_4 = arith.constant 0 : index
    %4 = vector.load %arg3[%c0_3, %c0_4] : memref<24x1xf32, #tpu.memory_space<vmem>>, vector<24x1xf32>
    %c0_5 = arith.constant 0 : index
    %c0_6 = arith.constant 0 : index
    %5 = vector.load %arg4[%c0_5, %c0_6] : memref<24x1xf32, #tpu.memory_space<vmem>>, vector<24x1xf32>
    %cst_7 = arith.constant dense<0.000000e+00> : vector<24xf32>
    %6 = vector.multi_reduction <add>, %3, %cst_7 [1] : vector<24x512xf32> to vector<24xf32>
    %7 = vector.shape_cast %6 : vector<24xf32> to vector<24x1xf32>
    %cst_8 = arith.constant 5.120000e+02 : f32
    %8 = vector.broadcast %cst_8 : f32 to vector<24x1xf32>
    %9 = arith.divf %7, %8 : vector<24x1xf32>
    %10 = arith.mulf %3, %3 : vector<24x512xf32>
    %cst_9 = arith.constant dense<0.000000e+00> : vector<24xf32>
    %11 = vector.multi_reduction <add>, %10, %cst_9 [1] : vector<24x512xf32> to vector<24xf32>
    %12 = vector.shape_cast %11 : vector<24xf32> to vector<24x1xf32>
    %cst_10 = arith.constant 5.120000e+02 : f32
    %13 = vector.broadcast %cst_10 : f32 to vector<24x1xf32>
    %14 = arith.divf %12, %13 : vector<24x1xf32>
    %15 = arith.mulf %9, %9 : vector<24x1xf32>
    %16 = arith.subf %14, %15 : vector<24x1xf32>
    %cst_11 = arith.constant 0.000000e+00 : f32
    %17 = vector.broadcast %cst_11 : f32 to vector<24x1xf32>
    %18 = arith.maximumf %16, %17 : vector<24x1xf32>
    %19 = vector.broadcast %9 : vector<24x1xf32> to vector<24x512xf32>
    %20 = arith.subf %3, %19 : vector<24x512xf32>
    %cst_12 = arith.constant 9.99999974E-6 : f32
    %21 = vector.broadcast %cst_12 : f32 to vector<24x1xf32>
    %22 = arith.addf %18, %21 : vector<24x1xf32>
    %23 = math.rsqrt %22 : vector<24x1xf32>
    %24 = arith.mulf %4, %23 : vector<24x1xf32>
    %25 = vector.broadcast %24 : vector<24x1xf32> to vector<24x512xf32>
    %26 = arith.mulf %20, %25 : vector<24x512xf32>
    %27 = vector.broadcast %5 : vector<24x1xf32> to vector<24x512xf32>
    %28 = arith.addf %26, %27 : vector<24x512xf32>
    %cst_13 = arith.constant 0.000000e+00 : f32
    %29 = vector.broadcast %cst_13 : f32 to vector<24x512xf32>
    %30 = arith.maximumf %28, %29 : vector<24x512xf32>
    %c0_14 = arith.constant 0 : index
    %c0_15 = arith.constant 0 : index
    %31 = vector.load %arg1[%c0_14, %c0_15] : memref<54x512xf32, #tpu.memory_space<vmem>>, vector<54x512xf32>
    %32 = vector.extract_strided_slice %30 {offsets = [0, 0], sizes = [6, 512], strides = [1, 1]} : vector<24x512xf32> to vector<6x512xf32>
    %c17_i32 = arith.constant 17 : i32
    %33 = tpu.dynamic_rotate %32 by %c17_i32 dim 1 : vector<6x512xf32>, i32 -> vector<6x512xf32>
    %c16_i32 = arith.constant 16 : i32
    %34 = tpu.dynamic_rotate %32 by %c16_i32 dim 1 : vector<6x512xf32>, i32 -> vector<6x512xf32>
    %c15_i32 = arith.constant 15 : i32
    %35 = tpu.dynamic_rotate %32 by %c15_i32 dim 1 : vector<6x512xf32>, i32 -> vector<6x512xf32>
    %c1_i32 = arith.constant 1 : i32
    %36 = tpu.dynamic_rotate %32 by %c1_i32 dim 1 : vector<6x512xf32>, i32 -> vector<6x512xf32>
    %c511_i32 = arith.constant 511 : i32
    %37 = tpu.dynamic_rotate %32 by %c511_i32 dim 1 : vector<6x512xf32>, i32 -> vector<6x512xf32>
    %c497_i32 = arith.constant 497 : i32
    %38 = tpu.dynamic_rotate %32 by %c497_i32 dim 1 : vector<6x512xf32>, i32 -> vector<6x512xf32>
    %c496_i32 = arith.constant 496 : i32
    %39 = tpu.dynamic_rotate %32 by %c496_i32 dim 1 : vector<6x512xf32>, i32 -> vector<6x512xf32>
    %c495_i32 = arith.constant 495 : i32
    %40 = tpu.dynamic_rotate %32 by %c495_i32 dim 1 : vector<6x512xf32>, i32 -> vector<6x512xf32>
    %41 = tpu.concatenate %33, %34, %35, %36, %32, %37, %38, %39, %40 in 0 : vector<6x512xf32>, vector<6x512xf32>, vector<6x512xf32>, vector<6x512xf32>, vector<6x512xf32>, vector<6x512xf32>, vector<6x512xf32>, vector<6x512xf32>, vector<6x512xf32> -> vector<54x512xf32>
    %42 = arith.mulf %41, %31 : vector<54x512xf32>
    %c0_16 = arith.constant 0 : index
    %c0_17 = arith.constant 0 : index
    %c0_18 = arith.constant 0 : index
    %43 = vector.load %arg5[%c0_16, %c0_17, %c0_18] : memref<3x6x54xbf16, #tpu.memory_space<vmem>>, vector<1x6x54xbf16>
    %44 = vector.shape_cast %43 : vector<1x6x54xbf16> to vector<6x54xbf16>
    %45 = arith.truncf %42 : vector<54x512xf32> to vector<54x512xbf16>
    %cst_19 = arith.constant dense<0.000000e+00> : vector<6x512xf32>
    %46 = tpu.matmul %44, %45, %cst_19 {dimension_numbers = #tpu.dot_dimension_numbers<[1], [0], [0], [1], [0, 0, 1, 1], [], []>} : vector<6x54xbf16>, vector<54x512xbf16>, vector<6x512xf32> -> vector<6x512xf32>
    %c0_20 = arith.constant 0 : index
    %c0_21 = arith.constant 0 : index
    %c0_22 = arith.constant 0 : index
    %47 = vector.load %arg6[%c0_20, %c0_21, %c0_22] : memref<3x6x1xf32, #tpu.memory_space<vmem>>, vector<1x6x1xf32>
    %48 = vector.shape_cast %47 : vector<1x6x1xf32> to vector<6x1xf32>
    %c0_23 = arith.constant 0 : index
    %c0_24 = arith.constant 0 : index
    %c0_25 = arith.constant 0 : index
    %49 = vector.load %arg7[%c0_23, %c0_24, %c0_25] : memref<3x6x1xf32, #tpu.memory_space<vmem>>, vector<1x6x1xf32>
    %50 = vector.shape_cast %49 : vector<1x6x1xf32> to vector<6x1xf32>
    %cst_26 = arith.constant dense<0.000000e+00> : vector<6xf32>
    %51 = vector.multi_reduction <add>, %46, %cst_26 [1] : vector<6x512xf32> to vector<6xf32>
    %52 = vector.shape_cast %51 : vector<6xf32> to vector<6x1xf32>
    %cst_27 = arith.constant 5.120000e+02 : f32
    %53 = vector.broadcast %cst_27 : f32 to vector<6x1xf32>
    %54 = arith.divf %52, %53 : vector<6x1xf32>
    %55 = arith.mulf %46, %46 : vector<6x512xf32>
    %cst_28 = arith.constant dense<0.000000e+00> : vector<6xf32>
    %56 = vector.multi_reduction <add>, %55, %cst_28 [1] : vector<6x512xf32> to vector<6xf32>
    %57 = vector.shape_cast %56 : vector<6xf32> to vector<6x1xf32>
    %cst_29 = arith.constant 5.120000e+02 : f32
    %58 = vector.broadcast %cst_29 : f32 to vector<6x1xf32>
    %59 = arith.divf %57, %58 : vector<6x1xf32>
    %60 = arith.mulf %54, %54 : vector<6x1xf32>
    %61 = arith.subf %59, %60 : vector<6x1xf32>
    %cst_30 = arith.constant 0.000000e+00 : f32
    %62 = vector.broadcast %cst_30 : f32 to vector<6x1xf32>
    %63 = arith.maximumf %61, %62 : vector<6x1xf32>
    %64 = vector.broadcast %54 : vector<6x1xf32> to vector<6x512xf32>
    %65 = arith.subf %46, %64 : vector<6x512xf32>
    %cst_31 = arith.constant 9.99999974E-6 : f32
    %66 = vector.broadcast %cst_31 : f32 to vector<6x1xf32>
    %67 = arith.addf %63, %66 : vector<6x1xf32>
    %68 = math.rsqrt %67 : vector<6x1xf32>
    %69 = arith.mulf %48, %68 : vector<6x1xf32>
    %70 = vector.broadcast %69 : vector<6x1xf32> to vector<6x512xf32>
    %71 = arith.mulf %65, %70 : vector<6x512xf32>
    %72 = vector.broadcast %50 : vector<6x1xf32> to vector<6x512xf32>
    %73 = arith.addf %71, %72 : vector<6x512xf32>
    %cst_32 = arith.constant 0.000000e+00 : f32
    %74 = vector.broadcast %cst_32 : f32 to vector<6x512xf32>
    %75 = arith.maximumf %73, %74 : vector<6x512xf32>
    %76 = vector.extract_strided_slice %30 {offsets = [6, 0], sizes = [6, 512], strides = [1, 1]} : vector<24x512xf32> to vector<6x512xf32>
    %77 = arith.addf %75, %76 : vector<6x512xf32>
    %c17_i32_33 = arith.constant 17 : i32
    %78 = tpu.dynamic_rotate %77 by %c17_i32_33 dim 1 : vector<6x512xf32>, i32 -> vector<6x512xf32>
    %c16_i32_34 = arith.constant 16 : i32
    %79 = tpu.dynamic_rotate %77 by %c16_i32_34 dim 1 : vector<6x512xf32>, i32 -> vector<6x512xf32>
    %c15_i32_35 = arith.constant 15 : i32
    %80 = tpu.dynamic_rotate %77 by %c15_i32_35 dim 1 : vector<6x512xf32>, i32 -> vector<6x512xf32>
    %c1_i32_36 = arith.constant 1 : i32
    %81 = tpu.dynamic_rotate %77 by %c1_i32_36 dim 1 : vector<6x512xf32>, i32 -> vector<6x512xf32>
    %c511_i32_37 = arith.constant 511 : i32
    %82 = tpu.dynamic_rotate %77 by %c511_i32_37 dim 1 : vector<6x512xf32>, i32 -> vector<6x512xf32>
    %c497_i32_38 = arith.constant 497 : i32
    %83 = tpu.dynamic_rotate %77 by %c497_i32_38 dim 1 : vector<6x512xf32>, i32 -> vector<6x512xf32>
    %c496_i32_39 = arith.constant 496 : i32
    %84 = tpu.dynamic_rotate %77 by %c496_i32_39 dim 1 : vector<6x512xf32>, i32 -> vector<6x512xf32>
    %c495_i32_40 = arith.constant 495 : i32
    %85 = tpu.dynamic_rotate %77 by %c495_i32_40 dim 1 : vector<6x512xf32>, i32 -> vector<6x512xf32>
    %86 = tpu.concatenate %78, %79, %80, %81, %77, %82, %83, %84, %85 in 0 : vector<6x512xf32>, vector<6x512xf32>, vector<6x512xf32>, vector<6x512xf32>, vector<6x512xf32>, vector<6x512xf32>, vector<6x512xf32>, vector<6x512xf32>, vector<6x512xf32> -> vector<54x512xf32>
    %87 = arith.mulf %86, %31 : vector<54x512xf32>
    %c1 = arith.constant 1 : index
    %c0_41 = arith.constant 0 : index
    %c0_42 = arith.constant 0 : index
    %88 = vector.load %arg5[%c1, %c0_41, %c0_42] : memref<3x6x54xbf16, #tpu.memory_space<vmem>>, vector<1x6x54xbf16>
    %89 = vector.shape_cast %88 : vector<1x6x54xbf16> to vector<6x54xbf16>
    %90 = arith.truncf %87 : vector<54x512xf32> to vector<54x512xbf16>
    %cst_43 = arith.constant dense<0.000000e+00> : vector<6x512xf32>
    %91 = tpu.matmul %89, %90, %cst_43 {dimension_numbers = #tpu.dot_dimension_numbers<[1], [0], [0], [1], [0, 0, 1, 1], [], []>} : vector<6x54xbf16>, vector<54x512xbf16>, vector<6x512xf32> -> vector<6x512xf32>
    %c1_44 = arith.constant 1 : index
    %c0_45 = arith.constant 0 : index
    %c0_46 = arith.constant 0 : index
    %92 = vector.load %arg6[%c1_44, %c0_45, %c0_46] : memref<3x6x1xf32, #tpu.memory_space<vmem>>, vector<1x6x1xf32>
    %93 = vector.shape_cast %92 : vector<1x6x1xf32> to vector<6x1xf32>
    %c1_47 = arith.constant 1 : index
    %c0_48 = arith.constant 0 : index
    %c0_49 = arith.constant 0 : index
    %94 = vector.load %arg7[%c1_47, %c0_48, %c0_49] : memref<3x6x1xf32, #tpu.memory_space<vmem>>, vector<1x6x1xf32>
    %95 = vector.shape_cast %94 : vector<1x6x1xf32> to vector<6x1xf32>
    %cst_50 = arith.constant dense<0.000000e+00> : vector<6xf32>
    %96 = vector.multi_reduction <add>, %91, %cst_50 [1] : vector<6x512xf32> to vector<6xf32>
    %97 = vector.shape_cast %96 : vector<6xf32> to vector<6x1xf32>
    %cst_51 = arith.constant 5.120000e+02 : f32
    %98 = vector.broadcast %cst_51 : f32 to vector<6x1xf32>
    %99 = arith.divf %97, %98 : vector<6x1xf32>
    %100 = arith.mulf %91, %91 : vector<6x512xf32>
    %cst_52 = arith.constant dense<0.000000e+00> : vector<6xf32>
    %101 = vector.multi_reduction <add>, %100, %cst_52 [1] : vector<6x512xf32> to vector<6xf32>
    %102 = vector.shape_cast %101 : vector<6xf32> to vector<6x1xf32>
    %cst_53 = arith.constant 5.120000e+02 : f32
    %103 = vector.broadcast %cst_53 : f32 to vector<6x1xf32>
    %104 = arith.divf %102, %103 : vector<6x1xf32>
    %105 = arith.mulf %99, %99 : vector<6x1xf32>
    %106 = arith.subf %104, %105 : vector<6x1xf32>
    %cst_54 = arith.constant 0.000000e+00 : f32
    %107 = vector.broadcast %cst_54 : f32 to vector<6x1xf32>
    %108 = arith.maximumf %106, %107 : vector<6x1xf32>
    %109 = vector.broadcast %99 : vector<6x1xf32> to vector<6x512xf32>
    %110 = arith.subf %91, %109 : vector<6x512xf32>
    %cst_55 = arith.constant 9.99999974E-6 : f32
    %111 = vector.broadcast %cst_55 : f32 to vector<6x1xf32>
    %112 = arith.addf %108, %111 : vector<6x1xf32>
    %113 = math.rsqrt %112 : vector<6x1xf32>
    %114 = arith.mulf %93, %113 : vector<6x1xf32>
    %115 = vector.broadcast %114 : vector<6x1xf32> to vector<6x512xf32>
    %116 = arith.mulf %110, %115 : vector<6x512xf32>
    %117 = vector.broadcast %95 : vector<6x1xf32> to vector<6x512xf32>
    %118 = arith.addf %116, %117 : vector<6x512xf32>
    %cst_56 = arith.constant 0.000000e+00 : f32
    %119 = vector.broadcast %cst_56 : f32 to vector<6x512xf32>
    %120 = arith.maximumf %118, %119 : vector<6x512xf32>
    %121 = vector.extract_strided_slice %30 {offsets = [12, 0], sizes = [6, 512], strides = [1, 1]} : vector<24x512xf32> to vector<6x512xf32>
    %122 = arith.addf %120, %121 : vector<6x512xf32>
    %c17_i32_57 = arith.constant 17 : i32
    %123 = tpu.dynamic_rotate %122 by %c17_i32_57 dim 1 : vector<6x512xf32>, i32 -> vector<6x512xf32>
    %c16_i32_58 = arith.constant 16 : i32
    %124 = tpu.dynamic_rotate %122 by %c16_i32_58 dim 1 : vector<6x512xf32>, i32 -> vector<6x512xf32>
    %c15_i32_59 = arith.constant 15 : i32
    %125 = tpu.dynamic_rotate %122 by %c15_i32_59 dim 1 : vector<6x512xf32>, i32 -> vector<6x512xf32>
    %c1_i32_60 = arith.constant 1 : i32
    %126 = tpu.dynamic_rotate %122 by %c1_i32_60 dim 1 : vector<6x512xf32>, i32 -> vector<6x512xf32>
    %c511_i32_61 = arith.constant 511 : i32
    %127 = tpu.dynamic_rotate %122 by %c511_i32_61 dim 1 : vector<6x512xf32>, i32 -> vector<6x512xf32>
    %c497_i32_62 = arith.constant 497 : i32
    %128 = tpu.dynamic_rotate %122 by %c497_i32_62 dim 1 : vector<6x512xf32>, i32 -> vector<6x512xf32>
    %c496_i32_63 = arith.constant 496 : i32
    %129 = tpu.dynamic_rotate %122 by %c496_i32_63 dim 1 : vector<6x512xf32>, i32 -> vector<6x512xf32>
    %c495_i32_64 = arith.constant 495 : i32
    %130 = tpu.dynamic_rotate %122 by %c495_i32_64 dim 1 : vector<6x512xf32>, i32 -> vector<6x512xf32>
    %131 = tpu.concatenate %123, %124, %125, %126, %122, %127, %128, %129, %130 in 0 : vector<6x512xf32>, vector<6x512xf32>, vector<6x512xf32>, vector<6x512xf32>, vector<6x512xf32>, vector<6x512xf32>, vector<6x512xf32>, vector<6x512xf32>, vector<6x512xf32> -> vector<54x512xf32>
    %132 = arith.mulf %131, %31 : vector<54x512xf32>
    %c2 = arith.constant 2 : index
    %c0_65 = arith.constant 0 : index
    %c0_66 = arith.constant 0 : index
    %133 = vector.load %arg5[%c2, %c0_65, %c0_66] : memref<3x6x54xbf16, #tpu.memory_space<vmem>>, vector<1x6x54xbf16>
    %134 = vector.shape_cast %133 : vector<1x6x54xbf16> to vector<6x54xbf16>
    %135 = arith.truncf %132 : vector<54x512xf32> to vector<54x512xbf16>
    %cst_67 = arith.constant dense<0.000000e+00> : vector<6x512xf32>
    %136 = tpu.matmul %134, %135, %cst_67 {dimension_numbers = #tpu.dot_dimension_numbers<[1], [0], [0], [1], [0, 0, 1, 1], [], []>} : vector<6x54xbf16>, vector<54x512xbf16>, vector<6x512xf32> -> vector<6x512xf32>
    %c2_68 = arith.constant 2 : index
    %c0_69 = arith.constant 0 : index
    %c0_70 = arith.constant 0 : index
    %137 = vector.load %arg6[%c2_68, %c0_69, %c0_70] : memref<3x6x1xf32, #tpu.memory_space<vmem>>, vector<1x6x1xf32>
    %138 = vector.shape_cast %137 : vector<1x6x1xf32> to vector<6x1xf32>
    %c2_71 = arith.constant 2 : index
    %c0_72 = arith.constant 0 : index
    %c0_73 = arith.constant 0 : index
    %139 = vector.load %arg7[%c2_71, %c0_72, %c0_73] : memref<3x6x1xf32, #tpu.memory_space<vmem>>, vector<1x6x1xf32>
    %140 = vector.shape_cast %139 : vector<1x6x1xf32> to vector<6x1xf32>
    %cst_74 = arith.constant dense<0.000000e+00> : vector<6xf32>
    %141 = vector.multi_reduction <add>, %136, %cst_74 [1] : vector<6x512xf32> to vector<6xf32>
    %142 = vector.shape_cast %141 : vector<6xf32> to vector<6x1xf32>
    %cst_75 = arith.constant 5.120000e+02 : f32
    %143 = vector.broadcast %cst_75 : f32 to vector<6x1xf32>
    %144 = arith.divf %142, %143 : vector<6x1xf32>
    %145 = arith.mulf %136, %136 : vector<6x512xf32>
    %cst_76 = arith.constant dense<0.000000e+00> : vector<6xf32>
    %146 = vector.multi_reduction <add>, %145, %cst_76 [1] : vector<6x512xf32> to vector<6xf32>
    %147 = vector.shape_cast %146 : vector<6xf32> to vector<6x1xf32>
    %cst_77 = arith.constant 5.120000e+02 : f32
    %148 = vector.broadcast %cst_77 : f32 to vector<6x1xf32>
    %149 = arith.divf %147, %148 : vector<6x1xf32>
    %150 = arith.mulf %144, %144 : vector<6x1xf32>
    %151 = arith.subf %149, %150 : vector<6x1xf32>
    %cst_78 = arith.constant 0.000000e+00 : f32
    %152 = vector.broadcast %cst_78 : f32 to vector<6x1xf32>
    %153 = arith.maximumf %151, %152 : vector<6x1xf32>
    %154 = vector.broadcast %144 : vector<6x1xf32> to vector<6x512xf32>
    %155 = arith.subf %136, %154 : vector<6x512xf32>
    %cst_79 = arith.constant 9.99999974E-6 : f32
    %156 = vector.broadcast %cst_79 : f32 to vector<6x1xf32>
    %157 = arith.addf %153, %156 : vector<6x1xf32>
    %158 = math.rsqrt %157 : vector<6x1xf32>
    %159 = arith.mulf %138, %158 : vector<6x1xf32>
    %160 = vector.broadcast %159 : vector<6x1xf32> to vector<6x512xf32>
    %161 = arith.mulf %155, %160 : vector<6x512xf32>
    %162 = vector.broadcast %140 : vector<6x1xf32> to vector<6x512xf32>
    %163 = arith.addf %161, %162 : vector<6x512xf32>
    %cst_80 = arith.constant 0.000000e+00 : f32
    %164 = vector.broadcast %cst_80 : f32 to vector<6x512xf32>
    %165 = arith.maximumf %163, %164 : vector<6x512xf32>
    %166 = vector.extract_strided_slice %30 {offsets = [18, 0], sizes = [6, 512], strides = [1, 1]} : vector<24x512xf32> to vector<6x512xf32>
    %167 = tpu.concatenate %75, %120, %165, %166 in 0 : vector<6x512xf32>, vector<6x512xf32>, vector<6x512xf32>, vector<6x512xf32> -> vector<24x512xf32>
    %c0_81 = arith.constant 0 : index
    %c0_82 = arith.constant 0 : index
    %168 = vector.load %arg8[%c0_81, %c0_82] : memref<64x24xbf16, #tpu.memory_space<vmem>>, vector<64x24xbf16>
    %169 = arith.truncf %167 : vector<24x512xf32> to vector<24x512xbf16>
    %cst_83 = arith.constant dense<0.000000e+00> : vector<64x512xf32>
    %170 = tpu.matmul %168, %169, %cst_83 {dimension_numbers = #tpu.dot_dimension_numbers<[1], [0], [0], [1], [0, 0, 1, 1], [], []>} : vector<64x24xbf16>, vector<24x512xbf16>, vector<64x512xf32> -> vector<64x512xf32>
    %c0_84 = arith.constant 0 : index
    %c0_85 = arith.constant 0 : index
    %171 = vector.load %arg9[%c0_84, %c0_85] : memref<64x1xf32, #tpu.memory_space<vmem>>, vector<64x1xf32>
    %c0_86 = arith.constant 0 : index
    %c0_87 = arith.constant 0 : index
    %172 = vector.load %arg10[%c0_86, %c0_87] : memref<64x1xf32, #tpu.memory_space<vmem>>, vector<64x1xf32>
    %cst_88 = arith.constant dense<0.000000e+00> : vector<64xf32>
    %173 = vector.multi_reduction <add>, %170, %cst_88 [1] : vector<64x512xf32> to vector<64xf32>
    %174 = vector.shape_cast %173 : vector<64xf32> to vector<64x1xf32>
    %cst_89 = arith.constant 5.120000e+02 : f32
    %175 = vector.broadcast %cst_89 : f32 to vector<64x1xf32>
    %176 = arith.divf %174, %175 : vector<64x1xf32>
    %177 = arith.mulf %170, %170 : vector<64x512xf32>
    %cst_90 = arith.constant dense<0.000000e+00> : vector<64xf32>
    %178 = vector.multi_reduction <add>, %177, %cst_90 [1] : vector<64x512xf32> to vector<64xf32>
    %179 = vector.shape_cast %178 : vector<64xf32> to vector<64x1xf32>
    %cst_91 = arith.constant 5.120000e+02 : f32
    %180 = vector.broadcast %cst_91 : f32 to vector<64x1xf32>
    %181 = arith.divf %179, %180 : vector<64x1xf32>
    %182 = arith.mulf %176, %176 : vector<64x1xf32>
    %183 = arith.subf %181, %182 : vector<64x1xf32>
    %cst_92 = arith.constant 0.000000e+00 : f32
    %184 = vector.broadcast %cst_92 : f32 to vector<64x1xf32>
    %185 = arith.maximumf %183, %184 : vector<64x1xf32>
    %186 = vector.broadcast %176 : vector<64x1xf32> to vector<64x512xf32>
    %187 = arith.subf %170, %186 : vector<64x512xf32>
    %cst_93 = arith.constant 9.99999974E-6 : f32
    %188 = vector.broadcast %cst_93 : f32 to vector<64x1xf32>
    %189 = arith.addf %185, %188 : vector<64x1xf32>
    %190 = math.rsqrt %189 : vector<64x1xf32>
    %191 = arith.mulf %171, %190 : vector<64x1xf32>
    %192 = vector.broadcast %191 : vector<64x1xf32> to vector<64x512xf32>
    %193 = arith.mulf %187, %192 : vector<64x512xf32>
    %194 = vector.broadcast %172 : vector<64x1xf32> to vector<64x512xf32>
    %195 = arith.addf %193, %194 : vector<64x512xf32>
    %196 = arith.addf %195, %0 : vector<64x512xf32>
    %cst_94 = arith.constant 0.000000e+00 : f32
    %197 = vector.broadcast %cst_94 : f32 to vector<64x512xf32>
    %198 = arith.maximumf %196, %197 : vector<64x512xf32>
    %c0_95 = arith.constant 0 : index
    %c0_96 = arith.constant 0 : index
    %199 = vector.load %arg11[%c0_95, %c0_96] : memref<64x512xf32, #tpu.memory_space<vmem>>, vector<64x512xf32>
    tpu.vector_store %arg11[%c0_95, %c0_96], %198 {strides = array<i32>} : memref<64x512xf32, #tpu.memory_space<vmem>>, vector<64x512xf32>,
    return
  }
}

</mosaic_0001>

<bundles_post_ra>
// kernel: tpu_custom_call.1
= control target key start
LH: loop header
LB: loop body
LE: loop exit
PB: predicated region body
PF: predicated region fallthrough
CT: control target
= control target key end

     0   :  { %16 = vsyncpa [#allocation3], 0  ;;  %s4440_s0 = inlined_call_operand.vmem [shape: f32[64,512], index: 0, kind: input, shape index: {}]   ;;  %s4441_s1 = inlined_call_operand.hbm [shape: f32[54,512], index: 1, kind: input, shape index: {}]   ;;  %s4442_s2 = inlined_call_operand.vmem [shape: bf16[24,64], index: 2, kind: input, shape index: {}]   ;;  %s4443_s3 = inlined_call_operand.vmem [shape: f32[24,1], index: 3, kind: input, shape index: {}]   ;;  %s4444_s4 = inlined_call_operand.vmem [shape: f32[24,1], index: 4, kind: input, shape index: {}]   ;;  %s4445_s5 = inlined_call_operand.vmem [shape: bf16[3,6,54], index: 5, kind: input, shape index: {}]   ;;  %s4446_s6 = inlined_call_operand.vmem [shape: f32[3,6,1], index: 6, kind: input, shape index: {}]   ;;  %s4447_s7 = inlined_call_operand.vmem [shape: f32[3,6,1], index: 7, kind: input, shape index: {}]   ;;  %s4448_s8 = inlined_call_operand.vmem [shape: bf16[64,24], index: 8, kind: input, shape index: {}]   ;;  %s4449_s9 = inlined_call_operand.vmem [shape: f32[64,1], index: 9, kind: input, shape index: {}]   ;;  %s4450_s10 = inlined_call_operand.vmem [shape: f32[64,1], index: 10, kind: input, shape index: {}]   ;;  %s4451_s11 = inlined_call_operand.hbm [shape: f32[64,512], index: 11, kind: output, shape index: {}]  }
   0x1   :  { %17 = vsyncpa [#allocation4], 0  ;;  %s2569_s17 = smov [#allocation2]   ;;  %s2521_s21 = scalar_lea.hbm %s4441_s1, 3584 }
   0x2   :  { %s25_s18 = sshll.u32 %s2569_s17, 4  ;;  %p2522_p0 = scmp.ne.s32.totalorder %s4441_s1, %s2521_s21  ;;  %s26_s18 = int_to_ptr.vmem [resolvable:$true] %s25_s18 }
   0x3   :  { %p2525_p1 = scmp.lt.u32.totalorder %s2521_s21, %s4441_s1 }
   0x5   :  { %p2527_p2 = pnand %p2525_p1, %p2522_p0 }
   0x7   :  { %2530 = shalt.err (!%p2527_p2)
}
   0x8   :  { %s2531_s26 = scalar_lea.vmem %s26_s18, 3584  ;;  %p2536_p4 = scmp.lt.s32.totalorder %s26_s18, %s26_s18 }
   0x9   :  { %p2532_p3 = scmp.ne.s32.totalorder %s26_s18, %s2531_s26  ;;  %p2537_p5 = scmp.lt.s32.totalorder %s2531_s26, %s2531_s26 }
   0xb   :  { %p2538_p6 = por %p2537_p5, %p2536_p4 }
   0xd   :  { %p2539_p7 = pnand %p2538_p6, %p2532_p3 }
   0xf   :  { %2542 = shalt.err (!%p2539_p7)
}
  0x10   :  { %s2570_s27 = smov 512   ;;  %s2571_s28 = smov 32  }
  0x11   :  { %31 = dma.hbm_to_vmem [thread:$0]  %s4441_s1, 3584, %s26_s18, [#allocation3], %s2570_s27, %s2570_s27, %s2571_s28  }
  0x12   :  { %2565 = dma.done.wait [#allocation3], 3584  }
  0x13   :  { %2566 = vsyncadd [#allocation3], 4294963712  ;;  %v4452_v0 = vmov 0   ;;  %v55_v1 = vld [vmem:[%s4440_s0 + $0x8] sm:$0xff]  ;;  %v57_v3 = vld [vmem:[%s4440_s0 + $0x18] sm:$0xff]  ;;  %vm113_vm0 = vcmask 523264  }
  0x14   :  { %152 = vmatprep.mubr.bf16.mxu0 %v4452_v0  ;;  %203 = vmatprep.mubr.bf16.mxu1 %v4452_v0  ;;  %v59_v2 = vld [vmem:[%s4440_s0 + $0x28] sm:$0xff]  ;;  %v61_v5 = vld [vmem:[%s4440_s0 + $0x38] sm:$0xff]  ;;  %v54_v6 = vld [vmem:[%s4440_s0] sm:$0xff]  ;;  %s2573_s29 = smov 16   ;;  %s2574_s30 = smov 15   ;;  %vm584_vm3 = vcmask 1043456  }
  0x15   :  { %2425 = vset.pattern.permute.xlu1 %v4452_v0  ;;  %2426 = vset.pattern.permute.xlu0 %v4452_v0  ;;  %v90_v4 = vpack.c.bf16 %v59_v2, %v55_v1  ;;  %v58_v7 = vld [vmem:[%s4440_s0 + $0x20] sm:$0xff]  ;;  %v92_v8 = vpack.c.bf16 %v61_v5, %v57_v3  ;;  %v56_v10 = vld [vmem:[%s4440_s0 + $0x10] sm:$0xff]  ;;  %v63_v12 = vld [vmem:[%s4440_s0 + $0x48] sm:$0xff]  ;;  %s2575_s12 = smov 17   ;;  %s2576_s13 = smov 1   ;;  %vm579_vm5 = vcmask 1045504  }
  0x16   :  { %v89_v9 = vpack.c.bf16 %v58_v7, %v54_v6  ;;  %v60_v11 = vld [vmem:[%s4440_s0 + $0x30] sm:$0xff]  ;;  %v67_v14 = vld [vmem:[%s4440_s0 + $0x68] sm:$0xff]  ;;  %v65_v15 = vld [vmem:[%s4440_s0 + $0x58] sm:$0xff]  ;;  %s2577_s14 = smov 127   ;;  %s2578_s15 = smov 113   ;;  %vm589_vm8 = vcmask 1041408  }
  0x17   :  { %120 = vmatprep.subr.bf16.mxu0 %v90_v4  ;;  %v91_v13 = vpack.c.bf16 %v60_v11, %v56_v10  ;;  %v69_v16 = vld [vmem:[%s4440_s0 + $0x78] sm:$0xff]  ;;  %171 = vmatprep.subr.bf16.mxu1 %v92_v8  ;;  %v94_v17 = vpack.c.bf16 %v67_v14, %v63_v12  ;;  %v62_v19 = vld [vmem:[%s4440_s0 + $0x40] sm:$0xff]  ;;  %v64_v21 = vld [vmem:[%s4440_s0 + $0x50] sm:$0xff]  ;;  %s2579_s1 = smov 112   ;;  %s2580_s16 = smov 111   ;;  %vm655_vm12 = vcmask 1042432  }
  0x18   :  { %121 = vmatpush1.bf16.msra.mxu0 %v89_v9  ;;  %v96_v18 = vpack.c.bf16 %v69_v16, %v65_v15  ;;  %v66_v20 = vld [vmem:[%s4440_s0 + $0x60] sm:$0xff]  ;;  %v68_v23 = vld [vmem:[%s4440_s0 + $0x70] sm:$0xff]  ;;  %v71_v24 = vld [vmem:[%s4440_s0 + $0x88] sm:$0xff]  ;;  %vm651_vm13 = vcmask 441344   ;;  %vm1722_vm14 = vcmask 195584   ;;  %s2581_s22 = smov [#allocation5]  }
  0x19   :  { %172 = vmatpush1.bf16.msra.mxu1 %v91_v13  ;;  %v93_v22 = vpack.c.bf16 %v66_v20, %v62_v19  ;;  %v75_v25 = vld [vmem:[%s4440_s0 + $0xa8] sm:$0xff]  ;;  %122 = vmatprep.subr.bf16.mxu0 %v94_v17  ;;  %v95_v26 = vpack.c.bf16 %v68_v23, %v64_v21  ;;  %v73_v28 = vld [vmem:[%s4440_s0 + $0x98] sm:$0xff]  ;;  %v70_v30 = vld [vmem:[%s4440_s0 + $0x80] sm:$0xff]  ;;  %s2362_s23 = sshll.u32 %s2581_s22, 4  ;;  %s2363_s23 = int_to_ptr.vmem [resolvable:$true] %s2362_s23 }
  0x1a   :  { %173 = vmatprep.subr.bf16.mxu1 %v96_v18  ;;  %v98_v27 = vpack.c.bf16 %v75_v25, %v71_v24  ;;  %v77_v29 = vld [vmem:[%s4440_s0 + $0xb8] sm:$0xff]  ;;  %v74_v32 = vld [vmem:[%s4440_s0 + $0xa0] sm:$0xff]  ;;  %v72_v33 = vld [vmem:[%s4440_s0 + $0x90] sm:$0xff]  ;;  %p2548_p9 = scmp.lt.s32.totalorder %s2363_s23, %s2363_s23 }
  0x1b   :  { %v100_v31 = vpack.c.bf16 %v77_v29, %v73_v28  ;;  %v76_v34 = vld [vmem:[%s4440_s0 + $0xb0] sm:$0xff]  ;;  %v97_v35 = vpack.c.bf16 %v74_v32, %v70_v30  ;;  %v79_v36 = vld [vmem:[%s4440_s0 + $0xc8] sm:$0xff]  ;;  %v81_v38 = vld [vmem:[%s4440_s0 + $0xd8] sm:$0xff] }
  0x1c   :  { %123 = vmatpush1.bf16.msra.mxu0 %v93_v22  ;;  %v83_v37 = vld [vmem:[%s4440_s0 + $0xe8] sm:$0xff]  ;;  %v99_v39 = vpack.c.bf16 %v76_v34, %v72_v33  ;;  %v85_v41 = vld [vmem:[%s4440_s0 + $0xf8] sm:$0xff]  ;;  %v78_v42 = vld [vmem:[%s4440_s0 + $0xc0] sm:$0xff] }
  0x1d   :  { %174 = vmatpush1.bf16.msra.mxu1 %v95_v26  ;;  %124 = vmatprep.subr.bf16.mxu0 %v98_v27  ;;  %v102_v40 = vpack.c.bf16 %v83_v37, %v79_v36  ;;  %v82_v43 = vld [vmem:[%s4440_s0 + $0xe0] sm:$0xff]  ;;  %v104_v44 = vpack.c.bf16 %v85_v41, %v81_v38  ;;  %v80_v45 = vld [vmem:[%s4440_s0 + $0xd0] sm:$0xff] }
  0x1e   :  { %175 = vmatprep.subr.bf16.mxu1 %v100_v31  ;;  %v84_v46 = vld [vmem:[%s4440_s0 + $0xf0] sm:$0xff]  ;;  %v101_v47 = vpack.c.bf16 %v82_v43, %v78_v42  ;;  %v2427_v49 = vld [vmem:[%s4442_s2] sm:$0xff]  }
  0x1f   :  { %v103_v48 = vpack.c.bf16 %v84_v46, %v80_v45  ;;  %v222_v27 = vld [vmem:[%s4443_s3] sm:$0xff]  ;;  %v2428_v45 = vld [vmem:[%s4442_s2 + $0x8] ss:$0 sps:$4 sm:$0xff]  }
  0x20   :  { %125 = vmatpush1.bf16.msra.mxu0 %v97_v35  ;;  %v225_v30 = vld [vmem:[%s4444_s4] sm:$0xff] }
  0x21   :  { %176 = vmatpush1.bf16.msra.mxu1 %v99_v39  ;;  %126 = vmatprep.subr.bf16.mxu0 %v102_v40 }
  0x22   :  { %177 = vmatprep.subr.bf16.mxu1 %v104_v44 }
  0x24   :  { %127 = vmatpush1.bf16.msra.mxu0 %v101_v47 }
  0x25   :  { %178 = vmatpush1.bf16.msra.mxu1 %v103_v48  ;;  %v409_v48 = vlaneseq }
  0x27   :  { %2376 = vmatmul.mubr.msk.bf16.vlgmr.msra.gmra.mrb[0].mxu0 %vm113_vm0, %v2427_v49 }
  0x28   :  { %2378 = vmatmul.mubr.msk.bf16.vlgmr.msra.gmra.mrb[0].mxu1 %vm113_vm0, %v2427_v49  ;;  %162 = vmatprep.mubr.bf16.mxu0 %v4452_v0 }
  0x29   :  { %213 = vmatprep.mubr.bf16.mxu1 %v4452_v0 }
  0x2f   :  { %2377 = vmatmul.mubr.msk.bf16.gmra.mrb[4].mxu0 %vm113_vm0, %v2428_v45 }
  0x30   :  { %2379 = vmatmul.mubr.msk.bf16.gmra.mrb[4].mxu1 %vm113_vm0, %v2428_v45  ;;  %700 = vmatprep.mubr.bf16.mxu0 %v4452_v0 }
  0x31   :  { %741 = vmatprep.mubr.bf16.mxu1 %v4452_v0 }
  0xfa   :  { %v154_v50 = vpop.f32.mrb[0].mxu0 }
  0xfb   :  { %v247_v51 = vmul.f32 %v154_v50, %v154_v50  ;;  %v205_v52 = vpop.f32.mrb[0].mxu1  ;;  %v156_v53 = vpop.f32.mrb[1].mxu0 }
  0xfc   :  { %v228_v54 = vadd.f32 %v156_v53, %v154_v50  ;;  %v248_v55 = vmul.f32 %v156_v53, %v156_v53  ;;  %v207_v56 = vpop.f32.mrb[1].mxu1  ;;  %v2764_v57 = vpop.f32.mrb[2].mxu0  ;;  %v249_v58 = vmul.f32 %v205_v52, %v205_v52 }
  0xfd   :  { %v251_v59 = vmul.f32 %v2764_v57, %v2764_v57  ;;  %v2768_v60 = vpop.f32.mrb[2].mxu1  ;;  %v2770_v61 = vpop.f32.mrb[3].mxu0  ;;  %v250_v8 = vmul.f32 %v207_v56, %v207_v56 }
  0xfe   :  { %v233_v62 = vadd.f32 %v2770_v61, %v2764_v57  ;;  %v252_v63 = vmul.f32 %v2770_v61, %v2770_v61  ;;  %v2776_v1 = vpop.f32.mrb[3].mxu1  ;;  %v229_v2 = vadd.f32 %v228_v54, %v205_v52  ;;  %v259_v3 = vadd.f32 %v248_v55, %v247_v51 }
  0xff   :  { %v253_v4 = vmul.f32 %v2768_v60, %v2768_v60  ;;  %v254_v10 = vmul.f32 %v2776_v1, %v2776_v1  ;;  %v2875_v51 = vand.u32 127, %v409_v48  ;;  %v2950_v48 = vld [vmem:[#allocation2 + $0x38] sm:$0xff] }
 0x100   :  { %v230_v5 = vadd.f32 %v229_v2, %v207_v56  ;;  %v264_v6 = vadd.f32 %v252_v63, %v251_v59  ;;  %v234_v7 = vadd.f32 %v233_v62, %v2768_v60  ;;  %v260_v9 = vadd.f32 %v259_v3, %v249_v58 }
 0x101   :  { %vm437_vm1 = vcmp.lt.s32.totalorder %v2875_v51, 15  ;;  %vm424_vm2 = vcmp.lt.s32.totalorder %v2875_v51, 16  ;;  %vm411_vm4 = vcmp.lt.s32.totalorder %v2875_v51, 17  ;;  %vm463_vm6 = vcmp.lt.s32.totalorder %v2875_v51, 127 }
 0x102   :  { %231 = vadd.xlane.f32.xlu0 %v230_v5  ;;  %v265_v11 = vadd.f32 %v264_v6, %v253_v4  ;;  %v2784_v12 = vadd.f32 %v234_v7, %v2776_v1  ;;  %v261_v13 = vadd.f32 %v260_v9, %v250_v8  ;;  %v2897_v7 = vld [vmem:[#allocation2 + $0x8] sm:$0xff]  ;;  %vm450_vm7 = vcmp.lt.s32.totalorder %v2875_v51, 1 }
 0x103   :  { %v2899_v8 = vld [vmem:[#allocation2 + $0x28] sm:$0xff]  ;;  %vm476_vm9 = vcmp.lt.s32.totalorder %v2875_v51, 113  ;;  %vm489_vm10 = vcmp.lt.s32.totalorder %v2875_v51, 112  ;;  %vm502_vm11 = vcmp.lt.s32.totalorder %v2875_v51, 111 }
 0x104   :  { %v2786_v14 = vadd.f32 %v265_v11, %v254_v10 }
 0x106   :  { %262 = vadd.xlane.f32.xlu0 %v261_v13 }
 0x18f   :  { %v232_v15 = vpop.xlane.xlu0 %231 }
 0x190   :  { %v244_v16 = vmul.f32 0.001953125, %v232_v15 }
 0x192   :  { %v286_v17 = vsub.f32 %v154_v50, %v244_v16  ;;  %v287_v18 = vsub.f32 %v156_v53, %v244_v16  ;;  %v288_v19 = vsub.f32 %v205_v52, %v244_v16  ;;  %v289_v21 = vsub.f32 %v207_v56, %v244_v16 }
 0x193   :  { %v263_v20 = vpop.xlane.xlu0 %262  ;;  %v277_v22 = vmul.f32 %v244_v16, %v244_v16 }
 0x194   :  { %v274_v23 = vmul.f32 0.001953125, %v263_v20 }
 0x196   :  { %v280_v24 = vsub.f32 %v274_v23, %v277_v22 }
 0x198   :  { %v283_v25 = vmax.f32 %v280_v24, 0.0 }
 0x19a   :  { %v298_v26 = vadd.f32 1e-05, %v283_v25 }
 0x19c   :  { %2433 = vrsqrt.f32 %v298_v26 }
 0x1a6   :  { %v2434_v28 = vpop.eup %2433 }
 0x1a7   :  { %v304_v29 = vmul.f32 %v2434_v28, %v222_v27 }
 0x1a9   :  { %309 = vperm.xlu1 %2425, %v304_v29  }
 0x1ad   :  { %336 = vperm.xlu1 %2425, %v225_v30  }
 0x228   :  { %v310_v31 = vpop.permute.xlu1 %309 }
 0x229   :  { %v322_v32 = vmul.f32 %v310_v31, %v286_v17  ;;  %v323_v33 = vmul.f32 %v310_v31, %v287_v18  ;;  %v324_v39 = vmul.f32 %v310_v31, %v288_v19  ;;  %v325_v41 = vmul.f32 %v310_v31, %v289_v21  ;;  %v2912_v17 = vld [vmem:[#allocation2] sm:$0xff] }
 0x22a   :  { %v2916_v21 = vld [vmem:[#allocation2 + $0x20] sm:$0xff] }
 0x22c   :  { %v337_v34 = vpop.permute.xlu1 %336 }
 0x22d   :  { %v349_v35 = vadd.f32 %v337_v34, %v322_v32  ;;  %v350_v36 = vadd.f32 %v337_v34, %v323_v33  ;;  %v351_v40 = vadd.f32 %v337_v34, %v324_v39  ;;  %v352_v42 = vadd.f32 %v337_v34, %v325_v41  ;;  %v2931_v34 = vld [vmem:[#allocation2 + $0x10] sm:$0xff] }
 0x22e   :  { %v2944_v41 = vld [vmem:[#allocation2 + $0x30] sm:$0xff] }
 0x22f   :  { %v2794_v37 = vmax.f32 %v349_v35, 0.0  ;;  %v2796_v38 = vmax.f32 %v350_v36, 0.0  ;;  %v2806_v43 = vmax.f32 %v351_v40, 0.0  ;;  %v2812_v44 = vmax.f32 %v352_v42, 0.0 }
 0x231   :  { %418 = vrot.lane.b32.xlu1 %v2796_v38, %s2573_s29  ;;  %416 = vrot.lane.b32.xlu0 %v2794_v37, %s2573_s29 }
 0x235   :  { %429 = vrot.lane.b32.xlu1 %v2794_v37, %s2574_s30  ;;  %403 = vrot.lane.b32.xlu0 %v2796_v38, %s2575_s12 }
 0x239   :  { %431 = vrot.lane.b32.xlu1 %v2796_v38, %s2574_s30  ;;  %420 = vrot.lane.b32.xlu0 %v2806_v43, %s2573_s29 }
 0x23d   :  { %422 = vrot.lane.b32.xlu1 %v2812_v44, %s2573_s29  ;;  %442 = vrot.lane.b32.xlu0 %v2794_v37, %s2576_s13 }
 0x241   :  { %435 = vrot.lane.b32.xlu1 %v2812_v44, %s2574_s30  ;;  %457 = vrot.lane.b32.xlu0 %v2796_v38, %s2577_s14 }
 0x245   :  { %401 = vrot.lane.b32.xlu1 %v2794_v37, %s2575_s12  ;;  %405 = vrot.lane.b32.xlu0 %v2806_v43, %s2575_s12 }
 0x249   :  { %407 = vrot.lane.b32.xlu1 %v2812_v44, %s2575_s12  ;;  %455 = vrot.lane.b32.xlu0 %v2794_v37, %s2577_s14 }
 0x24d   :  { %433 = vrot.lane.b32.xlu1 %v2806_v43, %s2574_s30  ;;  %461 = vrot.lane.b32.xlu0 %v2812_v44, %s2577_s14 }
 0x251   :  { %444 = vrot.lane.b32.xlu1 %v2796_v38, %s2576_s13  ;;  %472 = vrot.lane.b32.xlu0 %v2806_v43, %s2578_s15 }
 0x255   :  { %459 = vrot.lane.b32.xlu1 %v2806_v43, %s2577_s14  ;;  %485 = vrot.lane.b32.xlu0 %v2806_v43, %s2579_s1 }
 0x259   :  { %448 = vrot.lane.b32.xlu1 %v2812_v44, %s2576_s13  ;;  %481 = vrot.lane.b32.xlu0 %v2794_v37, %s2579_s1 }
 0x25d   :  { %446 = vrot.lane.b32.xlu1 %v2806_v43, %s2576_s13  ;;  %487 = vrot.lane.b32.xlu0 %v2812_v44, %s2579_s1 }
 0x261   :  { %470 = vrot.lane.b32.xlu1 %v2796_v38, %s2578_s15  ;;  %496 = vrot.lane.b32.xlu0 %v2796_v38, %s2580_s16 }
 0x265   :  { %483 = vrot.lane.b32.xlu1 %v2796_v38, %s2579_s1  ;;  %500 = vrot.lane.b32.xlu0 %v2812_v44, %s2580_s16 }
 0x269   :  { %468 = vrot.lane.b32.xlu1 %v2794_v37, %s2578_s15 }
 0x26d   :  { %474 = vrot.lane.b32.xlu1 %v2812_v44, %s2578_s15 }
 0x271   :  { %494 = vrot.lane.b32.xlu1 %v2794_v37, %s2580_s16 }
 0x275   :  { %498 = vrot.lane.b32.xlu1 %v2806_v43, %s2580_s16 }
 0x284   :  { %267 = vadd.xlane.f32.xlu0 %v2786_v14 }
 0x299   :  { %236 = vadd.xlane.f32.xlu1 %v2784_v12 }
 0x2a3   :  { %v419_v46 = vpop.permute.xlu1 %418  ;;  %v417_v47 = vpop.permute.xlu0 %416 }
 0x2a4   :  { %v427_v58 = vsel %vm424_vm2, %v417_v47, %v419_v46 }
 0x2a5   :  { %v512_v2 = vrot.slane %v427_v58, 2 }
 0x2a7   :  { %v430_v49 = vpop.permute.xlu1 %429  ;;  %v404_v50 = vpop.permute.xlu0 %403 }
 0x2ab   :  { %v432_v52 = vpop.permute.xlu1 %431  ;;  %v421_v53 = vpop.permute.xlu0 %420 }
 0x2ac   :  { %v2883_v56 = vsel %vm437_vm1, %v430_v49, %v432_v52  ;;  %v426_v16 = vsel %vm424_vm2, %v419_v46, %v421_v53 }
 0x2ad   :  { %v524_v59 = vrot.slane %v2883_v56, 4  ;;  %v513_v27 = vrot.slane %v426_v16, 2 }
 0x2af   :  { %v423_v54 = vpop.permute.xlu1 %422  ;;  %v2879_v55 = vpop.permute.xlu0 %442  ;;  %v586_v9 = vsel %vm584_vm3, %v512_v2, %v524_v59 }
 0x2b0   :  { %v428_v4 = vsel %vm424_vm2, %v423_v54, %v417_v47  ;;  %v611_v15 = vmul.f32 %v586_v9, %v2899_v8  ;;  %v425_v20 = vsel %vm424_vm2, %v421_v53, %v423_v54  ;;  %v2948_v47 = vld [vmem:[#allocation2 + $0x18] sm:$0xff] }
 0x2b1   :  { %v511_v13 = vrot.slane %v428_v4, 2  ;;  %v514_v30 = vrot.slane %v425_v20, 2  ;;  %v2985_v20 = vld [vmem:[#allocation2 + $0x68] sm:$0xff] }
 0x2b3   :  { %v436_v62 = vpop.permute.xlu1 %435  ;;  %v2888_v63 = vpop.permute.xlu0 %457 }
 0x2b4   :  { %v2892_v3 = vsel %vm437_vm1, %v436_v62, %v430_v49 }
 0x2b5   :  { %v523_v10 = vrot.slane %v2892_v3, 4  ;;  %v3028_v3 = vld [vmem:[#allocation2 + $0x70] sm:$0xff] }
 0x2b7   :  { %v402_v5 = vpop.permute.xlu1 %401  ;;  %v406_v6 = vpop.permute.xlu0 %405  ;;  %v585_v22 = vsel %vm584_vm3, %v511_v13, %v523_v10 }
 0x2b8   :  { %v414_v11 = vsel %vm411_vm4, %v402_v5, %v404_v50  ;;  %v413_v25 = vsel %vm411_vm4, %v404_v50, %v406_v6  ;;  %v610_v31 = vmul.f32 %v585_v22, %v2916_v21 }
 0x2b9   :  { %v581_v12 = vsel %vm579_vm5, %v414_v11, %v512_v2  ;;  %v582_v35 = vsel %vm579_vm5, %v413_v25, %v513_v27 }
 0x2ba   :  { %v607_v14 = vmul.f32 %v581_v12, %v2897_v7  ;;  %v608_v49 = vmul.f32 %v582_v35, %v2931_v34 }
 0x2bb   :  { %v408_v18 = vpop.permute.xlu1 %407  ;;  %v456_v19 = vpop.permute.xlu0 %455 }
 0x2bc   :  { %v415_v23 = vsel %vm411_vm4, %v408_v18, %v402_v5  ;;  %v636_v24 = vpack.c.bf16 %v611_v15, %v607_v14  ;;  %v412_v28 = vsel %vm411_vm4, %v406_v6, %v408_v18  ;;  %v2956_v50 = vsel %vm463_vm6, %v456_v19, %v2888_v63  ;;  %v2983_v18 = vld [vmem:[#allocation2 + $0x48] sm:$0xff] }
 0x2bd   :  { %v580_v26 = vsel %vm579_vm5, %v415_v23, %v511_v13  ;;  %v583_v40 = vsel %vm579_vm5, %v412_v28, %v514_v30  ;;  %v547_v12 = vrot.slane %v2956_v50, 2 }
 0x2be   :  { %v606_v29 = vmul.f32 %v580_v26, %v2912_v17  ;;  %668 = vmatprep.subr.bf16.mxu0 %v636_v24  ;;  %v609_v2 = vmul.f32 %v583_v40, %v2948_v47  ;;  %v3002_v26 = vld [vmem:[#allocation2 + $0x60] sm:$0xff] }
 0x2bf   :  { %v434_v32 = vpop.permute.xlu1 %433  ;;  %v462_v33 = vpop.permute.xlu0 %461 }
 0x2c0   :  { %v2936_v36 = vsel %vm437_vm1, %v434_v32, %v436_v62  ;;  %v2940_v39 = vsel %vm437_vm1, %v432_v52, %v434_v32  ;;  %v635_v46 = vpack.c.bf16 %v610_v31, %v606_v29  ;;  %v2980_v15 = vsel %vm463_vm6, %v462_v33, %v456_v19 }
 0x2c1   :  { %v525_v42 = vrot.slane %v2940_v39, 4  ;;  %v526_v45 = vrot.slane %v2936_v36, 4  ;;  %v594_v19 = vsel %vm579_vm5, %v2794_v37, %v547_v12  ;;  %v550_v56 = vrot.slane %v2980_v15, 2 }
 0x2c2   :  { %669 = vmatpush1.bf16.msra.mxu0 %v635_v46 }
 0x2c3   :  { %v587_v52 = vsel %vm584_vm3, %v513_v27, %v525_v42  ;;  %v445_v53 = vpop.permute.xlu1 %444  ;;  %v588_v54 = vsel %vm584_vm3, %v514_v30, %v526_v45  ;;  %v2970_v6 = vpop.permute.xlu0 %472  ;;  %v3011_v30 = vld [vmem:[#allocation2 + $0x40] sm:$0xff] }
 0x2c4   :  { %v612_v58 = vmul.f32 %v587_v52, %v2944_v41  ;;  %v453_v62 = vsel %vm450_vm7, %v2879_v55, %v445_v53  ;;  %v613_v4 = vmul.f32 %v588_v54, %v2950_v48  ;;  %v3022_v52 = vld [vmem:[#allocation2 + $0x78] sm:$0xff]  ;;  %v597_v54 = vsel %vm579_vm5, %v2812_v44, %v550_v56 }
 0x2c5   :  { %v536_v5 = vrot.slane %v453_v62, 6  ;;  %v3034_v62 = vld [vmem:[#allocation2 + $0x50] sm:$0xff] }
 0x2c6   :  { %v638_v9 = vpack.c.bf16 %v613_v4, %v609_v2  ;;  %v637_v11 = vpack.c.bf16 %v612_v58, %v608_v49  ;;  %v3037_v4 = vld [vmem:[#allocation2 + $0x58] sm:$0xff] }
 0x2c7   :  { %v460_v13 = vpop.permute.xlu1 %459  ;;  %v591_v22 = vsel %vm589_vm8, %v524_v59, %v536_v5  ;;  %v2998_v23 = vpop.permute.xlu0 %485 }
 0x2c8   :  { %v2976_v14 = vsel %vm463_vm6, %v2888_v63, %v460_v13  ;;  %709 = vmatprep.subr.bf16.mxu1 %v638_v9  ;;  %v2992_v63 = vsel %vm463_vm6, %v460_v13, %v462_v33  ;;  %v615_v27 = vmul.f32 %v591_v22, %v2983_v18  ;;  %v618_v33 = vmul.f32 %v594_v19, %v3002_v26 }
 0x2c9   :  { %v548_v16 = vrot.slane %v2976_v14, 2  ;;  %710 = vmatpush1.bf16.msra.mxu1 %v637_v11  ;;  %v549_v29 = vrot.slane %v2992_v63, 2  ;;  %v621_v14 = vmul.f32 %v597_v54, %v3022_v52 }
 0x2cb   :  { %v449_v24 = vpop.permute.xlu1 %448  ;;  %v595_v25 = vsel %vm579_vm5, %v2796_v38, %v548_v16  ;;  %v482_v58 = vpop.permute.xlu0 %481 }
 0x2cc   :  { %v454_v59 = vsel %vm450_vm7, %v449_v24, %v2879_v55  ;;  %v619_v28 = vmul.f32 %v595_v25, %v2985_v20 }
 0x2cd   :  { %v535_v31 = vrot.slane %v454_v59, 6 }
 0x2ce   :  { %v640_v32 = vpack.c.bf16 %v619_v28, %v615_v27 }
 0x2cf   :  { %v590_v35 = vsel %vm589_vm8, %v523_v10, %v535_v31  ;;  %v447_v40 = vpop.permute.xlu1 %446  ;;  %v596_v10 = vsel %vm579_vm5, %v2806_v43, %v549_v29  ;;  %v488_v36 = vpop.permute.xlu0 %487  ;;  %v3056_v31 = vld [vmem:[#allocation2 + $0x88] sm:$0xff] }
 0x2d0   :  { %v614_v46 = vmul.f32 %v590_v35, %v3011_v30  ;;  %v451_v55 = vsel %vm450_vm7, %v447_v40, %v449_v24  ;;  %v452_v49 = vsel %vm450_vm7, %v445_v53, %v447_v40  ;;  %670 = vmatprep.subr.bf16.mxu0 %v640_v32  ;;  %v620_v22 = vmul.f32 %v596_v10, %v3028_v3  ;;  %v3058_v32 = vld [vmem:[#allocation2 + $0xa8] sm:$0xff] }
 0x2d1   :  { %v537_v2 = vrot.slane %v452_v49, 6  ;;  %v538_v53 = vrot.slane %v451_v55, 6 }
 0x2d2   :  { %v639_v5 = vpack.c.bf16 %v618_v33, %v614_v46 }
 0x2d3   :  { %v592_v9 = vsel %vm589_vm8, %v525_v42, %v537_v2  ;;  %v471_v11 = vpop.permute.xlu1 %470  ;;  %v593_v13 = vsel %vm589_vm8, %v526_v45, %v538_v53  ;;  %v497_v10 = vpop.permute.xlu0 %496  ;;  %v3068_v53 = vld [vmem:[#allocation2 + $0x80] sm:$0xff] }
 0x2d4   :  { %v616_v19 = vmul.f32 %v592_v9, %v3034_v62  ;;  %v478_v24 = vsel %vm476_vm9, %v471_v11, %v2970_v6  ;;  %671 = vmatpush1.bf16.msra.mxu0 %v639_v5  ;;  %v617_v39 = vmul.f32 %v593_v13, %v3037_v4  ;;  %v3070_v5 = vld [vmem:[#allocation2 + $0xa0] sm:$0xff]  ;;  %v490_v9 = vsel %vm489_vm10, %v2998_v23, %v488_v36 }
 0x2d5   :  { %v560_v25 = vrot.slane %v478_v24, 4  ;;  %v493_v13 = vsel %vm489_vm10, %v488_v36, %v482_v58 }
 0x2d6   :  { %v642_v42 = vpack.c.bf16 %v621_v14, %v617_v39  ;;  %v641_v59 = vpack.c.bf16 %v620_v22, %v616_v19 }
 0x2d7   :  { %v484_v45 = vpop.permute.xlu1 %483  ;;  %v599_v33 = vsel %vm584_vm3, %v548_v16, %v560_v25 }
 0x2d8   :  { %v491_v27 = vsel %vm489_vm10, %v484_v45, %v2998_v23  ;;  %711 = vmatprep.subr.bf16.mxu1 %v642_v42  ;;  %v492_v35 = vsel %vm489_vm10, %v482_v58, %v484_v45  ;;  %v623_v49 = vmul.f32 %v599_v33, %v3056_v31  ;;  %v3086_v23 = vld [vmem:[#allocation2 + $0xb0] sm:$0xff]  ;;  %v574_v42 = vrot.slane %v493_v13, 6  ;;  %v3093_v45 = vld [vmem:[#allocation2 + $0xc0] sm:$0x3f]  ;;  %v3097_v33 = vld [vmem:[#allocation2 + $0x98] sm:$0xff] }
 0x2d9   :  { %v572_v28 = vrot.slane %v491_v27, 6  ;;  %712 = vmatpush1.bf16.msra.mxu1 %v641_v59  ;;  %v571_v2 = vrot.slane %v492_v35, 6  ;;  %v3095_v27 = vld [vmem:[#allocation2 + $0xd8] sm:$0x3f] }
 0x2da   :  { %4475 = vst [vmem:[#allocation8_spill] sm:$0xff] %v3095_v27  ;;  %v3099_v35 = vld [vmem:[#allocation2 + $0xb8] sm:$0xff] }
 0x2db   :  { %v469_v40 = vpop.permute.xlu1 %468  ;;  %v603_v46 = vsel %vm589_vm8, %v560_v25, %v572_v28  ;;  %v3084_v25 = vld [vmem:[#allocation2 + $0x90] sm:$0xff] }
 0x2dc   :  { %v479_v55 = vsel %vm476_vm9, %v469_v40, %v471_v11  ;;  %v627_v54 = vmul.f32 %v603_v46, %v3058_v32  ;;  %v501_v46 = vpop.permute.xlu0 %500 }
 0x2dd   :  { %v559_v16 = vrot.slane %v479_v55, 4 }
 0x2de   :  { %v644_v14 = vpack.c.bf16 %v627_v54, %v623_v49 }
 0x2df   :  { %v598_v11 = vsel %vm584_vm3, %v547_v12, %v559_v16  ;;  %v602_v22 = vsel %vm589_vm8, %v559_v16, %v571_v2  ;;  %v475_v19 = vpop.permute.xlu1 %474  ;;  %v573_v12 = vrot.slane %v490_v9, 6 }
 0x2e0   :  { %v622_v24 = vmul.f32 %v598_v11, %v3068_v53  ;;  %v626_v39 = vmul.f32 %v602_v22, %v3070_v5  ;;  %v477_v58 = vsel %vm476_vm9, %v2970_v6, %v475_v19  ;;  %v480_v50 = vsel %vm476_vm9, %v475_v19, %v469_v40  ;;  %672 = vmatprep.subr.bf16.mxu0 %v644_v14  ;;  %v3119_v14 = vld [vmem:[#allocation2 + $0xc8] sm:$0x3f]  ;;  %v3121_v11 = vld [vmem:[#allocation2 + $0xd0] sm:$0x3f] }
 0x2e1   :  { %v561_v59 = vrot.slane %v477_v58, 4  ;;  %v562_v36 = vrot.slane %v480_v50, 4 }
 0x2e2   :  { %v643_v28 = vpack.c.bf16 %v626_v39, %v622_v24 }
 0x2e3   :  { %v600_v6 = vsel %vm584_vm3, %v549_v29, %v561_v59  ;;  %v604_v40 = vsel %vm589_vm8, %v561_v59, %v573_v12  ;;  %v495_v55 = vpop.permute.xlu1 %494  ;;  %v601_v49 = vsel %vm584_vm3, %v550_v56, %v562_v36  ;;  %v605_v54 = vsel %vm589_vm8, %v562_v36, %v574_v42 }
 0x2e4   :  { %v624_v2 = vmul.f32 %v600_v6, %v3084_v25  ;;  %v628_v16 = vmul.f32 %v604_v40, %v3086_v23  ;;  %v505_v9 = vsel %vm502_vm11, %v495_v55, %v497_v10  ;;  %v506_v63 = vsel %vm502_vm11, %v501_v46, %v495_v55  ;;  %673 = vmatpush1.bf16.msra.mxu0 %v643_v28 }
 0x2e5   :  { %v630_v29 = vmul.f32 %v505_v9, %v3093_v45  ;;  %v633_v13 = vmul.f32 %v506_v63, %v3095_v27  ;;  %v625_v15 = vmul.f32 %v601_v49, %v3097_v33  ;;  %v629_v56 = vmul.f32 %v605_v54, %v3099_v35  ;;  %v3150_v9 = vpop.f32.mrb[4].mxu0  ;;  %v3152_v63 = vpop.f32.mrb[4].mxu1 }
 0x2e6   :  { %v645_v22 = vpack.c.bf16 %v628_v16, %v624_v2  ;;  %4476 = vst [vmem:[#allocation9_spill] sm:$0xff] %v3150_v9  ;;  %4477 = vst [vmem:[#allocation10_spill] sm:$0xff] %v3152_v63 }
 0x2e7   :  { %v650_v19 = vpack.c.bf16 %v633_v13, %v633_v13  ;;  %v499_v24 = vpop.permute.xlu1 %498  ;;  %v646_v39 = vpack.c.bf16 %v629_v56, %v625_v15  ;;  %v647_v12 = vpack.c.bf16 %v630_v29, %v630_v29  ;;  %v255_v29 = vmul.f32 %v3150_v9, %v3150_v9  ;;  %v3156_v13 = vpop.f32.mrb[5].mxu0 }
 0x2e8   :  { %v503_v58 = vsel %vm502_vm11, %v499_v24, %v501_v46  ;;  %v504_v50 = vsel %vm502_vm11, %v497_v10, %v499_v24  ;;  %v634_v10 = vld [vmem:[%s4445_s5] sm:$0x7]  ;;  %4478 = vst [vmem:[#allocation11_spill] sm:$0xff] %v3156_v13  ;;  %v3158_v15 = vpop.f32.mrb[5].mxu1  ;;  %v238_v56 = vadd.f32 %v3156_v13, %v3150_v9 }
 0x2e9   :  { %v631_v42 = vmul.f32 %v504_v50, %v3119_v14  ;;  %v632_v59 = vmul.f32 %v503_v58, %v3121_v11  ;;  %713 = vmatprep.subr.bf16.mxu1 %v646_v39  ;;  %v657_v6 = vsel %vm655_vm12, %v647_v12, 0  ;;  %4479 = vst [vmem:[#allocation12_spill] sm:$0xff] %v3158_v15  ;;  %v219_v24 = vpop.f32.mrb[6].mxu1  ;;  %v257_v58 = vmul.f32 %v3152_v63, %v3152_v63 }
 0x2ea   :  { %714 = vmatpush1.bf16.msra.mxu1 %v645_v22  ;;  %v256_v22 = vmul.f32 %v3156_v13, %v3156_v13  ;;  %v220_v50 = vpop.f32.mrb[7].mxu1  ;;  %v239_v12 = vadd.f32 %v238_v56, %v3152_v63 }
 0x2eb   :  { %v648_v36 = vpack.c.bf16 %v631_v42, %v631_v42  ;;  %v649_v28 = vpack.c.bf16 %v632_v59, %v632_v59  ;;  %2382 = vmatprep.subr.msk.bf16.mxu1 %vm655_vm12, %v650_v19  ;;  %v168_v19 = vpop.f32.mrb[6].mxu0 }
 0x2ec   :  { %v169_v39 = vpop.f32.mrb[7].mxu0  ;;  %v269_v42 = vadd.f32 %v256_v22, %v255_v29  ;;  %v3168_v59 = vadd.f32 %v239_v12, %v3158_v15 }
 0x2ed   :  { %2380 = vmatprep.subr.msk.bf16.mxu0 %vm655_vm12, %v648_v36  ;;  %v663_v46 = vsel %vm655_vm12, %v649_v28, 0  ;;  %v258_v36 = vmul.f32 %v3158_v15, %v3158_v15 }
 0x2ee   :  { %675 = vmatpush1.bf16.msra.mxu0 %v657_v6  ;;  %716 = vmatpush1.bf16.msra.mxu1 %v663_v46  ;;  %v270_v28 = vadd.f32 %v269_v42, %v257_v58 }
 0x2f0   :  { %v3172_v6 = vadd.f32 %v270_v28, %v258_v36 }
 0x2f1   :  { %2381 = vmatmul.mubr.msk.bf16.vlgmr.msra.gmra.mrb[8].mxu0 %vm651_vm13, %v634_v10  ;;  %2383 = vmatmul.mubr.msk.bf16.vlgmr.msra.gmra.mrb[8].mxu1 %vm651_vm13, %v634_v10 }
 0x2f2   :  { %1121 = vmatprep.mubr.bf16.mxu0 %v4452_v0  ;;  %1162 = vmatprep.mubr.bf16.mxu1 %v4452_v0 }
 0x311   :  { %v268_v46 = vpop.xlane.xlu0 %267 }
 0x312   :  { %v275_v58 = vmul.f32 0.001953125, %v268_v46 }
 0x326   :  { %v237_v40 = vpop.xlane.xlu1 %236 }
 0x327   :  { %v3140_v55 = vmul.f32 0.001953125, %v237_v40 }
 0x329   :  { %v278_v10 = vmul.f32 %v3140_v55, %v3140_v55 }
 0x32b   :  { %v281_v49 = vsub.f32 %v275_v58, %v278_v10  ;;  %v226_v10 = vld [vmem:[%s4444_s4 + $0x8] sm:$0xff] }
 0x3c4   :  { %v3176_v40 = vpop.f32.mrb[8].mxu0  ;;  %v3178_v19 = vpop.f32.mrb[8].mxu1 }
 0x3c5   :  { %v752_v29 = vsel %vm579_vm5, %v3176_v40, 0.0  ;;  %v762_v56 = vmul.f32 %v3176_v40, %v3176_v40  ;;  %v764_v22 = vmul.f32 %v3178_v19, %v3178_v19  ;;  %v3186_v24 = vpop.f32.mrb[9].mxu0  ;;  %v3188_v39 = vpop.f32.mrb[9].mxu1  ;;  %v755_v50 = vsel %vm579_vm5, %v3178_v19, 0.0 }
 0x3c6   :  { %v753_v12 = vsel %vm579_vm5, %v3186_v24, 0.0  ;;  %v763_v42 = vmul.f32 %v3186_v24, %v3186_v24  ;;  %v706_v36 = vpop.f32.mrb[10].mxu0  ;;  %v747_v28 = vpop.f32.mrb[10].mxu1  ;;  %v765_v46 = vmul.f32 %v3188_v39, %v3188_v39  ;;  %v757_v27 = vsel %vm579_vm5, %v3188_v39, 0.0 }
 0x3c7   :  { %v766_v0 = vsel %vm579_vm5, %v762_v56, 0.0  ;;  %v754_v2 = vadd.f32 %v753_v12, %v752_v29  ;;  %v707_v54 = vpop.f32.mrb[11].mxu0  ;;  %v748_v16 = vpop.f32.mrb[11].mxu1  ;;  %v769_v63 = vsel %vm579_vm5, %v764_v22, 0.0  ;;  %v284_v29 = vmax.f32 %v281_v49, 0.0 }
 0x3c8   :  { %v767_v15 = vsel %vm579_vm5, %v763_v42, 0.0  ;;  %v771_v56 = vsel %vm579_vm5, %v765_v46, 0.0 }
 0x3c9   :  { %v756_v13 = vadd.f32 %v755_v50, %v754_v2  ;;  %v768_v9 = vadd.f32 %v767_v15, %v766_v0  ;;  %v299_v16 = vadd.f32 1e-05, %v284_v29  ;;  %v223_v0 = vld [vmem:[%s4443_s3 + $0x8] sm:$0xff] }
 0x3cb   :  { %v758_v36 = vadd.f32 %v757_v27, %v756_v13  ;;  %v770_v28 = vadd.f32 %v769_v63, %v768_v9  ;;  %2435 = vrsqrt.f32 %v299_v16 }
 0x3cd   :  { %759 = vadd.xlane.f32.xlu0 %v758_v36  ;;  %v772_v54 = vadd.f32 %v771_v56, %v770_v28  ;;  %v750_v28 = vld [vmem:[%s4446_s6] sm:$0x3f] }
 0x3cf   :  { %773 = vadd.xlane.f32.xlu1 %v772_v54  ;;  %v4481_v54 = vsub.f32 %v2776_v1, %v3140_v55 }
 0x3d5   :  { %v2436_v22 = vpop.eup %2435 }
 0x3d6   :  { %v305_v27 = vmul.f32 %v2436_v22, %v223_v0  ;;  %v4482_v22 = vsub.f32 %v2770_v61, %v3140_v55 }
 0x3e0   :  { %341 = vperm.xlu1 %2425, %v226_v10  }
 0x3e3   :  { %314 = vperm.xlu0 %2426, %v305_v27  }
 0x45a   :  { %v760_v2 = vpop.xlane.xlu0 %759 }
 0x45b   :  { %v761_v9 = vmul.f32 0.001953125, %v760_v2 }
 0x45c   :  { %v774_v49 = vpop.xlane.xlu1 %773 }
 0x45d   :  { %v775_v63 = vmul.f32 0.001953125, %v774_v49  ;;  %v776_v13 = vmul.f32 %v761_v9, %v761_v9  ;;  %v779_v15 = vsub.f32 %v3176_v40, %v761_v9  ;;  %v780_v58 = vsub.f32 %v3186_v24, %v761_v9  ;;  %v751_v40 = vld [vmem:[%s4447_s7] sm:$0x3f] }
 0x45e   :  { %v781_v50 = vsub.f32 %v3178_v19, %v761_v9  ;;  %v782_v12 = vsub.f32 %v3188_v39, %v761_v9  ;;  %v4480_v19 = vsub.f32 %v2764_v57, %v3140_v55 }
 0x45f   :  { %v777_v42 = vsub.f32 %v775_v63, %v776_v13 }
 0x460   :  { %v342_v10 = vpop.permute.xlu1 %341 }
 0x461   :  { %v778_v46 = vmax.f32 %v777_v42, 0.0 }
 0x462   :  { %v315_v24 = vpop.permute.xlu0 %314 }
 0x463   :  { %v783_v36 = vadd.f32 1e-05, %v778_v46  ;;  %v326_v39 = vmul.f32 %v315_v24, %v4480_v19  ;;  %v329_v16 = vmul.f32 %v315_v24, %v4481_v54  ;;  %v327_v0 = vmul.f32 %v315_v24, %v4482_v22 }
 0x464   :  { %v4483_v46 = vsub.f32 %v2768_v60, %v3140_v55  ;;  %v825_v60 = vrot.slane %v2812_v44, 6 }
 0x465   :  { %2437 = vrsqrt.f32 %v783_v36  ;;  %v3229_v27 = vadd.f32 %v342_v10, %v326_v39  ;;  %v3231_v2 = vadd.f32 %v342_v10, %v329_v16  ;;  %v3233_v9 = vadd.f32 %v342_v10, %v327_v0 }
 0x466   :  { %v328_v36 = vmul.f32 %v315_v24, %v4483_v46 }
 0x467   :  { %v4470_v49 = vmax.f32 %v3229_v27, 0.0  ;;  %v4467_v57 = vmax.f32 %v3231_v2, 0.0  ;;  %v4469_v61 = vmax.f32 %v3233_v9, 0.0 }
 0x468   :  { %v3255_v24 = vadd.f32 %v342_v10, %v328_v36  ;;  %v819_v10 = vrot.slane %v2796_v38, 6 }
 0x469   :  { %v820_v39 = vrot.slane %v4469_v61, 6 }
 0x46f   :  { %v2438_v56 = vpop.eup %2437 }
 0x470   :  { %v785_v29 = vmul.f32 %v2438_v56, %v750_v28  ;;  %v817_v28 = vrot.slane %v4470_v49, 6  ;;  %v826_v56 = vrot.slane %v4467_v57, 6 }
 0x472   :  { %788 = vperm.xlu1 %2425, %v785_v29   ;;  %v827_v16 = vsel %vm589_vm8, %v825_v60, %v826_v56 }
 0x476   :  { %797 = vperm.xlu1 %2425, %v751_v40  }
 0x4f1   :  { %v789_v63 = vpop.permute.xlu1 %788 }
 0x4f2   :  { %v791_v13 = vmul.f32 %v789_v63, %v779_v15  ;;  %v792_v42 = vmul.f32 %v789_v63, %v780_v58  ;;  %v794_v1 = vmul.f32 %v789_v63, %v782_v12  ;;  %v816_v58 = vrot.slane %v2794_v37, 6 }
 0x4f3   :  { %v793_v0 = vmul.f32 %v789_v63, %v781_v50  ;;  %v822_v63 = vrot.slane %v2806_v43, 6 }
 0x4f4   :  { %v818_v54 = vsel %vm589_vm8, %v816_v58, %v817_v28 }
 0x4f5   :  { %v798_v29 = vpop.permute.xlu1 %797 }
 0x4f6   :  { %v3245_v40 = vadd.f32 %v798_v29, %v791_v13  ;;  %v3247_v19 = vadd.f32 %v798_v29, %v792_v42  ;;  %v3249_v15 = vadd.f32 %v798_v29, %v794_v1  ;;  %v4468_v13 = vmax.f32 %v3255_v24, 0.0 }
 0x4f7   :  { %v821_v42 = vsel %vm589_vm8, %v819_v10, %v820_v39  ;;  %v3277_v1 = vadd.f32 %v798_v29, %v793_v0 }
 0x4f8   :  { %4484 = vst [vmem:[#allocation13_spill] sm:$0xff] %v3245_v40  ;;  %4485 = vst [vmem:[#allocation14_spill] sm:$0xff] %v3247_v19  ;;  %v4464_v55 = vmax.f32 %v3245_v40, 0.0  ;;  %v4465_v12 = vmax.f32 %v3249_v15, 0.0  ;;  %v4466_v22 = vmax.f32 %v3247_v19, 0.0  ;;  %v823_v38 = vrot.slane %v4468_v13, 6 }
 0x4f9   :  { %4486 = vst [vmem:[#allocation15_spill] sm:$0xff] %v3249_v15  ;;  %4487 = vst [vmem:[#allocation16_spill] sm:$0xff] %v3277_v1  ;;  %v4463_v50 = vmax.f32 %v3277_v1, 0.0 }
 0x4fa   :  { %v3264_v37 = vadd.f32 %v818_v54, %v4464_v55  ;;  %v3268_v44 = vadd.f32 %v827_v16, %v4465_v12  ;;  %v3281_v46 = vadd.f32 %v821_v42, %v4466_v22  ;;  %v824_v36 = vsel %vm589_vm8, %v822_v63, %v823_v38 }
 0x4fb   :  { %v3298_v28 = vadd.f32 %v824_v36, %v4463_v50 }
 0x4fc   :  { %854 = vrot.lane.b32.xlu0 %v3268_v44, %s2573_s29  ;;  %848 = vrot.lane.b32.xlu1 %v3264_v37, %s2573_s29 }
 0x500   :  { %836 = vrot.lane.b32.xlu0 %v3264_v37, %s2575_s12  ;;  %850 = vrot.lane.b32.xlu1 %v3281_v46, %s2573_s29 }
 0x504   :  { %842 = vrot.lane.b32.xlu0 %v3268_v44, %s2575_s12  ;;  %860 = vrot.lane.b32.xlu1 %v3264_v37, %s2574_s30 }
 0x508   :  { %864 = vrot.lane.b32.xlu0 %v3298_v28, %s2574_s30  ;;  %862 = vrot.lane.b32.xlu1 %v3281_v46, %s2574_s30 }
 0x50c   :  { %874 = vrot.lane.b32.xlu0 %v3281_v46, %s2576_s13  ;;  %866 = vrot.lane.b32.xlu1 %v3268_v44, %s2574_s30 }
 0x510   :  { %888 = vrot.lane.b32.xlu0 %v3298_v28, %s2577_s14  ;;  %838 = vrot.lane.b32.xlu1 %v3281_v46, %s2575_s12 }
 0x514   :  { %878 = vrot.lane.b32.xlu0 %v3268_v44, %s2576_s13  ;;  %852 = vrot.lane.b32.xlu1 %v3298_v28, %s2573_s29 }
 0x518   :  { %876 = vrot.lane.b32.xlu0 %v3298_v28, %s2576_s13  ;;  %872 = vrot.lane.b32.xlu1 %v3264_v37, %s2576_s13 }
 0x51c   :  { %898 = vrot.lane.b32.xlu0 %v3281_v46, %s2578_s15  ;;  %886 = vrot.lane.b32.xlu1 %v3281_v46, %s2577_s14 }
 0x520   :  { %910 = vrot.lane.b32.xlu0 %v3281_v46, %s2579_s1  ;;  %840 = vrot.lane.b32.xlu1 %v3298_v28, %s2575_s12 }
 0x524   :  { %896 = vrot.lane.b32.xlu0 %v3264_v37, %s2578_s15  ;;  %884 = vrot.lane.b32.xlu1 %v3264_v37, %s2577_s14 }
 0x528   :  { %902 = vrot.lane.b32.xlu0 %v3268_v44, %s2578_s15  ;;  %890 = vrot.lane.b32.xlu1 %v3268_v44, %s2577_s14 }
 0x52c   :  { %920 = vrot.lane.b32.xlu0 %v3264_v37, %s2580_s16  ;;  %900 = vrot.lane.b32.xlu1 %v3298_v28, %s2578_s15 }
 0x530   :  { %924 = vrot.lane.b32.xlu0 %v3298_v28, %s2580_s16  ;;  %912 = vrot.lane.b32.xlu1 %v3298_v28, %s2579_s1 }
 0x534   :  { %908 = vrot.lane.b32.xlu1 %v3264_v37, %s2579_s1 }
 0x538   :  { %914 = vrot.lane.b32.xlu1 %v3268_v44, %s2579_s1 }
 0x53c   :  { %922 = vrot.lane.b32.xlu1 %v3281_v46, %s2580_s16 }
 0x540   :  { %926 = vrot.lane.b32.xlu1 %v3268_v44, %s2580_s16 }
 0x54f   :  { %241 = vadd.xlane.f32.xlu0 %v3168_v59 }
 0x564   :  { %272 = vadd.xlane.f32.xlu1 %v3172_v6 }
 0x56e   :  { %v855_v43 = vpop.permute.xlu0 %854  ;;  %v849_v56 = vpop.permute.xlu1 %848 }
 0x56f   :  { %v859_v0 = vsel %vm424_vm2, %v855_v43, %v849_v56 }
 0x570   :  { %v936_v36 = vrot.slane %v859_v0, 2 }
 0x572   :  { %v837_v29 = vpop.permute.xlu0 %836  ;;  %v851_v58 = vpop.permute.xlu1 %850 }
 0x573   :  { %v858_v42 = vsel %vm424_vm2, %v849_v56, %v851_v58 }
 0x574   :  { %v937_v50 = vrot.slane %v858_v42, 2 }
 0x576   :  { %v843_v60 = vpop.permute.xlu0 %842  ;;  %v861_v39 = vpop.permute.xlu1 %860 }
 0x577   :  { %v847_v55 = vsel %vm411_vm4, %v843_v60, %v837_v29 }
 0x57a   :  { %v865_v54 = vpop.permute.xlu0 %864  ;;  %v863_v16 = vpop.permute.xlu1 %862 }
 0x57b   :  { %v870_v10 = vsel %vm437_vm1, %v861_v39, %v863_v16 }
 0x57c   :  { %v949_v59 = vrot.slane %v870_v10, 4  ;;  %v1004_v10 = vsel %vm579_vm5, %v847_v55, %v936_v36 }
 0x57d   :  { %v1028_v49 = vmul.f32 %v1004_v10, %v2912_v17 }
 0x57e   :  { %v875_v38 = vpop.permute.xlu0 %874  ;;  %v867_v6 = vpop.permute.xlu1 %866  ;;  %v1009_v56 = vsel %vm584_vm3, %v937_v50, %v949_v59 }
 0x57f   :  { %v3362_v63 = vsel %vm437_vm1, %v867_v6, %v861_v39 }
 0x580   :  { %v948_v12 = vrot.slane %v3362_v63, 4  ;;  %v1033_v63 = vmul.f32 %v1009_v56, %v2899_v8  ;;  %v869_v8 = vsel %vm437_vm1, %v863_v16, %v865_v54 }
 0x582   :  { %v1008_v22 = vsel %vm584_vm3, %v936_v36, %v948_v12  ;;  %v3368_v57 = vpop.permute.xlu0 %888  ;;  %v839_v13 = vpop.permute.xlu1 %838 }
 0x583   :  { %v846_v39 = vsel %vm411_vm4, %v837_v29, %v839_v13  ;;  %v1032_v0 = vmul.f32 %v1008_v22, %v2916_v21 }
 0x584   :  { %v1005_v42 = vsel %vm579_vm5, %v846_v39, %v937_v50 }
 0x585   :  { %v1029_v61 = vmul.f32 %v1005_v42, %v2897_v7  ;;  %v1058_v19 = vpack.c.bf16 %v1032_v0, %v1028_v49  ;;  %v868_v49 = vsel %vm437_vm1, %v865_v54, %v867_v6 }
 0x586   :  { %v879_v1 = vpop.permute.xlu0 %878  ;;  %v853_v40 = vpop.permute.xlu1 %852 }
 0x587   :  { %v1059_v15 = vpack.c.bf16 %v1033_v63, %v1029_v61  ;;  %v857_v55 = vsel %vm424_vm2, %v851_v58, %v853_v40  ;;  %v856_v21 = vsel %vm424_vm2, %v853_v40, %v855_v43  ;;  %v950_v58 = vrot.slane %v869_v8, 4 }
 0x588   :  { %v938_v61 = vrot.slane %v857_v55, 2  ;;  %v951_v40 = vrot.slane %v868_v49, 4 }
 0x589   :  { %1089 = vmatprep.subr.bf16.mxu0 %v1059_v15  ;;  %v939_v15 = vrot.slane %v856_v21, 2 }
 0x58a   :  { %v877_v36 = vpop.permute.xlu0 %876  ;;  %1090 = vmatpush1.bf16.msra.mxu0 %v1058_v19  ;;  %v873_v29 = vpop.permute.xlu1 %872  ;;  %v1010_v16 = vsel %vm584_vm3, %v938_v61, %v950_v58 }
 0x58b   :  { %v882_v7 = vsel %vm450_vm7, %v873_v29, %v875_v38  ;;  %v883_v54 = vsel %vm450_vm7, %v879_v1, %v873_v29  ;;  %v881_v6 = vsel %vm450_vm7, %v875_v38, %v877_v36  ;;  %v1011_v0 = vsel %vm584_vm3, %v939_v15, %v951_v40 }
 0x58c   :  { %v961_v17 = vrot.slane %v882_v7, 6  ;;  %v960_v29 = vrot.slane %v883_v54, 6  ;;  %v1034_v21 = vmul.f32 %v1010_v16, %v2944_v41  ;;  %v1035_v49 = vmul.f32 %v1011_v0, %v2950_v48 }
 0x58e   :  { %v899_v22 = vpop.permute.xlu0 %898  ;;  %v887_v50 = vpop.permute.xlu1 %886  ;;  %v1013_v43 = vsel %vm589_vm8, %v949_v59, %v961_v17 }
 0x58f   :  { %v3392_v19 = vsel %vm463_vm6, %v887_v50, %v3368_v57  ;;  %v1037_v63 = vmul.f32 %v1013_v43, %v2983_v18  ;;  %v880_v18 = vsel %vm450_vm7, %v877_v36, %v879_v1 }
 0x590   :  { %v973_v56 = vrot.slane %v3392_v19, 2 }
 0x592   :  { %v1017_v10 = vsel %vm579_vm5, %v3281_v46, %v973_v56  ;;  %v841_v39 = vpop.permute.xlu1 %840  ;;  %v911_v38 = vpop.permute.xlu0 %910 }
 0x593   :  { %v844_v59 = vsel %vm411_vm4, %v841_v39, %v843_v60  ;;  %v845_v42 = vsel %vm411_vm4, %v839_v13, %v841_v39  ;;  %v1041_v55 = vmul.f32 %v1017_v10, %v2985_v20 }
 0x594   :  { %v1006_v7 = vsel %vm579_vm5, %v845_v42, %v938_v61  ;;  %v1007_v46 = vsel %vm579_vm5, %v844_v59, %v939_v15  ;;  %v962_v61 = vrot.slane %v881_v6, 6  ;;  %v1012_v15 = vsel %vm589_vm8, %v948_v12, %v960_v29 }
 0x595   :  { %v1030_v8 = vmul.f32 %v1006_v7, %v2931_v34  ;;  %v1031_v17 = vmul.f32 %v1007_v46, %v2948_v47  ;;  %v1063_v60 = vpack.c.bf16 %v1041_v55, %v1037_v63  ;;  %v963_v34 = vrot.slane %v880_v18, 6 }
 0x596   :  { %v885_v13 = vpop.permute.xlu1 %884  ;;  %v897_v47 = vpop.permute.xlu0 %896  ;;  %v1036_v1 = vmul.f32 %v1012_v15, %v3011_v30  ;;  %v1014_v6 = vsel %vm589_vm8, %v950_v58, %v962_v61 }
 0x597   :  { %v1060_v20 = vpack.c.bf16 %v1034_v21, %v1030_v8  ;;  %v894_v43 = vsel %vm463_vm6, %v885_v13, %v887_v50  ;;  %1091 = vmatprep.subr.bf16.mxu0 %v1063_v60  ;;  %v1061_v41 = vpack.c.bf16 %v1035_v49, %v1031_v17  ;;  %v1015_v39 = vsel %vm589_vm8, %v951_v40, %v963_v34 }
 0x598   :  { %v972_v16 = vrot.slane %v894_v43, 2  ;;  %v906_v42 = vsel %vm476_vm9, %v897_v47, %v899_v22  ;;  %v1039_v55 = vmul.f32 %v1015_v39, %v3037_v4 }
 0x599   :  { %1130 = vmatprep.subr.bf16.mxu1 %v1061_v41 }
 0x59a   :  { %v1016_v48 = vsel %vm579_vm5, %v3264_v37, %v972_v16  ;;  %1131 = vmatpush1.bf16.msra.mxu1 %v1060_v20  ;;  %v891_v54 = vpop.permute.xlu1 %890  ;;  %v903_v63 = vpop.permute.xlu0 %902 }
 0x59b   :  { %v1040_v36 = vmul.f32 %v1016_v48, %v3002_v26  ;;  %v892_v50 = vsel %vm463_vm6, %v3368_v57, %v891_v54  ;;  %v895_v12 = vsel %vm463_vm6, %v891_v54, %v885_v13  ;;  %v1038_v26 = vmul.f32 %v1014_v6, %v3034_v62 }
 0x59c   :  { %v974_v10 = vrot.slane %v892_v50, 2  ;;  %v975_v0 = vrot.slane %v895_v12, 2  ;;  %v984_v62 = vrot.slane %v906_v42, 4  ;;  %v907_v8 = vsel %vm476_vm9, %v903_v63, %v897_v47 }
 0x59d   :  { %v1062_v37 = vpack.c.bf16 %v1040_v36, %v1036_v1  ;;  %v987_v17 = vrot.slane %v907_v8, 4  ;;  %v4491_v8 = vld [vmem:[#allocation11_spill] sm:$0xff] }
 0x59e   :  { %v1018_v59 = vsel %vm579_vm5, %v3298_v28, %v974_v10  ;;  %v901_v30 = vpop.permute.xlu1 %900  ;;  %v1019_v57 = vsel %vm579_vm5, %v3268_v44, %v975_v0  ;;  %v921_v19 = vpop.permute.xlu0 %920 }
 0x59f   :  { %v1042_v58 = vmul.f32 %v1018_v59, %v3028_v3  ;;  %1092 = vmatpush1.bf16.msra.mxu0 %v1062_v37  ;;  %v905_v40 = vsel %vm476_vm9, %v899_v22, %v901_v30  ;;  %v1043_v28 = vmul.f32 %v1019_v57, %v3022_v52  ;;  %v904_v44 = vsel %vm476_vm9, %v901_v30, %v903_v63 }
 0x5a0   :  { %v985_v29 = vrot.slane %v905_v40, 4  ;;  %v1020_v52 = vsel %vm584_vm3, %v972_v16, %v984_v62  ;;  %v986_v18 = vrot.slane %v904_v44, 4  ;;  %v1023_v15 = vsel %vm584_vm3, %v975_v0, %v987_v17  ;;  %v4488_v40 = vld [vmem:[#allocation8_spill] sm:$0xff]  ;;  %v4492_v44 = vld [vmem:[#allocation10_spill] sm:$0xff] }
 0x5a1   :  { %v1064_v21 = vpack.c.bf16 %v1042_v58, %v1038_v26  ;;  %v1065_v46 = vpack.c.bf16 %v1043_v28, %v1039_v55  ;;  %v1044_v61 = vmul.f32 %v1020_v52, %v3068_v53 }
 0x5a2   :  { %v913_v7 = vpop.permute.xlu1 %912  ;;  %v1021_v4 = vsel %vm584_vm3, %v973_v56, %v985_v29  ;;  %v1022_v47 = vsel %vm584_vm3, %v974_v10, %v986_v18  ;;  %v925_v36 = vpop.permute.xlu0 %924 }
 0x5a3   :  { %v917_v3 = vsel %vm489_vm10, %v911_v38, %v913_v7  ;;  %1132 = vmatprep.subr.bf16.mxu1 %v1065_v46  ;;  %v1045_v20 = vmul.f32 %v1021_v4, %v3056_v31  ;;  %v1046_v53 = vmul.f32 %v1022_v47, %v3084_v25 }
 0x5a4   :  { %v997_v22 = vrot.slane %v917_v3, 6  ;;  %1133 = vmatpush1.bf16.msra.mxu1 %v1064_v21 }
 0x5a6   :  { %v1025_v60 = vsel %vm589_vm8, %v985_v29, %v997_v22  ;;  %v909_v49 = vpop.permute.xlu1 %908  ;;  %v4489_v29 = vmov 0   ;;  %v4493_v22 = vld [vmem:[#allocation12_spill] sm:$0xff] }
 0x5a7   :  { %v918_v13 = vsel %vm489_vm10, %v909_v49, %v911_v38  ;;  %v1049_v43 = vmul.f32 %v1025_v60, %v3058_v32 }
 0x5a8   :  { %v996_v41 = vrot.slane %v918_v13, 6 }
 0x5a9   :  { %v1067_v56 = vpack.c.bf16 %v1049_v43, %v1045_v20  ;;  %v224_v43 = vld [vmem:[%s4443_s3 + $0x10] sm:$0xff] }
 0x5aa   :  { %v1024_v16 = vsel %vm589_vm8, %v984_v62, %v996_v41  ;;  %v915_v34 = vpop.permute.xlu1 %914 }
 0x5ab   :  { %v1048_v48 = vmul.f32 %v1024_v16, %v3070_v5  ;;  %v916_v38 = vsel %vm489_vm10, %v913_v7, %v915_v34  ;;  %v919_v31 = vsel %vm489_vm10, %v915_v34, %v909_v49  ;;  %1093 = vmatprep.subr.bf16.mxu0 %v1067_v56  ;;  %v1047_v5 = vmul.f32 %v1023_v15, %v3097_v33  ;;  %v4490_v7 = vld [vmem:[#allocation9_spill] sm:$0xff] }
 0x5ac   :  { %v998_v32 = vrot.slane %v916_v38, 6  ;;  %v999_v54 = vrot.slane %v919_v31, 6 }
 0x5ad   :  { %v1066_v1 = vpack.c.bf16 %v1048_v48, %v1044_v61 }
 0x5ae   :  { %v1026_v50 = vsel %vm589_vm8, %v986_v18, %v998_v32  ;;  %v1027_v6 = vsel %vm589_vm8, %v987_v17, %v999_v54  ;;  %v923_v12 = vpop.permute.xlu1 %922 }
 0x5af   :  { %v1050_v10 = vmul.f32 %v1026_v50, %v3086_v23  ;;  %v929_v39 = vsel %vm502_vm11, %v923_v12, %v925_v36  ;;  %v930_v0 = vsel %vm502_vm11, %v921_v19, %v923_v12  ;;  %1094 = vmatpush1.bf16.msra.mxu0 %v1066_v1  ;;  %v1051_v37 = vmul.f32 %v1027_v6, %v3099_v35 }
 0x5b0   :  { %v1052_v25 = vmul.f32 %v930_v0, %v3093_v45  ;;  %v1053_v59 = vmul.f32 %v929_v39, %v3119_v14  ;;  %v2384_v14 = vld [vmem:[%s4445_s5 + $0x4] sm:$0x7] }
 0x5b1   :  { %v1069_v30 = vpack.c.bf16 %v1051_v37, %v1047_v5  ;;  %v1068_v26 = vpack.c.bf16 %v1050_v10, %v1046_v53 }
 0x5b2   :  { %v1070_v42 = vpack.c.bf16 %v1052_v25, %v1052_v25  ;;  %v1071_v57 = vpack.c.bf16 %v1053_v59, %v1053_v59  ;;  %v927_v33 = vpop.permute.xlu1 %926 }
 0x5b3   :  { %v928_v23 = vsel %vm502_vm11, %v925_v36, %v927_v33  ;;  %v931_v58 = vsel %vm502_vm11, %v927_v33, %v921_v19  ;;  %1134 = vmatprep.subr.bf16.mxu1 %v1069_v30 }
 0x5b4   :  { %v1054_v63 = vmul.f32 %v928_v23, %v3121_v11  ;;  %v1055_v35 = vmul.f32 %v931_v58, %v4488_v40  ;;  %2385 = vmatprep.subr.msk.bf16.mxu0 %vm655_vm12, %v1071_v57  ;;  %1135 = vmatpush1.bf16.msra.mxu1 %v1068_v26  ;;  %v1078_v45 = vsel %vm655_vm12, %v1070_v42, 0  ;;  %v227_v42 = vld [vmem:[%s4444_s4 + $0x10] sm:$0xff] }
 0x5b5   :  { %1096 = vmatpush1.bf16.msra.mxu0 %v1078_v45 }
 0x5b6   :  { %v1072_v55 = vpack.c.bf16 %v1054_v63, %v1054_v63  ;;  %v1073_v28 = vpack.c.bf16 %v1055_v35, %v1055_v35 }
 0x5b8   :  { %2386 = vmatmul.mubr.msk.bf16.vlgmr.msra.gmra.mrb[12].mxu0 %vm651_vm13, %v2384_v14  ;;  %2387 = vmatprep.subr.msk.bf16.mxu1 %vm655_vm12, %v1073_v28  ;;  %v1084_v11 = vsel %vm655_vm12, %v1072_v55, 0 }
 0x5b9   :  { %1137 = vmatpush1.bf16.msra.mxu1 %v1084_v11  ;;  %1540 = vmatprep.mubr.bf16.mxu0 %v4489_v29 }
 0x5bc   :  { %2388 = vmatmul.mubr.msk.bf16.vlgmr.msra.gmra.mrb[12].mxu1 %vm651_vm13, %v2384_v14 }
 0x5bd   :  { %1581 = vmatprep.mubr.bf16.mxu1 %v4489_v29 }
 0x5dc   :  { %v242_v21 = vpop.xlane.xlu0 %241 }
 0x5dd   :  { %v3499_v62 = vmul.f32 0.001953125, %v242_v21  ;;  %v2389_v21 = vld [vmem:[%s4446_s6 + $0x8] sm:$0x3f] }
 0x5df   :  { %v294_v46 = vsub.f32 %v4490_v7, %v3499_v62  ;;  %v295_v3 = vsub.f32 %v4491_v8, %v3499_v62  ;;  %v296_v4 = vsub.f32 %v4492_v44, %v3499_v62  ;;  %v297_v52 = vsub.f32 %v4493_v22, %v3499_v62 }
 0x5e0   :  { %v279_v60 = vmul.f32 %v3499_v62, %v3499_v62 }
 0x5f1   :  { %v273_v17 = vpop.xlane.xlu1 %272 }
 0x5f2   :  { %v276_v49 = vmul.f32 0.001953125, %v273_v17 }
 0x5f4   :  { %v282_v18 = vsub.f32 %v276_v49, %v279_v60  ;;  %v2390_v49 = vld [vmem:[%s4447_s7 + $0x8] sm:$0x3f] }
 0x5f6   :  { %v285_v13 = vmax.f32 %v282_v18, 0.0 }
 0x5f8   :  { %v300_v20 = vadd.f32 1e-05, %v285_v13 }
 0x5fa   :  { %2439 = vrsqrt.f32 %v300_v20 }
 0x604   :  { %v2440_v19 = vpop.eup %2439 }
 0x605   :  { %v306_v41 = vmul.f32 %v2440_v19, %v224_v43 }
 0x607   :  { %319 = vperm.xlu1 %2425, %v306_v41  }
 0x686   :  { %v320_v18 = vpop.permute.xlu1 %319 }
 0x687   :  { %v330_v20 = vmul.f32 %v320_v18, %v294_v46  ;;  %v331_v43 = vmul.f32 %v320_v18, %v295_v3  ;;  %v332_v19 = vmul.f32 %v320_v18, %v296_v4  ;;  %v333_v41 = vmul.f32 %v320_v18, %v297_v52 }
 0x68b   :  { %v3514_v56 = vpop.f32.mrb[12].mxu0 }
 0x68c   :  { %v1175_v61 = vsel %vm579_vm5, %v3514_v56, 0.0  ;;  %v1185_v15 = vmul.f32 %v3514_v56, %v3514_v56  ;;  %v3520_v16 = vpop.f32.mrb[13].mxu0 }
 0x68d   :  { %v1176_v34 = vsel %vm579_vm5, %v3520_v16, 0.0  ;;  %v1186_v47 = vmul.f32 %v3520_v16, %v3520_v16  ;;  %v1127_v48 = vpop.f32.mrb[14].mxu0 }
 0x68e   :  { %v1189_v38 = vsel %vm579_vm5, %v1185_v15, 0.0  ;;  %v1177_v31 = vadd.f32 %v1176_v34, %v1175_v61  ;;  %v1128_v32 = vpop.f32.mrb[15].mxu0 }
 0x68f   :  { %v1190_v54 = vsel %vm579_vm5, %v1186_v47, 0.0  ;;  %v1164_v1 = vpop.f32.mrb[12].mxu1 }
 0x690   :  { %v1178_v53 = vsel %vm579_vm5, %v1164_v1, 0.0  ;;  %v1187_v36 = vmul.f32 %v1164_v1, %v1164_v1  ;;  %v1166_v50 = vpop.f32.mrb[13].mxu1  ;;  %v1191_v6 = vadd.f32 %v1190_v54, %v1189_v38 }
 0x691   :  { %v1188_v12 = vmul.f32 %v1166_v50, %v1166_v50  ;;  %v1168_v5 = vpop.f32.mrb[14].mxu1  ;;  %v1179_v10 = vadd.f32 %v1178_v53, %v1177_v31  ;;  %v1180_v39 = vsel %vm579_vm5, %v1166_v50, 0.0 }
 0x692   :  { %v1169_v0 = vpop.f32.mrb[15].mxu1  ;;  %v1192_v37 = vsel %vm579_vm5, %v1187_v36, 0.0  ;;  %v4494_v36 = vmax.f32 %v3229_v27, 0.0  ;;  %v4496_v5 = vmax.f32 %v3255_v24, 0.0 }
 0x693   :  { %v1181_v25 = vadd.f32 %v1180_v39, %v1179_v10  ;;  %v1193_v59 = vadd.f32 %v1192_v37, %v1191_v6  ;;  %v1194_v30 = vsel %vm579_vm5, %v1188_v12, 0.0  ;;  %v4495_v6 = vmax.f32 %v3233_v9, 0.0 }
 0x694   :  { %v1241_v10 = vrot.slane %v4496_v5, 4  ;;  %v4497_v39 = vmax.f32 %v3231_v2, 0.0 }
 0x695   :  { %1182 = vadd.xlane.f32.xlu0 %v1181_v25  ;;  %v1195_v26 = vadd.f32 %v1194_v30, %v1193_v59  ;;  %v1238_v12 = vrot.slane %v4495_v6, 4 }
 0x696   :  { %v1244_v0 = vrot.slane %v4497_v39, 4 }
 0x699   :  { %1196 = vadd.xlane.f32.xlu0 %v1195_v26 }
 0x6af   :  { %346 = vperm.xlu0 %2426, %v227_v42  }
 0x722   :  { %v1183_v57 = vpop.xlane.xlu0 %1182 }
 0x723   :  { %v1184_v33 = vmul.f32 0.001953125, %v1183_v57 }
 0x725   :  { %v1202_v23 = vsub.f32 %v3514_v56, %v1184_v33  ;;  %v1203_v58 = vsub.f32 %v3520_v16, %v1184_v33  ;;  %v1204_v63 = vsub.f32 %v1164_v1, %v1184_v33  ;;  %v1205_v35 = vsub.f32 %v1166_v50, %v1184_v33 }
 0x726   :  { %v1197_v40 = vpop.xlane.xlu0 %1196  ;;  %v1199_v45 = vmul.f32 %v1184_v33, %v1184_v33  ;;  %v1235_v50 = vrot.slane %v4494_v36, 4 }
 0x727   :  { %v1198_v14 = vmul.f32 0.001953125, %v1197_v40 }
 0x729   :  { %v1200_v55 = vsub.f32 %v1198_v14, %v1199_v45 }
 0x72b   :  { %v1201_v28 = vmax.f32 %v1200_v55, 0.0 }
 0x72d   :  { %v1206_v11 = vadd.f32 1e-05, %v1201_v28 }
 0x72e   :  { %v347_v13 = vpop.permute.xlu0 %346 }
 0x72f   :  { %2441 = vrsqrt.f32 %v1206_v11  ;;  %v3555_v56 = vadd.f32 %v347_v13, %v330_v20  ;;  %v3557_v61 = vadd.f32 %v347_v13, %v331_v43  ;;  %v3559_v15 = vadd.f32 %v347_v13, %v332_v19 }
 0x730   :  { %v3561_v7 = vadd.f32 %v347_v13, %v333_v41  ;;  %v2461_v41 = vld [vmem:[#allocation2 + $0x8] sm:$0xff] }
 0x731   :  { %v369_v46 = vmax.f32 %v3555_v56, 0.0  ;;  %v370_v8 = vmax.f32 %v3557_v61, 0.0  ;;  %v371_v3 = vmax.f32 %v3559_v15, 0.0  ;;  %v2429_v15 = vld [vmem:[%s4448_s8] sm:$0xff]  }
 0x732   :  { %v372_v44 = vmax.f32 %v3561_v7, 0.0 }
 0x733   :  { %v1236_v34 = vrot.slane %v369_v46, 4  ;;  %v1239_v47 = vrot.slane %v370_v8, 4  ;;  %v1242_v48 = vrot.slane %v371_v3, 4 }
 0x734   :  { %v1245_v38 = vrot.slane %v372_v44, 4 }
 0x735   :  { %v1237_v27 = vsel %vm584_vm3, %v1235_v50, %v1236_v34  ;;  %v1240_v26 = vsel %vm584_vm3, %v1238_v12, %v1239_v47  ;;  %v1243_v9 = vsel %vm584_vm3, %v1241_v10, %v1242_v48  ;;  %v2464_v50 = vld [vmem:[#allocation2] sm:$0xff] }
 0x736   :  { %v1246_v24 = vsel %vm584_vm3, %v1244_v0, %v1245_v38 }
 0x739   :  { %v2442_v17 = vpop.eup %2441 }
 0x73a   :  { %v1208_v60 = vmul.f32 %v2442_v17, %v2389_v21 }
 0x73c   :  { %1211 = vperm.xlu1 %2425, %v1208_v60  }
 0x740   :  { %1220 = vperm.xlu1 %2425, %v2390_v49  }
 0x7bb   :  { %v1212_v4 = vpop.permute.xlu1 %1211 }
 0x7bc   :  { %v1214_v16 = vmul.f32 %v1212_v4, %v1202_v23  ;;  %v1215_v62 = vmul.f32 %v1212_v4, %v1203_v58  ;;  %v1216_v22 = vmul.f32 %v1212_v4, %v1204_v63  ;;  %v1217_v52 = vmul.f32 %v1212_v4, %v1205_v35 }
 0x7bf   :  { %v1221_v31 = vpop.permute.xlu1 %1220 }
 0x7c0   :  { %v3575_v32 = vadd.f32 %v1221_v31, %v1214_v16  ;;  %v3577_v54 = vadd.f32 %v1221_v31, %v1215_v62  ;;  %v3579_v1 = vadd.f32 %v1221_v31, %v1216_v22  ;;  %v3581_v53 = vadd.f32 %v1221_v31, %v1217_v52  ;;  %v2462_v16 = vld [vmem:[#allocation2 + $0x28] sm:$0xff]  ;;  %v2463_v31 = vld [vmem:[#allocation2 + $0x20] sm:$0xff] }
 0x7c2   :  { %v1227_v37 = vmax.f32 %v3575_v32, 0.0  ;;  %v1228_v25 = vmax.f32 %v3577_v54, 0.0  ;;  %v1229_v59 = vmax.f32 %v3579_v1, 0.0  ;;  %v1230_v30 = vmax.f32 %v3581_v53, 0.0  ;;  %v4500_v54 = vld [vmem:[#allocation15_spill] sm:$0xff] }
 0x7c4   :  { %v3601_v2 = vadd.f32 %v1237_v27, %v1227_v37  ;;  %v3605_v42 = vadd.f32 %v1240_v26, %v1228_v25  ;;  %v3609_v57 = vadd.f32 %v1243_v9, %v1229_v59  ;;  %v3613_v33 = vadd.f32 %v1246_v24, %v1230_v30 }
 0x7c6   :  { %1269 = vrot.lane.b32.xlu1 %v3605_v42, %s2573_s29  ;;  %1267 = vrot.lane.b32.xlu0 %v3601_v2, %s2573_s29 }
 0x7ca   :  { %1281 = vrot.lane.b32.xlu1 %v3605_v42, %s2574_s30  ;;  %1279 = vrot.lane.b32.xlu0 %v3601_v2, %s2574_s30 }
 0x7ce   :  { %1285 = vrot.lane.b32.xlu1 %v3613_v33, %s2574_s30  ;;  %1273 = vrot.lane.b32.xlu0 %v3613_v33, %s2573_s29 }
 0x7d2   :  { %1257 = vrot.lane.b32.xlu1 %v3605_v42, %s2575_s12  ;;  %1255 = vrot.lane.b32.xlu0 %v3601_v2, %s2575_s12 }
 0x7d6   :  { %1271 = vrot.lane.b32.xlu1 %v3609_v57, %s2573_s29  ;;  %1261 = vrot.lane.b32.xlu0 %v3613_v33, %s2575_s12 }
 0x7da   :  { %1291 = vrot.lane.b32.xlu1 %v3601_v2, %s2576_s13  ;;  %1283 = vrot.lane.b32.xlu0 %v3609_v57, %s2574_s30 }
 0x7de   :  { %1305 = vrot.lane.b32.xlu1 %v3605_v42, %s2577_s14  ;;  %1293 = vrot.lane.b32.xlu0 %v3605_v42, %s2576_s13 }
 0x7e2   :  { %1259 = vrot.lane.b32.xlu1 %v3609_v57, %s2575_s12  ;;  %1307 = vrot.lane.b32.xlu0 %v3609_v57, %s2577_s14 }
 0x7e6   :  { %1303 = vrot.lane.b32.xlu1 %v3601_v2, %s2577_s14  ;;  %1297 = vrot.lane.b32.xlu0 %v3613_v33, %s2576_s13 }
 0x7ea   :  { %1309 = vrot.lane.b32.xlu1 %v3613_v33, %s2577_s14  ;;  %1295 = vrot.lane.b32.xlu0 %v3609_v57, %s2576_s13 }
 0x7ee   :  { %1319 = vrot.lane.b32.xlu1 %v3609_v57, %s2578_s15  ;;  %1317 = vrot.lane.b32.xlu0 %v3605_v42, %s2578_s15 }
 0x7f2   :  { %1331 = vrot.lane.b32.xlu1 %v3609_v57, %s2579_s1  ;;  %1329 = vrot.lane.b32.xlu0 %v3605_v42, %s2579_s1 }
 0x7f6   :  { %1327 = vrot.lane.b32.xlu1 %v3601_v2, %s2579_s1  ;;  %1315 = vrot.lane.b32.xlu0 %v3601_v2, %s2578_s15 }
 0x7fa   :  { %1333 = vrot.lane.b32.xlu1 %v3613_v33, %s2579_s1  ;;  %1321 = vrot.lane.b32.xlu0 %v3613_v33, %s2578_s15 }
 0x7fe   :  { %1341 = vrot.lane.b32.xlu1 %v3605_v42, %s2580_s16  ;;  %1339 = vrot.lane.b32.xlu0 %v3601_v2, %s2580_s16 }
 0x802   :  { %1345 = vrot.lane.b32.xlu1 %v3613_v33, %s2580_s16  ;;  %1343 = vrot.lane.b32.xlu0 %v3609_v57, %s2580_s16 }
 0x838   :  { %v1270_v23 = vpop.permute.xlu1 %1269  ;;  %v1268_v58 = vpop.permute.xlu0 %1267 }
 0x839   :  { %v1277_v45 = vsel %vm424_vm2, %v1268_v58, %v1270_v23 }
 0x83a   :  { %v1356_v17 = vrot.slane %v1277_v45, 2 }
 0x83c   :  { %v1282_v63 = vpop.permute.xlu1 %1281  ;;  %v1280_v40 = vpop.permute.xlu0 %1279 }
 0x83d   :  { %v1289_v35 = vsel %vm437_vm1, %v1280_v40, %v1282_v63 }
 0x83e   :  { %v1368_v14 = vrot.slane %v1289_v35, 4 }
 0x840   :  { %v1286_v55 = vpop.permute.xlu1 %1285  ;;  %v1274_v28 = vpop.permute.xlu0 %1273  ;;  %v1428_v60 = vsel %vm584_vm3, %v1356_v17, %v1368_v14 }
 0x841   :  { %v3685_v11 = vsel %vm437_vm1, %v1286_v55, %v1280_v40  ;;  %v1278_v21 = vsel %vm424_vm2, %v1274_v28, %v1268_v58  ;;  %v1452_v62 = vmul.f32 %v2462_v16, %v1428_v60 }
 0x842   :  { %v1367_v49 = vrot.slane %v3685_v11, 4  ;;  %v1355_v18 = vrot.slane %v1278_v21, 2 }
 0x844   :  { %v1258_v13 = vpop.permute.xlu1 %1257  ;;  %v1256_v20 = vpop.permute.xlu0 %1255  ;;  %v1427_v22 = vsel %vm584_vm3, %v1355_v18, %v1367_v49 }
 0x845   :  { %v1265_v43 = vsel %vm411_vm4, %v1256_v20, %v1258_v13  ;;  %v1451_v36 = vmul.f32 %v2463_v31, %v1427_v22  ;;  %v2466_v22 = vld [vmem:[#allocation2 + $0x10] sm:$0xff] }
 0x846   :  { %v1424_v19 = vsel %vm579_vm5, %v1265_v43, %v1356_v17  ;;  %v2465_v43 = vld [vmem:[#allocation2 + $0x30] sm:$0xff] }
 0x847   :  { %v1448_v4 = vmul.f32 %v2461_v41, %v1424_v19 }
 0x848   :  { %v1272_v52 = vpop.permute.xlu1 %1271  ;;  %v1262_v34 = vpop.permute.xlu0 %1261 }
 0x849   :  { %v1266_v47 = vsel %vm411_vm4, %v1262_v34, %v1256_v20  ;;  %v1478_v48 = vpack.c.bf16 %v1452_v62, %v1448_v4  ;;  %v1276_v27 = vsel %vm424_vm2, %v1270_v23, %v1272_v52  ;;  %v1275_v26 = vsel %vm424_vm2, %v1272_v52, %v1274_v28 }
 0x84a   :  { %v1423_v38 = vsel %vm579_vm5, %v1266_v47, %v1355_v18  ;;  %v1357_v35 = vrot.slane %v1276_v27, 2 }
 0x84b   :  { %v1447_v6 = vmul.f32 %v2464_v50, %v1423_v38  ;;  %1508 = vmatprep.subr.bf16.mxu0 %v1478_v48  ;;  %v2468_v48 = vld [vmem:[#allocation2 + $0x38] sm:$0xff] }
 0x84c   :  { %v1292_v12 = vpop.permute.xlu1 %1291  ;;  %v1284_v5 = vpop.permute.xlu0 %1283 }
 0x84d   :  { %v1477_v10 = vpack.c.bf16 %v1451_v36, %v1447_v6  ;;  %v3702_v39 = vsel %vm437_vm1, %v1284_v5, %v1286_v55  ;;  %v3706_v0 = vsel %vm437_vm1, %v1282_v63, %v1284_v5  ;;  %v1358_v55 = vrot.slane %v1275_v26, 2  ;;  %v2469_v26 = vld [vmem:[#allocation2 + $0x48] sm:$0xff] }
 0x84e   :  { %v1369_v9 = vrot.slane %v3706_v0, 4  ;;  %v1370_v24 = vrot.slane %v3702_v39, 4 }
 0x84f   :  { %1509 = vmatpush1.bf16.msra.mxu0 %v1477_v10 }
 0x850   :  { %v1306_v58 = vpop.permute.xlu1 %1305  ;;  %v1294_v40 = vpop.permute.xlu0 %1293  ;;  %v1429_v63 = vsel %vm584_vm3, %v1357_v35, %v1369_v9  ;;  %v1430_v28 = vsel %vm584_vm3, %v1358_v55, %v1370_v24 }
 0x851   :  { %v1301_v45 = vsel %vm450_vm7, %v1292_v12, %v1294_v40  ;;  %v1453_v19 = vmul.f32 %v2465_v43, %v1429_v63 }
 0x852   :  { %v1380_v23 = vrot.slane %v1301_v45, 6  ;;  %v2470_v45 = vld [vmem:[#allocation2 + $0x68] sm:$0xff] }
 0x854   :  { %v1260_v21 = vpop.permute.xlu1 %1259  ;;  %v1308_v17 = vpop.permute.xlu0 %1307  ;;  %v1432_v62 = vsel %vm589_vm8, %v1368_v14, %v1380_v23 }
 0x855   :  { %v1263_v60 = vsel %vm411_vm4, %v1260_v21, %v1262_v34  ;;  %v1264_v18 = vsel %vm411_vm4, %v1258_v13, %v1260_v21  ;;  %v3728_v20 = vsel %vm463_vm6, %v1306_v58, %v1308_v17  ;;  %v2467_v34 = vld [vmem:[#allocation2 + $0x18] sm:$0xff]  ;;  %v1454_v13 = vmul.f32 %v2468_v48, %v1430_v28  ;;  %v2471_v28 = vld [vmem:[#allocation2 + $0x60] sm:$0xff]  ;;  %v2473_v48 = vld [vmem:[#allocation2 + $0x70] sm:$0xff] }
 0x856   :  { %v1425_v41 = vsel %vm579_vm5, %v1264_v18, %v1357_v35  ;;  %v1426_v4 = vsel %vm579_vm5, %v1263_v60, %v1358_v55  ;;  %v1392_v16 = vrot.slane %v3728_v20, 2  ;;  %v1456_v35 = vmul.f32 %v2469_v26, %v1432_v62  ;;  %v2472_v60 = vld [vmem:[#allocation2 + $0x40] sm:$0xff] }
 0x857   :  { %v1449_v52 = vmul.f32 %v2466_v22, %v1425_v41  ;;  %v1450_v47 = vmul.f32 %v2467_v34, %v1426_v4 }
 0x858   :  { %v1436_v38 = vsel %vm579_vm5, %v3605_v42, %v1392_v16  ;;  %v1304_v31 = vpop.permute.xlu1 %1303  ;;  %v1298_v36 = vpop.permute.xlu0 %1297 }
 0x859   :  { %v1479_v50 = vpack.c.bf16 %v1453_v19, %v1449_v52  ;;  %v3740_v6 = vsel %vm463_vm6, %v1304_v31, %v1306_v58  ;;  %v1302_v14 = vsel %vm450_vm7, %v1298_v36, %v1292_v12  ;;  %v1480_v5 = vpack.c.bf16 %v1454_v13, %v1450_v47 }
 0x85a   :  { %v1391_v10 = vrot.slane %v3740_v6, 2  ;;  %v1379_v27 = vrot.slane %v1302_v14, 6  ;;  %v1460_v55 = vmul.f32 %v2470_v45, %v1436_v38 }
 0x85b   :  { %1549 = vmatprep.subr.bf16.mxu1 %v1480_v5  ;;  %v2476_v5 = vld [vmem:[#allocation2 + $0x78] sm:$0xff] }
 0x85c   :  { %v1435_v42 = vsel %vm579_vm5, %v3601_v2, %v1391_v10  ;;  %v1431_v58 = vsel %vm589_vm8, %v1367_v49, %v1379_v27  ;;  %v1310_v63 = vpop.permute.xlu1 %1309  ;;  %1550 = vmatpush1.bf16.msra.mxu1 %v1479_v50  ;;  %v1296_v12 = vpop.permute.xlu0 %1295  ;;  %v1482_v23 = vpack.c.bf16 %v1460_v55, %v1456_v35 }
 0x85d   :  { %v1459_v21 = vmul.f32 %v2471_v28, %v1435_v42  ;;  %v1455_v18 = vmul.f32 %v2472_v60, %v1431_v58  ;;  %v3754_v43 = vsel %vm463_vm6, %v1308_v17, %v1310_v63  ;;  %v3758_v19 = vsel %vm463_vm6, %v1310_v63, %v1304_v31  ;;  %v2474_v31 = vld [vmem:[#allocation2 + $0x50] sm:$0xff] }
 0x85e   :  { %v1393_v2 = vrot.slane %v3754_v43, 2  ;;  %v1394_v11 = vrot.slane %v3758_v19, 2  ;;  %v1299_v49 = vsel %vm450_vm7, %v1296_v12, %v1298_v36  ;;  %v1300_v41 = vsel %vm450_vm7, %v1294_v40, %v1296_v12  ;;  %1510 = vmatprep.subr.bf16.mxu0 %v1482_v23  ;;  %v2477_v23 = vld [vmem:[#allocation2 + $0x88] sm:$0xff] }
 0x85f   :  { %v1381_v4 = vrot.slane %v1300_v41, 6  ;;  %v1382_v62 = vrot.slane %v1299_v49, 6  ;;  %v1481_v22 = vpack.c.bf16 %v1459_v21, %v1455_v18  ;;  %v2478_v21 = vld [vmem:[#allocation2 + $0xa8] sm:$0xff] }
 0x860   :  { %v1437_v17 = vsel %vm579_vm5, %v3609_v57, %v1393_v2  ;;  %v1438_v52 = vsel %vm579_vm5, %v3613_v33, %v1394_v11  ;;  %v1320_v34 = vpop.permute.xlu1 %1319  ;;  %v1318_v47 = vpop.permute.xlu0 %1317  ;;  %v2475_v33 = vld [vmem:[#allocation2 + $0x58] sm:$0xff] }
 0x861   :  { %v1461_v13 = vmul.f32 %v2473_v48, %v1437_v17  ;;  %v1433_v40 = vsel %vm589_vm8, %v1369_v9, %v1381_v4  ;;  %v1434_v38 = vsel %vm589_vm8, %v1370_v24, %v1382_v62  ;;  %v1324_v57 = vsel %vm476_vm9, %v1318_v47, %v1320_v34  ;;  %1511 = vmatpush1.bf16.msra.mxu0 %v1481_v22  ;;  %v2479_v22 = vld [vmem:[#allocation2 + $0x80] sm:$0xff] }
 0x862   :  { %v1457_v36 = vmul.f32 %v2474_v31, %v1433_v40  ;;  %v1404_v50 = vrot.slane %v1324_v57, 4  ;;  %v1458_v14 = vmul.f32 %v2475_v33, %v1434_v38  ;;  %v1462_v27 = vmul.f32 %v2476_v5, %v1438_v52  ;;  %v2480_v52 = vld [vmem:[#allocation2 + $0xa0] sm:$0xff] }
 0x864   :  { %v1332_v26 = vpop.permute.xlu1 %1331  ;;  %v1330_v35 = vpop.permute.xlu0 %1329  ;;  %v1484_v0 = vpack.c.bf16 %v1462_v27, %v1458_v14  ;;  %v1483_v45 = vpack.c.bf16 %v1461_v13, %v1457_v36  ;;  %v1440_v9 = vsel %vm584_vm3, %v1392_v16, %v1404_v50 }
 0x865   :  { %v1336_v39 = vsel %vm489_vm10, %v1330_v35, %v1332_v26  ;;  %v1464_v28 = vmul.f32 %v2477_v23, %v1440_v9  ;;  %v2483_v9 = vld [vmem:[#allocation2 + $0x98] sm:$0xff] }
 0x866   :  { %v1416_v24 = vrot.slane %v1336_v39, 6  ;;  %1551 = vmatprep.subr.bf16.mxu1 %v1484_v0  ;;  %v2482_v0 = vld [vmem:[#allocation2 + $0xb0] sm:$0xff] }
 0x867   :  { %1552 = vmatpush1.bf16.msra.mxu1 %v1483_v45 }
 0x868   :  { %v1444_v55 = vsel %vm589_vm8, %v1404_v50, %v1416_v24  ;;  %v1328_v42 = vpop.permute.xlu1 %1327  ;;  %v1316_v58 = vpop.permute.xlu0 %1315  ;;  %v2484_v24 = vld [vmem:[#allocation2 + $0xc0] sm:$0x3f] }
 0x869   :  { %v1337_v63 = vsel %vm489_vm10, %v1328_v42, %v1330_v35  ;;  %v1325_v12 = vsel %vm476_vm9, %v1316_v58, %v1318_v47  ;;  %v1468_v60 = vmul.f32 %v2478_v21, %v1444_v55  ;;  %v2485_v55 = vld [vmem:[#allocation2 + $0xb8] sm:$0xff] }
 0x86a   :  { %v1415_v20 = vrot.slane %v1337_v63, 6  ;;  %v1403_v18 = vrot.slane %v1325_v12, 4  ;;  %v2486_v21 = vld [vmem:[#allocation2 + $0xd8] sm:$0x3f] }
 0x86b   :  { %v1486_v16 = vpack.c.bf16 %v1468_v60, %v1464_v28 }
 0x86c   :  { %v1439_v49 = vsel %vm584_vm3, %v1391_v10, %v1403_v18  ;;  %v1443_v41 = vsel %vm589_vm8, %v1403_v18, %v1415_v20  ;;  %v1334_v4 = vpop.permute.xlu1 %1333  ;;  %v1322_v62 = vpop.permute.xlu0 %1321  ;;  %v2487_v20 = vld [vmem:[#allocation2 + $0xc8] sm:$0x3f] }
 0x86d   :  { %v1463_v17 = vmul.f32 %v2479_v22, %v1439_v49  ;;  %v1467_v48 = vmul.f32 %v2480_v52, %v1443_v41  ;;  %v1335_v47 = vsel %vm489_vm10, %v1332_v26, %v1334_v4  ;;  %v1338_v13 = vsel %vm489_vm10, %v1334_v4, %v1328_v42  ;;  %1512 = vmatprep.subr.bf16.mxu0 %v1486_v16  ;;  %v2481_v26 = vld [vmem:[#allocation2 + $0x90] sm:$0xff]  ;;  %v2391_v52 = vld [vmem:[%s4445_s5 + $0x8] sm:$0x7] }
 0x86e   :  { %v1417_v40 = vrot.slane %v1335_v47, 6  ;;  %v1418_v38 = vrot.slane %v1338_v13, 6  ;;  %v1323_v6 = vsel %vm476_vm9, %v1320_v34, %v1322_v62  ;;  %v1326_v10 = vsel %vm476_vm9, %v1322_v62, %v1316_v58  ;;  %v2488_v16 = vld [vmem:[#allocation2 + $0xd0] sm:$0x3f] }
 0x86f   :  { %v1405_v57 = vrot.slane %v1323_v6, 4  ;;  %v1406_v31 = vrot.slane %v1326_v10, 4  ;;  %v1485_v36 = vpack.c.bf16 %v1467_v48, %v1463_v17 }
 0x870   :  { %v1342_v50 = vpop.permute.xlu1 %1341  ;;  %v1340_v33 = vpop.permute.xlu0 %1339 }
 0x871   :  { %v1441_v14 = vsel %vm584_vm3, %v1393_v2, %v1405_v57  ;;  %v1442_v5 = vsel %vm584_vm3, %v1394_v11, %v1406_v31  ;;  %v1445_v27 = vsel %vm589_vm8, %v1405_v57, %v1417_v40  ;;  %v1446_v34 = vsel %vm589_vm8, %v1406_v31, %v1418_v38  ;;  %1513 = vmatpush1.bf16.msra.mxu0 %v1485_v36 }
 0x872   :  { %v1465_v35 = vmul.f32 %v2481_v26, %v1441_v14  ;;  %v1469_v45 = vmul.f32 %v2482_v0, %v1445_v27  ;;  %v1349_v39 = vsel %vm502_vm11, %v1340_v33, %v1342_v50  ;;  %v1466_v43 = vmul.f32 %v2483_v9, %v1442_v5 }
 0x873   :  { %v1471_v2 = vmul.f32 %v2484_v24, %v1349_v39  ;;  %v1470_v19 = vmul.f32 %v2485_v55, %v1446_v34 }
 0x874   :  { %v1346_v42 = vpop.permute.xlu1 %1345  ;;  %v1344_v11 = vpop.permute.xlu0 %1343  ;;  %v1487_v58 = vpack.c.bf16 %v1469_v45, %v1465_v35 }
 0x875   :  { %v1489_v63 = vpack.c.bf16 %v1471_v2, %v1471_v2  ;;  %v1350_v12 = vsel %vm502_vm11, %v1346_v42, %v1340_v33  ;;  %v1347_v23 = vsel %vm502_vm11, %v1344_v11, %v1346_v42  ;;  %v1348_v28 = vsel %vm502_vm11, %v1342_v50, %v1344_v11 }
 0x876   :  { %v1474_v60 = vmul.f32 %v2486_v21, %v1350_v12  ;;  %v1472_v18 = vmul.f32 %v2487_v20, %v1348_v28  ;;  %v1473_v49 = vmul.f32 %v2488_v16, %v1347_v23  ;;  %v1488_v41 = vpack.c.bf16 %v1470_v19, %v1466_v43  ;;  %v2397_v19 = vld [vmem:[%s4447_s7 + $0x10] sm:$0x3f] }
 0x877   :  { %v1497_v17 = vsel %vm655_vm12, %v1489_v63, 0 }
 0x878   :  { %v1492_v4 = vpack.c.bf16 %v1474_v60, %v1474_v60  ;;  %v1490_v62 = vpack.c.bf16 %v1472_v18, %v1472_v18  ;;  %v1491_v22 = vpack.c.bf16 %v1473_v49, %v1473_v49  ;;  %1553 = vmatprep.subr.bf16.mxu1 %v1488_v41  ;;  %v2396_v49 = vld [vmem:[%s4446_s6 + $0x10] sm:$0x3f]  ;;  %s2543_s6 = scalar_lea.vmem %s2363_s23, 4096 }
 0x879   :  { %1554 = vmatpush1.bf16.msra.mxu1 %v1487_v58  ;;  %p2544_p8 = scmp.ne.s32.totalorder %s2363_s23, %s2543_s6  ;;  %p2549_p10 = scmp.lt.s32.totalorder %s2543_s6, %s2543_s6 }
 0x87a   :  { %2392 = vmatprep.subr.msk.bf16.mxu0 %vm655_vm12, %v1490_v62  ;;  %2394 = vmatprep.subr.msk.bf16.mxu1 %vm655_vm12, %v1492_v4  ;;  %v1503_v51 = vsel %vm655_vm12, %v1491_v22, 0 }
 0x87b   :  { %1515 = vmatpush1.bf16.msra.mxu0 %v1497_v17  ;;  %p2550_p11 = por %p2549_p10, %p2548_p9 }
 0x87d   :  { %1556 = vmatpush1.bf16.msra.mxu1 %v1503_v51  ;;  %p2551_p12 = pnand %p2550_p11, %p2544_p8 }
 0x87e   :  { %2393 = vmatmul.mubr.msk.bf16.vlgmr.msra.gmra.mrb[16].mxu0 %vm651_vm13, %v2391_v52 }
 0x87f   :  { %1779 = vmatprep.mubr.bf16.mxu0 %v4489_v29 }
 0x880   :  { %2395 = vmatmul.mubr.msk.bf16.vlgmr.msra.gmra.mrb[16].mxu1 %vm651_vm13, %v2391_v52 }
 0x881   :  { %1852 = vmatprep.mubr.bf16.mxu1 %v4489_v29 }
 0x951   :  { %v1542_v48 = vpop.f32.mrb[16].mxu0 }
 0x952   :  { %v1594_v47 = vsel %vm579_vm5, %v1542_v48, 0.0  ;;  %v1604_v13 = vmul.f32 %v1542_v48, %v1542_v48  ;;  %v1544_v40 = vpop.f32.mrb[17].mxu0 }
 0x953   :  { %v1583_v38 = vpop.f32.mrb[16].mxu1  ;;  %v1595_v6 = vsel %vm579_vm5, %v1544_v40, 0.0  ;;  %v1605_v10 = vmul.f32 %v1544_v40, %v1544_v40  ;;  %v1546_v57 = vpop.f32.mrb[18].mxu0 }
 0x954   :  { %v1608_v31 = vsel %vm579_vm5, %v1604_v13, 0.0  ;;  %v1597_v36 = vsel %vm579_vm5, %v1583_v38, 0.0  ;;  %v1606_v50 = vmul.f32 %v1583_v38, %v1583_v38  ;;  %v1596_v33 = vadd.f32 %v1595_v6, %v1594_v47  ;;  %v1585_v14 = vpop.f32.mrb[17].mxu1  ;;  %v1547_v5 = vpop.f32.mrb[19].mxu0 }
 0x955   :  { %v1609_v27 = vsel %vm579_vm5, %v1605_v10, 0.0  ;;  %v1607_v34 = vmul.f32 %v1585_v14, %v1585_v14  ;;  %v1587_v26 = vpop.f32.mrb[18].mxu1  ;;  %v1599_v9 = vsel %vm579_vm5, %v1585_v14, 0.0  ;;  %v1654_v6 = vrot.slane %v1227_v37, 2 }
 0x956   :  { %v1611_v35 = vsel %vm579_vm5, %v1606_v50, 0.0  ;;  %v1610_v0 = vadd.f32 %v1609_v27, %v1608_v31  ;;  %v1588_v45 = vpop.f32.mrb[19].mxu1  ;;  %v1598_v39 = vadd.f32 %v1597_v36, %v1596_v33  ;;  %v1655_v10 = vrot.slane %v1228_v25, 2 }
 0x957   :  { %v1613_v2 = vsel %vm579_vm5, %v1607_v34, 0.0  ;;  %v1656_v57 = vrot.slane %v1229_v59, 2  ;;  %v1657_v31 = vrot.slane %v1230_v30, 2  ;;  %v4501_v25 = vmax.f32 %v4500_v54, 0.0  ;;  %v4502_v59 = vld [vmem:[#allocation13_spill] sm:$0xff]  ;;  %v4504_v30 = vld [vmem:[#allocation16_spill] sm:$0xff] }
 0x958   :  { %v1600_v43 = vadd.f32 %v1599_v9, %v1598_v39  ;;  %v1612_v24 = vadd.f32 %v1611_v35, %v1610_v0  ;;  %v4498_v35 = vld [vmem:[#allocation14_spill] sm:$0xff]  ;;  %v4503_v0 = vmax.f32 %v4502_v59, 0.0  ;;  %v4505_v45 = vmax.f32 %v4504_v30, 0.0 }
 0x959   :  { %v4499_v32 = vmax.f32 %v4498_v35, 0.0  ;;  %v1677_v1 = vsel %vm579_vm5, %v4501_v25, %v1657_v31 }
 0x95a   :  { %1601 = vadd.xlane.f32.xlu0 %v1600_v43  ;;  %v1614_v55 = vadd.f32 %v1613_v2, %v1612_v24  ;;  %v1674_v53 = vsel %vm579_vm5, %v4503_v0, %v1654_v6  ;;  %v1676_v39 = vsel %vm579_vm5, %v4505_v45, %v1656_v57 }
 0x95b   :  { %v1675_v37 = vsel %vm579_vm5, %v4499_v32, %v1655_v10 }
 0x95c   :  { %1615 = vadd.xlane.f32.xlu1 %v1614_v55 }
 0x96d   :  { %1639 = vperm.xlu1 %2425, %v2397_v19  }
 0x9e7   :  { %v1602_v42 = vpop.xlane.xlu0 %1601 }
 0x9e8   :  { %v1603_v11 = vmul.f32 0.001953125, %v1602_v42 }
 0x9e9   :  { %v1616_v58 = vpop.xlane.xlu1 %1615 }
 0x9ea   :  { %v1617_v63 = vmul.f32 0.001953125, %v1616_v58  ;;  %v1618_v12 = vmul.f32 %v1603_v11, %v1603_v11  ;;  %v1621_v23 = vsub.f32 %v1542_v48, %v1603_v11  ;;  %v1622_v28 = vsub.f32 %v1544_v40, %v1603_v11 }
 0x9eb   :  { %v1623_v21 = vsub.f32 %v1583_v38, %v1603_v11  ;;  %v1624_v60 = vsub.f32 %v1585_v14, %v1603_v11 }
 0x9ec   :  { %v1619_v20 = vsub.f32 %v1617_v63, %v1618_v12 }
 0x9ed   :  { %v1640_v48 = vpop.permute.xlu1 %1639 }
 0x9ee   :  { %v1620_v18 = vmax.f32 %v1619_v20, 0.0 }
 0x9f0   :  { %v1625_v16 = vadd.f32 1e-05, %v1620_v18 }
 0x9f2   :  { %2443 = vrsqrt.f32 %v1625_v16 }
 0x9fc   :  { %v2444_v41 = vpop.eup %2443 }
 0x9fd   :  { %v1627_v4 = vmul.f32 %v2444_v41, %v2396_v49 }
 0x9ff   :  { %1630 = vperm.xlu0 %2426, %v1627_v4  }
 0xa7e   :  { %v1631_v62 = vpop.permute.xlu0 %1630 }
 0xa7f   :  { %v1633_v22 = vmul.f32 %v1631_v62, %v1621_v23  ;;  %v1634_v17 = vmul.f32 %v1631_v62, %v1622_v28  ;;  %v1635_v51 = vmul.f32 %v1631_v62, %v1623_v21  ;;  %v1636_v52 = vmul.f32 %v1631_v62, %v1624_v60 }
 0xa81   :  { %v1642_v47 = vadd.f32 %v1640_v48, %v1633_v22  ;;  %v1643_v13 = vadd.f32 %v1640_v48, %v1634_v17  ;;  %v1644_v40 = vadd.f32 %v1640_v48, %v1635_v51  ;;  %v1645_v38 = vadd.f32 %v1640_v48, %v1636_v52 }
 0xa83   :  { %v1646_v36 = vmax.f32 %v1642_v47, 0.0  ;;  %v1647_v50 = vmax.f32 %v1643_v13, 0.0  ;;  %v1648_v33 = vmax.f32 %v1644_v40, 0.0  ;;  %v1649_v14 = vmax.f32 %v1645_v38, 0.0 }
 0xa85   :  { %v1666_v5 = vrot.slane %v1646_v36, 4  ;;  %v1667_v27 = vrot.slane %v1647_v50, 4  ;;  %v1668_v34 = vrot.slane %v1648_v33, 4  ;;  %v1669_v26 = vrot.slane %v1649_v14, 4 }
 0xa87   :  { %v1679_v9 = vsel %vm584_vm3, %v1655_v10, %v1667_v27  ;;  %v1681_v43 = vsel %vm584_vm3, %v1657_v31, %v1669_v26  ;;  %v1678_v24 = vsel %vm584_vm3, %v1654_v6, %v1666_v5  ;;  %v1680_v2 = vsel %vm584_vm3, %v1656_v57, %v1668_v34 }
 0xa88   :  { %v1695_v55 = vpack.c.bf16 %v1679_v9, %v1675_v37  ;;  %v1697_v19 = vpack.c.bf16 %v1681_v43, %v1677_v1  ;;  %v1694_v42 = vpack.c.bf16 %v1678_v24, %v1674_v53  ;;  %v1696_v11 = vpack.c.bf16 %v1680_v2, %v1676_v39 }
 0xa89   :  { %v1683_v58 = vsel %vm589_vm8, %v1667_v27, %v370_v8  ;;  %v1685_v63 = vsel %vm589_vm8, %v1669_v26, %v372_v44  ;;  %v1682_v12 = vsel %vm589_vm8, %v1666_v5, %v369_v46  ;;  %v1684_v23 = vsel %vm589_vm8, %v1668_v34, %v371_v3  ;;  %v2430_v46 = vld [vmem:[%s4448_s8 + $0x8] sm:$0xff]   ;;  %v2431_v8 = vld [vmem:[%s4448_s8 + $0x10] sm:$0xff]   ;;  %v2432_v3 = vld [vmem:[%s4448_s8 + $0x18] sm:$0xff]  }
 0xa8a   :  { %1747 = vmatprep.subr.bf16.mxu0 %v1695_v55  ;;  %1820 = vmatprep.subr.bf16.mxu1 %v1697_v19  ;;  %v1699_v28 = vpack.c.bf16 %v1683_v58, %v1683_v58  ;;  %v1701_v21 = vpack.c.bf16 %v1685_v63, %v1685_v63  ;;  %v1698_v60 = vpack.c.bf16 %v1682_v12, %v1682_v12 }
 0xa8b   :  { %1748 = vmatpush1.bf16.msra.mxu0 %v1694_v42  ;;  %1821 = vmatpush1.bf16.msra.mxu1 %v1696_v11  ;;  %v1700_v61 = vpack.c.bf16 %v1684_v23, %v1684_v23 }
 0xa8c   :  { %2402 = vmatprep.subr.msk.bf16.mxu0 %vm584_vm3, %v1699_v28  ;;  %2407 = vmatprep.subr.msk.bf16.mxu1 %vm584_vm3, %v1701_v21  ;;  %v1736_v56 = vsel %vm584_vm3, %v1698_v60, 0 }
 0xa8d   :  { %v1742_v7 = vsel %vm584_vm3, %v1700_v61, 0 }
 0xa8f   :  { %1750 = vmatpush1.bf16.msra.mxu0 %v1736_v56  ;;  %1823 = vmatpush1.bf16.msra.mxu1 %v1742_v7 }
 0xa92   :  { %2403 = vmatmul.mubr.msk.bf16.vlgmr.msra.gmra.mrb[20].mxu0 %vm1722_vm14, %v2429_v15  ;;  %2408 = vmatmul.mubr.msk.bf16.vlgmr.msra.gmra.mrb[20].mxu1 %vm1722_vm14, %v2429_v15 }
 0xa93   :  { %1789 = vmatprep.mubr.bf16.mxu0 %v4489_v29  ;;  %1862 = vmatprep.mubr.bf16.mxu1 %v4489_v29 }
 0xa9a   :  { %2404 = vmatmul.mubr.msk.bf16.gmra.mrb[24].mxu0 %vm1722_vm14, %v2430_v46  ;;  %2409 = vmatmul.mubr.msk.bf16.gmra.mrb[24].mxu1 %vm1722_vm14, %v2430_v46 }
 0xa9b   :  { %1799 = vmatprep.mubr.bf16.mxu0 %v4489_v29  ;;  %1872 = vmatprep.mubr.bf16.mxu1 %v4489_v29 }
 0xaa2   :  { %2405 = vmatmul.mubr.msk.bf16.gmra.mrb[28].mxu0 %vm1722_vm14, %v2431_v8  ;;  %2410 = vmatmul.mubr.msk.bf16.gmra.mrb[28].mxu1 %vm1722_vm14, %v2431_v8 }
 0xaa3   :  { %1809 = vmatprep.mubr.bf16.mxu0 %v4489_v29  ;;  %1882 = vmatprep.mubr.bf16.mxu1 %v4489_v29 }
 0xaaa   :  { %2406 = vmatmul.mubr.msk.bf16.gmra.mrb[32].mxu0 %vm1722_vm14, %v2432_v3  ;;  %2411 = vmatmul.mubr.msk.bf16.gmra.mrb[32].mxu1 %vm1722_vm14, %v2432_v3 }
 0xb65   :  { %v3911_v44 = vpop.f32.mrb[20].mxu0  ;;  %v3913_v20 = vpop.f32.mrb[20].mxu1 }
 0xb66   :  { %v1957_v18 = vmul.f32 %v3911_v44, %v3911_v44  ;;  %v3917_v16 = vpop.f32.mrb[21].mxu0  ;;  %v3919_v49 = vpop.f32.mrb[21].mxu1  ;;  %v1959_v4 = vmul.f32 %v3913_v20, %v3913_v20 }
 0xb67   :  { %v1909_v29 = vadd.f32 %v3917_v16, %v3911_v44  ;;  %v1958_v41 = vmul.f32 %v3917_v16, %v3917_v16  ;;  %v3927_v62 = vpop.f32.mrb[22].mxu0  ;;  %v3929_v22 = vpop.f32.mrb[22].mxu1  ;;  %v1960_v38 = vmul.f32 %v3919_v49, %v3919_v49 }
 0xb68   :  { %v1961_v17 = vmul.f32 %v3927_v62, %v3927_v62  ;;  %v3933_v51 = vpop.f32.mrb[23].mxu0  ;;  %v3935_v52 = vpop.f32.mrb[23].mxu1  ;;  %v1963_v6 = vmul.f32 %v3929_v22, %v3929_v22 }
 0xb69   :  { %v1989_v48 = vadd.f32 %v1958_v41, %v1957_v18  ;;  %v1910_v47 = vadd.f32 %v1909_v29, %v3913_v20  ;;  %v1914_v13 = vadd.f32 %v3933_v51, %v3927_v62  ;;  %v1962_v40 = vmul.f32 %v3933_v51, %v3933_v51 }
 0xb6a   :  { %v1964_v14 = vmul.f32 %v3935_v52, %v3935_v52 }
 0xb6b   :  { %v1990_v10 = vadd.f32 %v1989_v48, %v1959_v4  ;;  %v1911_v57 = vadd.f32 %v1910_v47, %v3919_v49  ;;  %v1994_v31 = vadd.f32 %v1962_v40, %v1961_v17  ;;  %v1915_v36 = vadd.f32 %v1914_v13, %v3929_v22 }
 0xb6d   :  { %v1995_v50 = vadd.f32 %v1994_v31, %v1963_v6  ;;  %v1916_v33 = vadd.f32 %v1915_v36, %v3935_v52  ;;  %1912 = vadd.xlane.f32.xlu0 %v1911_v57  ;;  %v3951_v5 = vpop.f32.mrb[24].mxu0  ;;  %v3953_v27 = vpop.f32.mrb[24].mxu1  ;;  %v1991_v34 = vadd.f32 %v1990_v10, %v1960_v38 }
 0xb6e   :  { %v1965_v26 = vmul.f32 %v3951_v5, %v3951_v5  ;;  %v3957_v35 = vpop.f32.mrb[25].mxu0  ;;  %v3959_v32 = vpop.f32.mrb[25].mxu1  ;;  %v1967_v25 = vmul.f32 %v3953_v27, %v3953_v27 }
 0xb6f   :  { %v1919_v37 = vadd.f32 %v3957_v35, %v3951_v5  ;;  %v1966_v54 = vmul.f32 %v3957_v35, %v3957_v35  ;;  %1917 = vadd.xlane.f32.xlu1 %v1916_v33  ;;  %v3967_v1 = vpop.f32.mrb[26].mxu0  ;;  %v3969_v59 = vpop.f32.mrb[26].mxu1  ;;  %v1996_v0 = vadd.f32 %v1995_v50, %v1964_v14  ;;  %v1968_v2 = vmul.f32 %v3959_v32, %v3959_v32 }
 0xb70   :  { %v1969_v53 = vmul.f32 %v3967_v1, %v3967_v1  ;;  %v3973_v30 = vpop.f32.mrb[27].mxu0  ;;  %v3975_v45 = vpop.f32.mrb[27].mxu1  ;;  %v1971_v55 = vmul.f32 %v3969_v59, %v3969_v59 }
 0xb71   :  { %v1999_v39 = vadd.f32 %v1966_v54, %v1965_v26  ;;  %v1920_v9 = vadd.f32 %v1919_v37, %v3953_v27  ;;  %v1924_v43 = vadd.f32 %v3973_v30, %v3967_v1  ;;  %v1970_v24 = vmul.f32 %v3973_v30, %v3973_v30  ;;  %1997 = vadd.xlane.f32.xlu0 %v1996_v0 }
 0xb72   :  { %v1972_v23 = vmul.f32 %v3975_v45, %v3975_v45 }
 0xb73   :  { %v2000_v19 = vadd.f32 %v1999_v39, %v1967_v25  ;;  %v1921_v42 = vadd.f32 %v1920_v9, %v3959_v32  ;;  %v2004_v11 = vadd.f32 %v1970_v24, %v1969_v53  ;;  %v1925_v58 = vadd.f32 %v1924_v43, %v3969_v59  ;;  %1992 = vadd.xlane.f32.xlu1 %v1991_v34 }
 0xb75   :  { %v2005_v63 = vadd.f32 %v2004_v11, %v1971_v55  ;;  %v1926_v12 = vadd.f32 %v1925_v58, %v3975_v45  ;;  %1922 = vadd.xlane.f32.xlu0 %v1921_v42  ;;  %v3991_v28 = vpop.f32.mrb[28].mxu0  ;;  %v2001_v21 = vadd.f32 %v2000_v19, %v1968_v2  ;;  %v3993_v60 = vpop.f32.mrb[28].mxu1 }
 0xb76   :  { %v1973_v61 = vmul.f32 %v3991_v28, %v3991_v28  ;;  %v3997_v56 = vpop.f32.mrb[29].mxu0  ;;  %v3999_v7 = vpop.f32.mrb[29].mxu1  ;;  %v1975_v3 = vmul.f32 %v3993_v60, %v3993_v60 }
 0xb77   :  { %v1929_v15 = vadd.f32 %v3997_v56, %v3991_v28  ;;  %v1974_v46 = vmul.f32 %v3997_v56, %v3997_v56  ;;  %2002 = vadd.xlane.f32.xlu1 %v2001_v21  ;;  %v4005_v8 = vpop.f32.mrb[30].mxu0  ;;  %v4009_v18 = vpop.f32.mrb[30].mxu1  ;;  %v2006_v29 = vadd.f32 %v2005_v63, %v1972_v23  ;;  %v1976_v17 = vmul.f32 %v3999_v7, %v3999_v7 }
 0xb78   :  { %v1977_v41 = vmul.f32 %v4005_v8, %v4005_v8  ;;  %v4013_v4 = vpop.f32.mrb[31].mxu0  ;;  %v1979_v48 = vmul.f32 %v4009_v18, %v4009_v18  ;;  %v4019_v47 = vpop.f32.mrb[31].mxu1 }
 0xb79   :  { %v2009_v13 = vadd.f32 %v1974_v46, %v1973_v61  ;;  %v1934_v40 = vadd.f32 %v4013_v4, %v4005_v8  ;;  %v1978_v38 = vmul.f32 %v4013_v4, %v4013_v4  ;;  %v1930_v6 = vadd.f32 %v1929_v15, %v3993_v60  ;;  %1927 = vadd.xlane.f32.xlu0 %v1926_v12 }
 0xb7a   :  { %v1980_v50 = vmul.f32 %v4019_v47, %v4019_v47 }
 0xb7b   :  { %v2014_v10 = vadd.f32 %v1978_v38, %v1977_v41  ;;  %v2010_v57 = vadd.f32 %v2009_v13, %v1975_v3  ;;  %v1931_v31 = vadd.f32 %v1930_v6, %v3999_v7  ;;  %v1935_v36 = vadd.f32 %v1934_v40, %v4009_v18  ;;  %v1902_v40 = vld [vmem:[%s4450_s10 + $0x8] sm:$0xff]  ;;  %v1904_v38 = vld [vmem:[%s4450_s10 + $0x18] sm:$0xff] }
 0xb7c   :  { %v1906_v6 = vld [vmem:[%s4450_s10 + $0x28] sm:$0xff] }
 0xb7d   :  { %v2015_v33 = vadd.f32 %v2014_v10, %v1979_v48  ;;  %v1936_v14 = vadd.f32 %v1935_v36, %v4019_v47  ;;  %2007 = vadd.xlane.f32.xlu0 %v2006_v29  ;;  %1932 = vadd.xlane.f32.xlu1 %v1931_v31  ;;  %v4031_v34 = vpop.f32.mrb[32].mxu0  ;;  %v4033_v26 = vpop.f32.mrb[32].mxu1  ;;  %v2011_v37 = vadd.f32 %v2010_v57, %v1976_v17  ;;  %v1901_v10 = vld [vmem:[%s4450_s10] sm:$0xff]  ;;  %v1903_v57 = vld [vmem:[%s4450_s10 + $0x10] sm:$0xff] }
 0xb7e   :  { %v1981_v54 = vmul.f32 %v4031_v34, %v4031_v34  ;;  %v4037_v25 = vpop.f32.mrb[33].mxu0  ;;  %v4039_v0 = vpop.f32.mrb[33].mxu1  ;;  %v1983_v43 = vmul.f32 %v4033_v26, %v4033_v26  ;;  %v1905_v31 = vld [vmem:[%s4450_s10 + $0x20] sm:$0xff] }
 0xb7f   :  { %v1939_v53 = vadd.f32 %v4037_v25, %v4031_v34  ;;  %v1982_v39 = vmul.f32 %v4037_v25, %v4037_v25  ;;  %v4045_v9 = vpop.f32.mrb[34].mxu0  ;;  %v4049_v24 = vpop.f32.mrb[34].mxu1  ;;  %v2016_v2 = vadd.f32 %v2015_v33, %v1980_v50  ;;  %v1984_v42 = vmul.f32 %v4039_v0, %v4039_v0 }
 0xb80   :  { %v1985_v55 = vmul.f32 %v4045_v9, %v4045_v9  ;;  %v4053_v19 = vpop.f32.mrb[35].mxu0  ;;  %v1987_v11 = vmul.f32 %v4049_v24, %v4049_v24  ;;  %v4059_v58 = vpop.f32.mrb[35].mxu1 }
 0xb81   :  { %v2019_v63 = vadd.f32 %v1982_v39, %v1981_v54  ;;  %v1944_v12 = vadd.f32 %v4053_v19, %v4045_v9  ;;  %v1986_v23 = vmul.f32 %v4053_v19, %v4053_v19  ;;  %v1940_v21 = vadd.f32 %v1939_v53, %v4033_v26  ;;  %2012 = vadd.xlane.f32.xlu1 %v2011_v37 }
 0xb82   :  { %1937 = vadd.xlane.f32.xlu0 %v1936_v14  ;;  %v1988_v17 = vmul.f32 %v4059_v58, %v4059_v58 }
 0xb83   :  { %v2024_v61 = vadd.f32 %v1986_v23, %v1985_v55  ;;  %v2020_v15 = vadd.f32 %v2019_v63, %v1983_v43  ;;  %v1941_v46 = vadd.f32 %v1940_v21, %v4039_v0  ;;  %v1945_v3 = vadd.f32 %v1944_v12, %v4049_v24 }
 0xb85   :  { %v2025_v29 = vadd.f32 %v2024_v61, %v1987_v11  ;;  %v1946_v41 = vadd.f32 %v1945_v3, %v4059_v58  ;;  %1942 = vadd.xlane.f32.xlu1 %v1941_v46  ;;  %v2021_v48 = vadd.f32 %v2020_v15, %v1984_v42 }
 0xb86   :  { %2017 = vadd.xlane.f32.xlu0 %v2016_v2 }
 0xb87   :  { %v2026_v13 = vadd.f32 %v2025_v29, %v1988_v17 }
 0xb89   :  { %2022 = vadd.xlane.f32.xlu1 %v2021_v48 }
 0xb8a   :  { %1947 = vadd.xlane.f32.xlu0 %v1946_v41 }
 0xb8e   :  { %2027 = vadd.xlane.f32.xlu0 %v2026_v13 }
 0xb9a   :  { %2196 = vperm.xlu1 %2425, %v1902_v40  }
 0xb9e   :  { %2206 = vperm.xlu1 %2425, %v1904_v38  }
 0xba2   :  { %2216 = vperm.xlu1 %2425, %v1906_v6  }
 0xba4   :  { %2191 = vperm.xlu0 %2426, %v1901_v10  }
 0xba8   :  { %2201 = vperm.xlu0 %2426, %v1903_v57  }
 0xbac   :  { %2211 = vperm.xlu0 %2426, %v1905_v31  }
 0xbfa   :  { %v1913_v36 = vpop.xlane.xlu0 %1912 }
 0xbfb   :  { %v4089_v50 = vmul.f32 0.001953125, %v1913_v36 }
 0xbfc   :  { %v1918_v33 = vpop.xlane.xlu1 %1917 }
 0xbfd   :  { %v4091_v14 = vmul.f32 0.001953125, %v1918_v33  ;;  %v2061_v37 = vsub.f32 %v3911_v44, %v4089_v50  ;;  %v2062_v54 = vsub.f32 %v3917_v16, %v4089_v50  ;;  %v2063_v39 = vsub.f32 %v3913_v20, %v4089_v50  ;;  %v2490_v44 = vld [vmem:[%s4440_s0 + $0x28] sm:$0xff]  ;;  %v2491_v16 = vld [vmem:[%s4440_s0 + $0x30] sm:$0xff] }
 0xbfe   :  { %v1998_v53 = vpop.xlane.xlu0 %1997  ;;  %v2064_v43 = vsub.f32 %v3919_v49, %v4089_v50  ;;  %v2037_v61 = vmul.f32 %v4089_v50, %v4089_v50  ;;  %v2492_v49 = vld [vmem:[%s4440_s0 + $0x38] sm:$0xff] }
 0xbff   :  { %v2030_v2 = vmul.f32 0.001953125, %v1998_v53  ;;  %v2038_v55 = vmul.f32 %v4091_v14, %v4091_v14  ;;  %v2065_v42 = vsub.f32 %v3927_v62, %v4091_v14  ;;  %v2066_v11 = vsub.f32 %v3933_v51, %v4091_v14 }
 0xc00   :  { %v1993_v63 = vpop.xlane.xlu1 %1992  ;;  %v2067_v12 = vsub.f32 %v3929_v22, %v4091_v14  ;;  %v2068_v23 = vsub.f32 %v3935_v52, %v4091_v14  ;;  %v2489_v14 = vld [vmem:[%s4440_s0 + $0x20] sm:$0xff] }
 0xc01   :  { %v2046_v21 = vsub.f32 %v2030_v2, %v2038_v55  ;;  %v2029_v15 = vmul.f32 0.001953125, %v1993_v63 }
 0xc02   :  { %v1923_v46 = vpop.xlane.xlu0 %1922 }
 0xc03   :  { %v2054_v3 = vmax.f32 %v2046_v21, 0.0  ;;  %v2045_v29 = vsub.f32 %v2029_v15, %v2037_v61  ;;  %v4113_v41 = vmul.f32 0.001953125, %v1923_v46 }
 0xc04   :  { %v2003_v17 = vpop.xlane.xlu1 %2002 }
 0xc05   :  { %v2094_v48 = vadd.f32 1e-05, %v2054_v3  ;;  %v2053_v13 = vmax.f32 %v2045_v29, 0.0  ;;  %v2031_v40 = vmul.f32 0.001953125, %v2003_v17  ;;  %v2039_v38 = vmul.f32 %v4113_v41, %v4113_v41 }
 0xc06   :  { %v1928_v6 = vpop.xlane.xlu0 %1927 }
 0xc07   :  { %2445 = vrsqrt.f32 %v2094_v48  ;;  %v2093_v33 = vadd.f32 1e-05, %v2053_v13  ;;  %v2047_v53 = vsub.f32 %v2031_v40, %v2039_v38  ;;  %v4125_v2 = vmul.f32 0.001953125, %v1928_v6 }
 0xc09   :  { %2447 = vrsqrt.f32 %v2093_v33  ;;  %v2055_v55 = vmax.f32 %v2047_v53, 0.0  ;;  %v2040_v17 = vmul.f32 %v4125_v2, %v4125_v2  ;;  %v1893_v53 = vld [vmem:[%s4449_s9] sm:$0xff] }
 0xc0a   :  { %v2008_v21 = vpop.xlane.xlu0 %2007  ;;  %v1933_v61 = vpop.xlane.xlu1 %1932 }
 0xc0b   :  { %v2095_v29 = vadd.f32 1e-05, %v2055_v55  ;;  %v2032_v48 = vmul.f32 0.001953125, %v2008_v21  ;;  %v4137_v13 = vmul.f32 0.001953125, %v1933_v61 }
 0xc0d   :  { %2449 = vrsqrt.f32 %v2095_v29  ;;  %v2048_v40 = vsub.f32 %v2032_v48, %v2040_v17  ;;  %v2041_v21 = vmul.f32 %v4137_v13, %v4137_v13  ;;  %v1894_v17 = vld [vmem:[%s4449_s9 + $0x8] sm:$0xff] }
 0xc0e   :  { %v2013_v6 = vpop.xlane.xlu1 %2012 }
 0xc0f   :  { %v2056_v3 = vmax.f32 %v2048_v40, 0.0  ;;  %v2033_v61 = vmul.f32 0.001953125, %v2013_v6  ;;  %v1938_v29 = vpop.xlane.xlu0 %1937 }
 0xc10   :  { %v4152_v48 = vmul.f32 0.001953125, %v1938_v29 }
 0xc11   :  { %v2446_v38 = vpop.eup %2445  ;;  %v2096_v33 = vadd.f32 1e-05, %v2056_v3  ;;  %v2049_v46 = vsub.f32 %v2033_v61, %v2041_v21 }
 0xc12   :  { %v1943_v55 = vpop.xlane.xlu1 %1942  ;;  %v2110_v40 = vmul.f32 %v2446_v38, %v1894_v17  ;;  %v2042_v21 = vmul.f32 %v4152_v48, %v4152_v48 }
 0xc13   :  { %v2448_v63 = vpop.eup %2447  ;;  %2451 = vrsqrt.f32 %v2096_v33  ;;  %v2057_v36 = vmax.f32 %v2049_v46, 0.0  ;;  %v2018_v29 = vpop.xlane.xlu0 %2017  ;;  %v4161_v31 = vmul.f32 0.001953125, %v1943_v55  ;;  %v1895_v46 = vld [vmem:[%s4449_s9 + $0x10] sm:$0xff] }
 0xc14   :  { %v2034_v61 = vmul.f32 0.001953125, %v2018_v29  ;;  %2124 = vperm.xlu0 %2426, %v2110_v40   ;;  %v2109_v38 = vmul.f32 %v2448_v63, %v1893_v53 }
 0xc15   :  { %v2097_v15 = vadd.f32 1e-05, %v2057_v36  ;;  %v2043_v40 = vmul.f32 %v4161_v31, %v4161_v31 }
 0xc16   :  { %v2050_v3 = vsub.f32 %v2034_v61, %v2042_v21  ;;  %2119 = vperm.xlu1 %2425, %v2109_v38   ;;  %v2023_v6 = vpop.xlane.xlu1 %2022 }
 0xc17   :  { %v2450_v36 = vpop.eup %2449  ;;  %2453 = vrsqrt.f32 %v2097_v15  ;;  %v2035_v29 = vmul.f32 0.001953125, %v2023_v6  ;;  %v1948_v17 = vpop.xlane.xlu0 %1947  ;;  %v1896_v6 = vld [vmem:[%s4449_s9 + $0x18] sm:$0xff] }
 0xc18   :  { %v2058_v33 = vmax.f32 %v2050_v3, 0.0  ;;  %v4182_v57 = vmul.f32 0.001953125, %v1948_v17  ;;  %v2111_v55 = vmul.f32 %v2450_v36, %v1895_v46 }
 0xc19   :  { %v2051_v21 = vsub.f32 %v2035_v29, %v2043_v40 }
 0xc1a   :  { %v2098_v61 = vadd.f32 1e-05, %v2058_v33  ;;  %2129 = vperm.xlu1 %2425, %v2111_v55   ;;  %v2044_v46 = vmul.f32 %v4182_v57, %v4182_v57 }
 0xc1b   :  { %v2059_v63 = vmax.f32 %v2051_v21, 0.0  ;;  %v2028_v15 = vpop.xlane.xlu0 %2027  ;;  %v1897_v21 = vld [vmem:[%s4449_s9 + $0x20] sm:$0xff] }
 0xc1c   :  { %2455 = vrsqrt.f32 %v2098_v61  ;;  %v2036_v33 = vmul.f32 0.001953125, %v2028_v15  ;;  %v1898_v61 = vld [vmem:[%s4449_s9 + $0x28] sm:$0xff] }
 0xc1d   :  { %v2452_v55 = vpop.eup %2451  ;;  %v2099_v36 = vadd.f32 1e-05, %v2059_v63 }
 0xc1e   :  { %v2052_v40 = vsub.f32 %v2036_v33, %v2044_v46  ;;  %v2112_v29 = vmul.f32 %v2452_v55, %v1896_v6  ;;  %v1899_v6 = vld [vmem:[%s4449_s9 + $0x30] sm:$0xff]  ;;  %v1908_v55 = vld [vmem:[%s4450_s10 + $0x38] sm:$0xff] }
 0xc1f   :  { %2457 = vrsqrt.f32 %v2099_v36 }
 0xc20   :  { %v2060_v53 = vmax.f32 %v2052_v40, 0.0  ;;  %2134 = vperm.xlu1 %2425, %v2112_v29   ;;  %v2197_v40 = vpop.permute.xlu1 %2196 }
 0xc21   :  { %v2454_v3 = vpop.eup %2453 }
 0xc22   :  { %v2100_v38 = vadd.f32 1e-05, %v2060_v53  ;;  %v2113_v10 = vmul.f32 %v2454_v3, %v1897_v21  ;;  %v1900_v53 = vld [vmem:[%s4449_s9 + $0x38] sm:$0xff] }
 0xc23   :  { %v2192_v36 = vpop.permute.xlu0 %2191 }
 0xc24   :  { %2459 = vrsqrt.f32 %v2100_v38  ;;  %2139 = vperm.xlu0 %2426, %v2113_v10   ;;  %v1907_v10 = vld [vmem:[%s4450_s10 + $0x30] sm:$0xff]  ;;  %v4215_v21 = vpop.permute.xlu1 %2206 }
 0xc26   :  { %v2456_v15 = vpop.eup %2455 }
 0xc27   :  { %v2114_v63 = vmul.f32 %v2456_v15, %v1898_v61  ;;  %v2202_v29 = vpop.permute.xlu0 %2201 }
 0xc28   :  { %v4219_v15 = vpop.permute.xlu1 %2216 }
 0xc29   :  { %v2458_v46 = vpop.eup %2457  ;;  %2144 = vperm.xlu1 %2425, %v2114_v63  }
 0xc2a   :  { %v2115_v33 = vmul.f32 %v2458_v46, %v1899_v6 }
 0xc2b   :  { %v4217_v61 = vpop.permute.xlu0 %2211 }
 0xc2c   :  { %2149 = vperm.xlu0 %2426, %v2115_v33  }
 0xc2e   :  { %v2460_v38 = vpop.eup %2459 }
 0xc2f   :  { %v2116_v3 = vmul.f32 %v2460_v38, %v1900_v53 }
 0xc30   :  { %2221 = vperm.xlu0 %2426, %v1907_v10  }
 0xc31   :  { %2154 = vperm.xlu1 %2425, %v2116_v3  }
 0xc35   :  { %2226 = vperm.xlu1 %2425, %v1908_v55  }
 0xc93   :  { %v2125_v63 = vpop.permute.xlu0 %2124 }
 0xc94   :  { %v2161_v6 = vmul.f32 %v2125_v63, %v2065_v42  ;;  %v2162_v46 = vmul.f32 %v2125_v63, %v2066_v11  ;;  %v2163_v33 = vmul.f32 %v2125_v63, %v2067_v12  ;;  %v2164_v53 = vmul.f32 %v2125_v63, %v2068_v23 }
 0xc95   :  { %v2120_v10 = vpop.permute.xlu1 %2119 }
 0xc96   :  { %v2233_v38 = vadd.f32 %v2197_v40, %v2161_v6  ;;  %v2234_v3 = vadd.f32 %v2197_v40, %v2162_v46  ;;  %v2235_v55 = vadd.f32 %v2197_v40, %v2163_v33  ;;  %v2236_v17 = vadd.f32 %v2197_v40, %v2164_v53  ;;  %v2493_v46 = vld [vmem:[%s4440_s0] sm:$0xff]  ;;  %v2494_v53 = vld [vmem:[%s4440_s0 + $0x8] sm:$0xff] }
 0xc97   :  { %v2157_v62 = vmul.f32 %v2120_v10, %v2061_v37  ;;  %v2158_v51 = vmul.f32 %v2120_v10, %v2062_v54  ;;  %v2159_v22 = vmul.f32 %v2120_v10, %v2063_v39  ;;  %v2160_v52 = vmul.f32 %v2120_v10, %v2064_v43 }
 0xc98   :  { %v2265_v42 = vadd.f32 %v2489_v14, %v2233_v38  ;;  %v2266_v37 = vadd.f32 %v2490_v44, %v2234_v3  ;;  %v2267_v20 = vadd.f32 %v2491_v16, %v2235_v55  ;;  %v2268_v50 = vadd.f32 %v2492_v49, %v2236_v17  ;;  %v2495_v17 = vld [vmem:[%s4440_s0 + $0x10] sm:$0xff]  ;;  %v2496_v38 = vld [vmem:[%s4440_s0 + $0x18] sm:$0xff] }
 0xc99   :  { %v2229_v54 = vadd.f32 %v2192_v36, %v2157_v62  ;;  %v2230_v39 = vadd.f32 %v2192_v36, %v2158_v51  ;;  %v2231_v43 = vadd.f32 %v2192_v36, %v2159_v22  ;;  %v2232_v11 = vadd.f32 %v2192_v36, %v2160_v52  ;;  %v2130_v12 = vpop.permute.xlu1 %2129 }
 0xc9a   :  { %v2297_v23 = vmax.f32 %v2265_v42, 0.0  ;;  %v2298_v40 = vmax.f32 %v2266_v37, 0.0  ;;  %v2299_v63 = vmax.f32 %v2267_v20, 0.0  ;;  %v2300_v6 = vmax.f32 %v2268_v50, 0.0 }
 0xc9b   :  { %v2261_v33 = vadd.f32 %v2493_v46, %v2229_v54  ;;  %v2262_v10 = vadd.f32 %v2494_v53, %v2230_v39  ;;  %v2263_v36 = vadd.f32 %v2495_v17, %v2231_v43  ;;  %v2264_v3 = vadd.f32 %v2496_v38, %v2232_v11  ;;  %v2499_v11 = vld [vmem:[%s4440_s0 + $0x50] sm:$0xff] }
 0xc9c   :  { %2329 = vst [vmem:[#allocation5 + $0x20] sm:$0xff] %v2297_v23  ;;  %2330 = vst [vmem:[#allocation5 + $0x28] sm:$0xff] %v2298_v40  ;;  %v4506_v55 = vsub.f32 %v3951_v5, %v4113_v41  ;;  %v4507_v51 = vsub.f32 %v3957_v35, %v4113_v41  ;;  %v4508_v52 = vsub.f32 %v3953_v27, %v4113_v41  ;;  %v2497_v27 = vld [vmem:[%s4440_s0 + $0x40] sm:$0xff] }
 0xc9d   :  { %2331 = vst [vmem:[#allocation5 + $0x30] sm:$0xff] %v2299_v63  ;;  %2332 = vst [vmem:[#allocation5 + $0x38] sm:$0xff] %v2300_v6  ;;  %v4509_v42 = vsub.f32 %v3959_v32, %v4113_v41  ;;  %v2293_v37 = vmax.f32 %v2261_v33, 0.0  ;;  %v2294_v16 = vmax.f32 %v2262_v10, 0.0  ;;  %v2295_v20 = vmax.f32 %v2263_v36, 0.0  ;;  %v2498_v32 = vld [vmem:[%s4440_s0 + $0x48] sm:$0xff] }
 0xc9e   :  { %v2165_v62 = vmul.f32 %v2130_v12, %v4506_v55  ;;  %v2166_v22 = vmul.f32 %v2130_v12, %v4507_v51  ;;  %v2167_v14 = vmul.f32 %v2130_v12, %v4508_v52  ;;  %v2296_v49 = vmax.f32 %v2264_v3, 0.0 }
 0xc9f   :  { %v2168_v44 = vmul.f32 %v2130_v12, %v4509_v42  ;;  %2325 = vst [vmem:[#allocation5] sm:$0xff] %v2293_v37  ;;  %2326 = vst [vmem:[#allocation5 + $0x8] sm:$0xff] %v2294_v16  ;;  %v2135_v35 = vpop.permute.xlu1 %2134  ;;  %v2500_v12 = vld [vmem:[%s4440_s0 + $0x58] sm:$0xff]  ;;  %v4510_v40 = vsub.f32 %v3967_v1, %v4125_v2  ;;  %v4511_v6 = vsub.f32 %v3973_v30, %v4125_v2  ;;  %v2501_v37 = vld [vmem:[%s4440_s0 + $0x60] sm:$0xff] }
 0xca0   :  { %v2237_v50 = vadd.f32 %v2202_v29, %v2165_v62  ;;  %v2238_v54 = vadd.f32 %v2202_v29, %v2166_v22  ;;  %v2239_v5 = vadd.f32 %v2202_v29, %v2167_v14  ;;  %2327 = vst [vmem:[#allocation5 + $0x10] sm:$0xff] %v2295_v20  ;;  %2328 = vst [vmem:[#allocation5 + $0x18] sm:$0xff] %v2296_v49 }
 0xca1   :  { %v2240_v39 = vadd.f32 %v2202_v29, %v2168_v44  ;;  %v2169_v63 = vmul.f32 %v2135_v35, %v4510_v40  ;;  %v2170_v46 = vmul.f32 %v2135_v35, %v4511_v6  ;;  %v4512_v33 = vsub.f32 %v3969_v59, %v4125_v2 }
 0xca2   :  { %v2269_v43 = vadd.f32 %v2497_v27, %v2237_v50  ;;  %v2270_v41 = vadd.f32 %v2498_v32, %v2238_v54  ;;  %v2271_v29 = vadd.f32 %v2499_v11, %v2239_v5  ;;  %v4513_v10 = vsub.f32 %v3975_v45, %v4125_v2  ;;  %v2505_v32 = vld [vmem:[%s4440_s0 + $0x80] sm:$0xff]  ;;  %v2506_v11 = vld [vmem:[%s4440_s0 + $0x88] sm:$0xff] }
 0xca3   :  { %v2272_v23 = vadd.f32 %v2500_v12, %v2240_v39  ;;  %v2171_v53 = vmul.f32 %v2135_v35, %v4512_v33  ;;  %v2241_v62 = vadd.f32 %v4215_v21, %v2169_v63  ;;  %v2242_v1 = vadd.f32 %v4215_v21, %v2170_v46  ;;  %v2140_v22 = vpop.permute.xlu0 %2139  ;;  %v2507_v12 = vld [vmem:[%s4440_s0 + $0x90] sm:$0xff] }
 0xca4   :  { %v2172_v17 = vmul.f32 %v2135_v35, %v4513_v10  ;;  %v2301_v36 = vmax.f32 %v2269_v43, 0.0  ;;  %v2302_v38 = vmax.f32 %v2270_v41, 0.0  ;;  %v2303_v3 = vmax.f32 %v2271_v29, 0.0 }
 0xca5   :  { %v2304_v55 = vmax.f32 %v2272_v23, 0.0  ;;  %v2243_v51 = vadd.f32 %v4215_v21, %v2171_v53  ;;  %v4514_v59 = vsub.f32 %v3991_v28, %v4137_v13  ;;  %v4515_v2 = vsub.f32 %v3997_v56, %v4137_v13  ;;  %v2502_v28 = vld [vmem:[%s4440_s0 + $0x68] sm:$0xff]  ;;  %v2503_v56 = vld [vmem:[%s4440_s0 + $0x70] sm:$0xff] }
 0xca6   :  { %v2244_v30 = vadd.f32 %v4215_v21, %v2172_v17  ;;  %2333 = vst [vmem:[#allocation5 + $0x40] sm:$0xff] %v2301_v36  ;;  %2334 = vst [vmem:[#allocation5 + $0x48] sm:$0xff] %v2302_v38  ;;  %v4516_v14 = vsub.f32 %v3993_v60, %v4137_v13  ;;  %v4517_v21 = vsub.f32 %v3999_v7, %v4137_v13  ;;  %v2504_v7 = vld [vmem:[%s4440_s0 + $0x78] sm:$0xff] }
 0xca7   :  { %2335 = vst [vmem:[#allocation5 + $0x50] sm:$0xff] %v2303_v3  ;;  %2336 = vst [vmem:[#allocation5 + $0x58] sm:$0xff] %v2304_v55  ;;  %v2173_v45 = vmul.f32 %v2140_v22, %v4514_v59  ;;  %v2174_v52 = vmul.f32 %v2140_v22, %v4515_v2  ;;  %v2273_v16 = vadd.f32 %v2501_v37, %v2241_v62  ;;  %v2512_v2 = vld [vmem:[%s4440_s0 + $0xb8] sm:$0xff] }
 0xca8   :  { %v2175_v42 = vmul.f32 %v2140_v22, %v4516_v14  ;;  %v2176_v44 = vmul.f32 %v2140_v22, %v4517_v21  ;;  %v2274_v20 = vadd.f32 %v2502_v28, %v2242_v1  ;;  %v2275_v60 = vadd.f32 %v2503_v56, %v2243_v51  ;;  %v2145_v63 = vpop.permute.xlu1 %2144 }
 0xca9   :  { %v2276_v13 = vadd.f32 %v2504_v7, %v2244_v30  ;;  %v2245_v49 = vadd.f32 %v4217_v61, %v2173_v45  ;;  %v2246_v50 = vadd.f32 %v4217_v61, %v2174_v52  ;;  %v2305_v39 = vmax.f32 %v2273_v16, 0.0  ;;  %v2511_v45 = vld [vmem:[%s4440_s0 + $0xb0] sm:$0xff] }
 0xcaa   :  { %v2247_v54 = vadd.f32 %v4217_v61, %v2175_v42  ;;  %v2248_v5 = vadd.f32 %v4217_v61, %v2176_v44  ;;  %v2306_v35 = vmax.f32 %v2274_v20, 0.0  ;;  %v2307_v27 = vmax.f32 %v2275_v60, 0.0  ;;  %v2508_v61 = vld [vmem:[%s4440_s0 + $0x98] sm:$0xff] }
 0xcab   :  { %v2308_v43 = vmax.f32 %v2276_v13, 0.0  ;;  %v2277_v41 = vadd.f32 %v2505_v32, %v2245_v49  ;;  %v2278_v29 = vadd.f32 %v2506_v11, %v2246_v50  ;;  %2337 = vst [vmem:[#allocation5 + $0x60] sm:$0xff] %v2305_v39  ;;  %v4518_v6 = vsub.f32 %v4005_v8, %v4152_v48  ;;  %v2150_v22 = vpop.permute.xlu0 %2149 }
 0xcac   :  { %v2279_v23 = vadd.f32 %v2507_v12, %v2247_v54  ;;  %v2280_v40 = vadd.f32 %v2508_v61, %v2248_v5  ;;  %2338 = vst [vmem:[#allocation5 + $0x68] sm:$0xff] %v2306_v35  ;;  %2339 = vst [vmem:[#allocation5 + $0x70] sm:$0xff] %v2307_v27  ;;  %v4519_v33 = vsub.f32 %v4013_v4, %v4152_v48  ;;  %v2515_v35 = vld [vmem:[%s4440_s0 + $0xd0] sm:$0xff] }
 0xcad   :  { %2340 = vst [vmem:[#allocation5 + $0x78] sm:$0xff] %v2308_v43  ;;  %v2177_v46 = vmul.f32 %v2145_v63, %v4518_v6  ;;  %v4520_v10 = vsub.f32 %v4009_v18, %v4152_v48  ;;  %v4521_v36 = vsub.f32 %v4019_v47, %v4152_v48  ;;  %v2309_v3 = vmax.f32 %v2277_v41, 0.0  ;;  %v2509_v18 = vld [vmem:[%s4440_s0 + $0xa0] sm:$0xff]  ;;  %v2510_v48 = vld [vmem:[%s4440_s0 + $0xa8] sm:$0xff]  ;;  %v2516_v43 = vld [vmem:[%s4440_s0 + $0xd8] sm:$0xff] }
 0xcae   :  { %v2178_v53 = vmul.f32 %v2145_v63, %v4519_v33  ;;  %v2310_v55 = vmax.f32 %v2278_v29, 0.0  ;;  %v2311_v62 = vmax.f32 %v2279_v23, 0.0  ;;  %v2312_v1 = vmax.f32 %v2280_v40, 0.0 }
 0xcaf   :  { %v2179_v17 = vmul.f32 %v2145_v63, %v4520_v10  ;;  %v2180_v38 = vmul.f32 %v2145_v63, %v4521_v36  ;;  %v2249_v51 = vadd.f32 %v4219_v15, %v2177_v46  ;;  %2341 = vst [vmem:[#allocation5 + $0x80] sm:$0xff] %v2309_v3  ;;  %v4522_v14 = vsub.f32 %v4031_v34, %v4161_v31  ;;  %v2222_v49 = vpop.permute.xlu0 %2221  ;;  %v2519_v3 = vld [vmem:[%s4440_s0 + $0xf0] sm:$0xff] }
 0xcb0   :  { %v2250_v8 = vadd.f32 %v4219_v15, %v2178_v53  ;;  %2342 = vst [vmem:[#allocation5 + $0x88] sm:$0xff] %v2310_v55  ;;  %2343 = vst [vmem:[#allocation5 + $0x90] sm:$0xff] %v2311_v62  ;;  %v4523_v21 = vsub.f32 %v4037_v25, %v4161_v31  ;;  %v4524_v37 = vsub.f32 %v4033_v26, %v4161_v31  ;;  %v2155_v50 = vpop.permute.xlu1 %2154  ;;  %v2513_v26 = vld [vmem:[%s4440_s0 + $0xc0] sm:$0xff]  ;;  %v2520_v62 = vld [vmem:[%s4440_s0 + $0xf8] sm:$0xff] }
 0xcb1   :  { %v2251_v30 = vadd.f32 %v4219_v15, %v2179_v17  ;;  %v2252_v4 = vadd.f32 %v4219_v15, %v2180_v38  ;;  %2344 = vst [vmem:[#allocation5 + $0x98] sm:$0xff] %v2312_v1  ;;  %v2281_v47 = vadd.f32 %v2509_v18, %v2249_v51  ;;  %v2181_v42 = vmul.f32 %v2150_v22, %v4522_v14 }
 0xcb2   :  { %v2282_v59 = vadd.f32 %v2510_v48, %v2250_v8  ;;  %v2182_v44 = vmul.f32 %v2150_v22, %v4523_v21  ;;  %v2183_v16 = vmul.f32 %v2150_v22, %v4524_v37  ;;  %v4525_v28 = vsub.f32 %v4039_v0, %v4161_v31  ;;  %v2514_v0 = vld [vmem:[%s4440_s0 + $0xc8] sm:$0xff] }
 0xcb3   :  { %v2283_v15 = vadd.f32 %v2511_v45, %v2251_v30  ;;  %v2284_v52 = vadd.f32 %v2512_v2, %v2252_v4  ;;  %v2313_v56 = vmax.f32 %v2281_v47, 0.0  ;;  %v2253_v34 = vadd.f32 %v2222_v49, %v2181_v42 }
 0xcb4   :  { %v2184_v20 = vmul.f32 %v2150_v22, %v4525_v28  ;;  %v2314_v60 = vmax.f32 %v2282_v59, 0.0  ;;  %v2254_v54 = vadd.f32 %v2222_v49, %v2182_v44  ;;  %v2255_v5 = vadd.f32 %v2222_v49, %v2183_v16  ;;  %v2227_v10 = vpop.permute.xlu1 %2226 }
 0xcb5   :  { %v2315_v7 = vmax.f32 %v2283_v15, 0.0  ;;  %v2316_v13 = vmax.f32 %v2284_v52, 0.0  ;;  %2345 = vst [vmem:[#allocation5 + $0xa0] sm:$0xff] %v2313_v56  ;;  %v2285_v25 = vadd.f32 %v2513_v26, %v2253_v34  ;;  %v4526_v41 = vsub.f32 %v4045_v9, %v4182_v57 }
 0xcb6   :  { %v2256_v39 = vadd.f32 %v2222_v49, %v2184_v20  ;;  %2346 = vst [vmem:[#allocation5 + $0xa8] sm:$0xff] %v2314_v60  ;;  %v2286_v31 = vadd.f32 %v2514_v0, %v2254_v54  ;;  %v2287_v27 = vadd.f32 %v2515_v35, %v2255_v5  ;;  %v4527_v29 = vsub.f32 %v4053_v19, %v4182_v57 }
 0xcb7   :  { %2347 = vst [vmem:[#allocation5 + $0xb0] sm:$0xff] %v2315_v7  ;;  %2348 = vst [vmem:[#allocation5 + $0xb8] sm:$0xff] %v2316_v13  ;;  %v2185_v11 = vmul.f32 %v2155_v50, %v4526_v41  ;;  %v4528_v23 = vsub.f32 %v4049_v24, %v4182_v57  ;;  %v4529_v40 = vsub.f32 %v4059_v58, %v4182_v57  ;;  %v2317_v6 = vmax.f32 %v2285_v25, 0.0  ;;  %v2517_v24 = vld [vmem:[%s4440_s0 + $0xe0] sm:$0xff]  ;;  %v2518_v58 = vld [vmem:[%s4440_s0 + $0xe8] sm:$0xff] }
 0xcb8   :  { %v2288_v32 = vadd.f32 %v2516_v43, %v2256_v39  ;;  %v2186_v12 = vmul.f32 %v2155_v50, %v4527_v29  ;;  %v2318_v46 = vmax.f32 %v2286_v31, 0.0  ;;  %v2319_v33 = vmax.f32 %v2287_v27, 0.0 }
 0xcb9   :  { %v2187_v61 = vmul.f32 %v2155_v50, %v4528_v23  ;;  %v2188_v63 = vmul.f32 %v2155_v50, %v4529_v40  ;;  %v2257_v17 = vadd.f32 %v2227_v10, %v2185_v11  ;;  %2349 = vst [vmem:[#allocation5 + $0xc0] sm:$0xff] %v2317_v6 }
 0xcba   :  { %v2320_v53 = vmax.f32 %v2288_v32, 0.0  ;;  %v2258_v9 = vadd.f32 %v2227_v10, %v2186_v12  ;;  %2350 = vst [vmem:[#allocation5 + $0xc8] sm:$0xff] %v2318_v46  ;;  %2351 = vst [vmem:[#allocation5 + $0xd0] sm:$0xff] %v2319_v33 }
 0xcbb   :  { %v2259_v36 = vadd.f32 %v2227_v10, %v2187_v61  ;;  %v2260_v38 = vadd.f32 %v2227_v10, %v2188_v63  ;;  %v2289_v19 = vadd.f32 %v2517_v24, %v2257_v17 }
 0xcbc   :  { %2352 = vst [vmem:[#allocation5 + $0xd8] sm:$0xff] %v2320_v53  ;;  %v2290_v57 = vadd.f32 %v2518_v58, %v2258_v9 }
 0xcbd   :  { %v2291_v55 = vadd.f32 %v2519_v3, %v2259_v36  ;;  %v2292_v1 = vadd.f32 %v2520_v62, %v2260_v38  ;;  %v2321_v51 = vmax.f32 %v2289_v19, 0.0 }
 0xcbe   :  { %v2322_v8 = vmax.f32 %v2290_v57, 0.0 }
 0xcbf   :  { %v2323_v30 = vmax.f32 %v2291_v55, 0.0  ;;  %v2324_v4 = vmax.f32 %v2292_v1, 0.0  ;;  %2353 = vst [vmem:[#allocation5 + $0xe0] sm:$0xff] %v2321_v51 }
 0xcc0   :  { %2354 = vst [vmem:[#allocation5 + $0xe8] sm:$0xff] %v2322_v8 }
 0xcc1   :  { %2355 = vst [vmem:[#allocation5 + $0xf0] sm:$0xff] %v2323_v30  ;;  %2356 = vst [vmem:[#allocation5 + $0xf8] sm:$0xff] %v2324_v4 }
 0xcc2   :  { %2554 = shalt.err (!%p2551_p12)
}
 0xcc3   :  { %s2555_s0 = scalar_lea.hbm %s4451_s11, 4096 }
 0xcc4   :  { %p2556_p13 = scmp.ne.s32.totalorder %s4451_s11, %s2555_s0  ;;  %p2559_p0 = scmp.lt.u32.totalorder %s2555_s0, %s4451_s11 }
 0xcc6   :  { %p2561_p1 = pnand %p2559_p0, %p2556_p13 }
 0xcc8   :  { %2564 = shalt.err (!%p2561_p1)
}
 0xcc9   :  { %2368 = dma.vmem_to_hbm [thread:$0]  %s2363_s23, 4096, %s4451_s11, [#allocation4], %s2570_s27, %s2570_s27, %s2571_s28  }
 0xcca   :  { %2567 = dma.done.wait [#allocation4], 4096  }
 0xccb   :  { %2568 = vsyncadd [#allocation4], 4294963200 }
 0xccc   :  { %2372 = vsyncpa [#allocation3], 1 }
 0xccd   :  { %2373 = vsyncpa [#allocation4], 1 }

</bundles_post_ra>
